<compile_context>
chip_gen: v5e
topology: v5e:2x2
jax: 0.10.0
libtpu: 0.0.40
codegen_flags: <defaults>
</compile_context>

<pallas_src>
import functools

import jax
import jax.numpy as jnp
from jax import lax
from jax.experimental import pallas as pl
from jax.experimental.pallas import tpu as pltpu

_EPS = 1e-5


# --------------------------------- kernel -----------------------------------

def _unet_fused_kernel(x_ref, w1_ref, b1_ref, w2_ref, b2_ref, wf_ref, bf_ref,
                       o_ref,
                       pad1_scr, pad2_scr, patch_scr, act1_scr, act2_scr,
                       *, H, W, off):
    """Whole UNet(n_blocks=1) forward in one program, channel-major in VMEM.

    x_ref  : (N, 1, H*W)  float32, row-flattened images
    w1_ref : (C, 9)        conv1 weights, column t = ky*3+kx
    b1_ref : (C, 1)
    w2_ref : (C, 9*C)      conv2 weights, column t*C + ci
    b2_ref : (C, 1)
    wf_ref : (Cout, C)     final 1x1 conv weights
    bf_ref : (Cout, 1)
    o_ref  : (N, Cout, H*W)

    pad1_scr  : (1, Lpad)   zero-haloed flat padded input image
    pad2_scr  : (C, Lpad)   zero-haloed flat padded BN1 output (per image)
    patch_scr : (9*C, H*W)  explicit im2col buffer for conv2
    act1_scr  : (C, N*H*W)  conv1+ReLU output (whole batch, for BN1 stats)
    act2_scr  : (C, N*H*W)  conv2+ReLU output (whole batch, for BN2 stats)

    Flat padded layout: padded row r (0..H+1) occupies lanes
    [off + r*W, off + (r+1)*W); the image interior starts at lane off+W, which
    is a multiple of 128 (aligned interior stores).  Tap (ky,kx) of output
    pixel p is lane  off + ky*W + (kx-1) + p  — a static lane slice.
    """
    N = x_ref.shape[0]
    C = w2_ref.shape[0]
    HW = H * W
    cnt = float(N * HW)
    interior = off + W                      # 128-aligned lane offset

    # Lane masks killing horizontal wrap-around of the row-flattened layout
    # (zero-padding columns of the 'same' convolution).  Computed once.
    col = lax.rem(lax.broadcasted_iota(jnp.int32, (1, HW), 1), W)
    left_ok = (col != 0).astype(jnp.float32)        # needed for kx == 0 taps
    right_ok = (col != W - 1).astype(jnp.float32)   # needed for kx == 2 taps

    def tap_slice(ref, ky, kx):
        s = off + ky * W + kx - 1                   # static lane offset
        v = ref[:, s:s + HW]
        if kx == 0:
            v = v * left_ok
        elif kx == 2:
            v = v * right_ok
        return v

    # Zero the halos once; interiors are fully overwritten for every image.
    pad1_scr[...] = jnp.zeros(pad1_scr.shape, jnp.float32)
    pad2_scr[...] = jnp.zeros(pad2_scr.shape, jnp.float32)

    # ---- stage 1: conv1 (3x3, Cin=1) + bias + ReLU — VPU broadcast MAC ----
    for n in range(N):
        pad1_scr[:, interior:interior + HW] = x_ref[n]          # (1, HW)
        acc = jnp.zeros((C, HW), jnp.float32)
        for ky in range(3):
            for kx in range(3):
                t = ky * 3 + kx
                row = tap_slice(pad1_scr, ky, kx)                # (1, HW)
                acc = acc + w1_ref[:, t:t + 1] * row             # (C,1)*(1,HW)
        act1_scr[:, n * HW:(n + 1) * HW] = jnp.maximum(acc + b1_ref[...], 0.0)

    # ---- BatchNorm1: training-mode batch stats, gamma=1, beta=0 ----
    a1 = act1_scr[...]
    mean1 = jnp.sum(a1, axis=1, keepdims=True) * (1.0 / cnt)     # (C, 1)
    d1 = a1 - mean1
    var1 = jnp.sum(d1 * d1, axis=1, keepdims=True) * (1.0 / cnt)
    inv1 = lax.rsqrt(var1 + _EPS)

    # ---- stage 2: BN1-normalize + conv2 (3x3) + bias + ReLU, per image ----
    # The zero halo stays zero, exactly matching PyTorch's zero padding of the
    # BatchNorm output.
    for n in range(N):
        pad2_scr[:, interior:interior + HW] = (
            (act1_scr[:, n * HW:(n + 1) * HW] - mean1) * inv1)
        # Explicit im2col: 9 aligned (C, HW) stores into the patch buffer.
        for ky in range(3):
            for kx in range(3):
                t = ky * 3 + kx
                patch_scr[t * C:(t + 1) * C, :] = tap_slice(pad2_scr, ky, kx)
        # One MXU matmul, HW on the output columns (lane-dense result).
        # (default matmul precision; pass precision=HIGHEST / bf16 operands to
        #  trade exact-fp32 fidelity vs. MXU throughput.)
        conv = jnp.dot(w2_ref[...], patch_scr[...],
                       preferred_element_type=jnp.float32)        # (C, HW)
        act2_scr[:, n * HW:(n + 1) * HW] = jnp.maximum(conv + b2_ref[...], 0.0)

    # ---- BatchNorm2 ----
    a2 = act2_scr[...]
    mean2 = jnp.sum(a2, axis=1, keepdims=True) * (1.0 / cnt)
    d2 = a2 - mean2
    var2 = jnp.sum(d2 * d2, axis=1, keepdims=True) * (1.0 / cnt)
    inv2 = lax.rsqrt(var2 + _EPS)

    # ---- final 1x1 conv (Cout, C) x (C, HW) -> lane-dense (Cout, HW) ----
    for n in range(N):
        a2n = (act2_scr[:, n * HW:(n + 1) * HW] - mean2) * inv2
        y = jnp.dot(wf_ref[...], a2n, preferred_element_type=jnp.float32)
        o_ref[n] = y + bf_ref[...]


# --------------------------------- wrapper -----------------------------------

def unet_forward(x_nchw, params):
    """x_nchw: (N, 1, H, W) float32 -> (N, out_channels, H, W) float32."""
    N, Cin, H, W = x_nchw.shape
    assert Cin == 1, "kernel specialized for the UNet default in_channels=1"
    C = params["conv1_w"].shape[0]
    Cout = params["final_w"].shape[0]
    HW = H * W

    # Lane offset so the image interior (row 1 of the padded image) starts at
    # a multiple of 128; lane-padded length of the flat padded buffers.
    off = ((-W) % 128) or 128
    lpad = ((off + (H + 2) * W + 1 + 127) // 128) * 128

    x_cm = x_nchw.reshape(N, 1, HW).astype(jnp.float32)

    # Weight layouts (channel-major / flipped matmul orientation):
    w1 = params["conv1_w"].reshape(C, 9)                                  # (C, 9)
    w2 = jnp.transpose(params["conv2_w"], (0, 2, 3, 1)).reshape(C, 9 * C)  # col t*C+ci
    wf = params["final_w"].reshape(Cout, C)                               # (Cout, C)
    b1 = params["conv1_b"].reshape(C, 1)
    b2 = params["conv2_b"].reshape(C, 1)
    bf = params["final_b"].reshape(Cout, 1)

    kernel = functools.partial(_unet_fused_kernel, H=H, W=W, off=off)

    out = pl.pallas_call(
        kernel,
        out_shape=jax.ShapeDtypeStruct((N, Cout, HW), jnp.float32),
        scratch_shapes=[
            pltpu.VMEM((1, lpad), jnp.float32),        # pad1: flat padded input
            pltpu.VMEM((C, lpad), jnp.float32),        # pad2: flat padded BN1 out
            pltpu.VMEM((9 * C, HW), jnp.float32),      # conv2 im2col patches
            pltpu.VMEM((C, N * HW), jnp.float32),      # act1 (whole batch)
            pltpu.VMEM((C, N * HW), jnp.float32),      # act2 (whole batch)
        ],
    )(x_cm, w1, b1, w2, b2, wf, bf)

    # (N, Cout, H*W) is already channel-first: a pure reshape gives NCHW.
    return out.reshape(N, Cout, H, W)


# ----------------------------- parameter creation ----------------------------

def _xavier_uniform(key, shape):
    """nn.init.xavier_uniform_ for a conv weight of shape (Cout, Cin, kh, kw)."""
    cout, cin, kh, kw = shape
    fan_in, fan_out = cin * kh * kw, cout * kh * kw
    bound = (6.0 / (fan_in + fan_out)) ** 0.5
    return jax.random.uniform(key, shape, jnp.float32, -bound, bound)


def init_unet_params(key, in_channels=1, out_channels=2, start_filters=32):
    k1, k2, k3 = jax.random.split(key, 3)
    sf = start_filters
    return {
        "conv1_w": _xavier_uniform(k1, (sf, in_channels, 3, 3)),
        "conv1_b": jnp.zeros((sf,), jnp.float32),        # bias_init = zeros_
        "conv2_w": _xavier_uniform(k2, (sf, sf, 3, 3)),
        "conv2_b": jnp.zeros((sf,), jnp.float32),
        "final_w": _xavier_uniform(k3, (out_channels, sf, 1, 1)),
        "final_b": jnp.zeros((out_channels,), jnp.float32),
    }


# ----------------------------------- main ------------------------------------

if __name__ == "__main__":
    key = jax.random.PRNGKey(0)
    kx, kp = jax.random.split(key)
    # Small shapes consistent with UNet defaults: batch=2, in_channels=1, 16x16.
    x = jax.random.normal(kx, (2, 1, 16, 16), dtype=jnp.float32)
    params = init_unet_params(kp, in_channels=1, out_channels=2,
                              start_filters=32)

    fwd = jax.jit(unet_forward)
    out = jax.block_until_ready(fwd(x, params))

    assert out.shape == (2, 2, 16, 16), out.shape
    assert bool(jnp.all(jnp.isfinite(out)))
    print("KERNEL_OK")
</pallas_src>

<mosaic_0001>
module attributes {stable_mosaic.version = 11 : i64} {
  func.func @_unet_fused_kernel(%arg0: memref<2x1x256xf32, #tpu.memory_space<vmem>>, %arg1: memref<32x9xf32, #tpu.memory_space<vmem>>, %arg2: memref<32x1xf32, #tpu.memory_space<vmem>>, %arg3: memref<32x288xf32, #tpu.memory_space<vmem>>, %arg4: memref<32x1xf32, #tpu.memory_space<vmem>>, %arg5: memref<2x32xf32, #tpu.memory_space<vmem>>, %arg6: memref<2x1xf32, #tpu.memory_space<vmem>>, %arg7: memref<2x2x256xf32, #tpu.memory_space<vmem>>, %arg8: memref<1x512xf32, #tpu.memory_space<vmem>>, %arg9: memref<32x512xf32, #tpu.memory_space<vmem>>, %arg10: memref<288x256xf32, #tpu.memory_space<vmem>>, %arg11: memref<32x512xf32, #tpu.memory_space<vmem>>, %arg12: memref<32x512xf32, #tpu.memory_space<vmem>>) attributes {dimension_semantics = [], scalar_prefetch = 0 : i64, scratch_operands = 5 : i64, tpu.core_type = #tpu.core_type<tc>} {
    %0 = tpu.iota {dimensions = array<i32: 1>} : vector<1x256xi32>
    %c16_i32 = arith.constant 16 : i32
    %1 = vector.broadcast %c16_i32 : i32 to vector<1x256xi32>
    %2 = arith.remsi %0, %1 : vector<1x256xi32>
    %c0_i32 = arith.constant 0 : i32
    %3 = vector.broadcast %c0_i32 : i32 to vector<1x256xi32>
    %4 = arith.cmpi ne, %2, %3 : vector<1x256xi32>
    %5 = arith.extui %4 : vector<1x256xi1> to vector<1x256xi32>
    %6 = arith.sitofp %5 : vector<1x256xi32> to vector<1x256xf32>
    %c15_i32 = arith.constant 15 : i32
    %7 = vector.broadcast %c15_i32 : i32 to vector<1x256xi32>
    %8 = arith.cmpi ne, %2, %7 : vector<1x256xi32>
    %9 = arith.extui %8 : vector<1x256xi1> to vector<1x256xi32>
    %10 = arith.sitofp %9 : vector<1x256xi32> to vector<1x256xf32>
    %cst = arith.constant 0.000000e+00 : f32
    %11 = vector.broadcast %cst : f32 to vector<1x512xf32>
    %c0 = arith.constant 0 : index
    %c0_0 = arith.constant 0 : index
    %12 = vector.load %arg8[%c0, %c0_0] : memref<1x512xf32, #tpu.memory_space<vmem>>, vector<1x512xf32>
    tpu.vector_store %arg8[%c0, %c0_0], %11 {strides = array<i32>} : memref<1x512xf32, #tpu.memory_space<vmem>>, vector<1x512xf32>,
    %cst_1 = arith.constant 0.000000e+00 : f32
    %13 = vector.broadcast %cst_1 : f32 to vector<32x512xf32>
    %c0_2 = arith.constant 0 : index
    %c0_3 = arith.constant 0 : index
    %14 = vector.load %arg9[%c0_2, %c0_3] : memref<32x512xf32, #tpu.memory_space<vmem>>, vector<32x512xf32>
    tpu.vector_store %arg9[%c0_2, %c0_3], %13 {strides = array<i32>} : memref<32x512xf32, #tpu.memory_space<vmem>>, vector<32x512xf32>,
    %c0_4 = arith.constant 0 : index
    %c0_5 = arith.constant 0 : index
    %c0_6 = arith.constant 0 : index
    %15 = vector.load %arg0[%c0_4, %c0_5, %c0_6] : memref<2x1x256xf32, #tpu.memory_space<vmem>>, vector<1x1x256xf32>
    %16 = vector.shape_cast %15 : vector<1x1x256xf32> to vector<1x256xf32>
    %c0_7 = arith.constant 0 : index
    %c128 = arith.constant 128 : index
    %17 = vector.load %arg8[%c0_7, %c128] : memref<1x512xf32, #tpu.memory_space<vmem>>, vector<1x256xf32>
    tpu.vector_store %arg8[%c0_7, %c128], %16 {strides = array<i32>} : memref<1x512xf32, #tpu.memory_space<vmem>>, vector<1x256xf32>,
    %cst_8 = arith.constant 0.000000e+00 : f32
    %18 = vector.broadcast %cst_8 : f32 to vector<32x256xf32>
    %c0_9 = arith.constant 0 : index
    %c111 = arith.constant 111 : index
    %19 = vector.load %arg8[%c0_9, %c111] : memref<1x512xf32, #tpu.memory_space<vmem>>, vector<1x256xf32>
    %20 = arith.mulf %19, %6 : vector<1x256xf32>
    %c0_10 = arith.constant 0 : index
    %c0_11 = arith.constant 0 : index
    %21 = vector.load %arg1[%c0_10, %c0_11] : memref<32x9xf32, #tpu.memory_space<vmem>>, vector<32x1xf32>
    %22 = vector.broadcast %21 : vector<32x1xf32> to vector<32x256xf32>
    %23 = vector.broadcast %20 : vector<1x256xf32> to vector<32x256xf32>
    %24 = arith.mulf %22, %23 : vector<32x256xf32>
    %25 = arith.addf %18, %24 : vector<32x256xf32>
    %c0_12 = arith.constant 0 : index
    %c112 = arith.constant 112 : index
    %26 = vector.load %arg8[%c0_12, %c112] : memref<1x512xf32, #tpu.memory_space<vmem>>, vector<1x256xf32>
    %c0_13 = arith.constant 0 : index
    %c1 = arith.constant 1 : index
    %27 = vector.load %arg1[%c0_13, %c1] : memref<32x9xf32, #tpu.memory_space<vmem>>, vector<32x1xf32>
    %28 = vector.broadcast %27 : vector<32x1xf32> to vector<32x256xf32>
    %29 = vector.broadcast %26 : vector<1x256xf32> to vector<32x256xf32>
    %30 = arith.mulf %28, %29 : vector<32x256xf32>
    %31 = arith.addf %25, %30 : vector<32x256xf32>
    %c0_14 = arith.constant 0 : index
    %c113 = arith.constant 113 : index
    %32 = vector.load %arg8[%c0_14, %c113] : memref<1x512xf32, #tpu.memory_space<vmem>>, vector<1x256xf32>
    %33 = arith.mulf %32, %10 : vector<1x256xf32>
    %c0_15 = arith.constant 0 : index
    %c2 = arith.constant 2 : index
    %34 = vector.load %arg1[%c0_15, %c2] : memref<32x9xf32, #tpu.memory_space<vmem>>, vector<32x1xf32>
    %35 = vector.broadcast %34 : vector<32x1xf32> to vector<32x256xf32>
    %36 = vector.broadcast %33 : vector<1x256xf32> to vector<32x256xf32>
    %37 = arith.mulf %35, %36 : vector<32x256xf32>
    %38 = arith.addf %31, %37 : vector<32x256xf32>
    %c0_16 = arith.constant 0 : index
    %c127 = arith.constant 127 : index
    %39 = vector.load %arg8[%c0_16, %c127] : memref<1x512xf32, #tpu.memory_space<vmem>>, vector<1x256xf32>
    %40 = arith.mulf %39, %6 : vector<1x256xf32>
    %c0_17 = arith.constant 0 : index
    %c3 = arith.constant 3 : index
    %41 = vector.load %arg1[%c0_17, %c3] : memref<32x9xf32, #tpu.memory_space<vmem>>, vector<32x1xf32>
    %42 = vector.broadcast %41 : vector<32x1xf32> to vector<32x256xf32>
    %43 = vector.broadcast %40 : vector<1x256xf32> to vector<32x256xf32>
    %44 = arith.mulf %42, %43 : vector<32x256xf32>
    %45 = arith.addf %38, %44 : vector<32x256xf32>
    %c0_18 = arith.constant 0 : index
    %c128_19 = arith.constant 128 : index
    %46 = vector.load %arg8[%c0_18, %c128_19] : memref<1x512xf32, #tpu.memory_space<vmem>>, vector<1x256xf32>
    %c0_20 = arith.constant 0 : index
    %c4 = arith.constant 4 : index
    %47 = vector.load %arg1[%c0_20, %c4] : memref<32x9xf32, #tpu.memory_space<vmem>>, vector<32x1xf32>
    %48 = vector.broadcast %47 : vector<32x1xf32> to vector<32x256xf32>
    %49 = vector.broadcast %46 : vector<1x256xf32> to vector<32x256xf32>
    %50 = arith.mulf %48, %49 : vector<32x256xf32>
    %51 = arith.addf %45, %50 : vector<32x256xf32>
    %c0_21 = arith.constant 0 : index
    %c129 = arith.constant 129 : index
    %52 = vector.load %arg8[%c0_21, %c129] : memref<1x512xf32, #tpu.memory_space<vmem>>, vector<1x256xf32>
    %53 = arith.mulf %52, %10 : vector<1x256xf32>
    %c0_22 = arith.constant 0 : index
    %c5 = arith.constant 5 : index
    %54 = vector.load %arg1[%c0_22, %c5] : memref<32x9xf32, #tpu.memory_space<vmem>>, vector<32x1xf32>
    %55 = vector.broadcast %54 : vector<32x1xf32> to vector<32x256xf32>
    %56 = vector.broadcast %53 : vector<1x256xf32> to vector<32x256xf32>
    %57 = arith.mulf %55, %56 : vector<32x256xf32>
    %58 = arith.addf %51, %57 : vector<32x256xf32>
    %c0_23 = arith.constant 0 : index
    %c143 = arith.constant 143 : index
    %59 = vector.load %arg8[%c0_23, %c143] : memref<1x512xf32, #tpu.memory_space<vmem>>, vector<1x256xf32>
    %60 = arith.mulf %59, %6 : vector<1x256xf32>
    %c0_24 = arith.constant 0 : index
    %c6 = arith.constant 6 : index
    %61 = vector.load %arg1[%c0_24, %c6] : memref<32x9xf32, #tpu.memory_space<vmem>>, vector<32x1xf32>
    %62 = vector.broadcast %61 : vector<32x1xf32> to vector<32x256xf32>
    %63 = vector.broadcast %60 : vector<1x256xf32> to vector<32x256xf32>
    %64 = arith.mulf %62, %63 : vector<32x256xf32>
    %65 = arith.addf %58, %64 : vector<32x256xf32>
    %c0_25 = arith.constant 0 : index
    %c144 = arith.constant 144 : index
    %66 = vector.load %arg8[%c0_25, %c144] : memref<1x512xf32, #tpu.memory_space<vmem>>, vector<1x256xf32>
    %c0_26 = arith.constant 0 : index
    %c7 = arith.constant 7 : index
    %67 = vector.load %arg1[%c0_26, %c7] : memref<32x9xf32, #tpu.memory_space<vmem>>, vector<32x1xf32>
    %68 = vector.broadcast %67 : vector<32x1xf32> to vector<32x256xf32>
    %69 = vector.broadcast %66 : vector<1x256xf32> to vector<32x256xf32>
    %70 = arith.mulf %68, %69 : vector<32x256xf32>
    %71 = arith.addf %65, %70 : vector<32x256xf32>
    %c0_27 = arith.constant 0 : index
    %c145 = arith.constant 145 : index
    %72 = vector.load %arg8[%c0_27, %c145] : memref<1x512xf32, #tpu.memory_space<vmem>>, vector<1x256xf32>
    %73 = arith.mulf %72, %10 : vector<1x256xf32>
    %c0_28 = arith.constant 0 : index
    %c8 = arith.constant 8 : index
    %74 = vector.load %arg1[%c0_28, %c8] : memref<32x9xf32, #tpu.memory_space<vmem>>, vector<32x1xf32>
    %75 = vector.broadcast %74 : vector<32x1xf32> to vector<32x256xf32>
    %76 = vector.broadcast %73 : vector<1x256xf32> to vector<32x256xf32>
    %77 = arith.mulf %75, %76 : vector<32x256xf32>
    %78 = arith.addf %71, %77 : vector<32x256xf32>
    %c0_29 = arith.constant 0 : index
    %c0_30 = arith.constant 0 : index
    %79 = vector.load %arg2[%c0_29, %c0_30] : memref<32x1xf32, #tpu.memory_space<vmem>>, vector<32x1xf32>
    %80 = vector.broadcast %79 : vector<32x1xf32> to vector<32x256xf32>
    %81 = arith.addf %78, %80 : vector<32x256xf32>
    %cst_31 = arith.constant 0.000000e+00 : f32
    %82 = vector.broadcast %cst_31 : f32 to vector<32x256xf32>
    %83 = arith.maximumf %81, %82 : vector<32x256xf32>
    %c0_32 = arith.constant 0 : index
    %c0_33 = arith.constant 0 : index
    %84 = vector.load %arg11[%c0_32, %c0_33] : memref<32x512xf32, #tpu.memory_space<vmem>>, vector<32x256xf32>
    tpu.vector_store %arg11[%c0_32, %c0_33], %83 {strides = array<i32>} : memref<32x512xf32, #tpu.memory_space<vmem>>, vector<32x256xf32>,
    %c1_34 = arith.constant 1 : index
    %c0_35 = arith.constant 0 : index
    %c0_36 = arith.constant 0 : index
    %85 = vector.load %arg0[%c1_34, %c0_35, %c0_36] : memref<2x1x256xf32, #tpu.memory_space<vmem>>, vector<1x1x256xf32>
    %86 = vector.shape_cast %85 : vector<1x1x256xf32> to vector<1x256xf32>
    %c0_37 = arith.constant 0 : index
    %c128_38 = arith.constant 128 : index
    %87 = vector.load %arg8[%c0_37, %c128_38] : memref<1x512xf32, #tpu.memory_space<vmem>>, vector<1x256xf32>
    tpu.vector_store %arg8[%c0_37, %c128_38], %86 {strides = array<i32>} : memref<1x512xf32, #tpu.memory_space<vmem>>, vector<1x256xf32>,
    %cst_39 = arith.constant 0.000000e+00 : f32
    %88 = vector.broadcast %cst_39 : f32 to vector<32x256xf32>
    %c0_40 = arith.constant 0 : index
    %c111_41 = arith.constant 111 : index
    %89 = vector.load %arg8[%c0_40, %c111_41] : memref<1x512xf32, #tpu.memory_space<vmem>>, vector<1x256xf32>
    %90 = arith.mulf %89, %6 : vector<1x256xf32>
    %c0_42 = arith.constant 0 : index
    %c0_43 = arith.constant 0 : index
    %91 = vector.load %arg1[%c0_42, %c0_43] : memref<32x9xf32, #tpu.memory_space<vmem>>, vector<32x1xf32>
    %92 = vector.broadcast %91 : vector<32x1xf32> to vector<32x256xf32>
    %93 = vector.broadcast %90 : vector<1x256xf32> to vector<32x256xf32>
    %94 = arith.mulf %92, %93 : vector<32x256xf32>
    %95 = arith.addf %88, %94 : vector<32x256xf32>
    %c0_44 = arith.constant 0 : index
    %c112_45 = arith.constant 112 : index
    %96 = vector.load %arg8[%c0_44, %c112_45] : memref<1x512xf32, #tpu.memory_space<vmem>>, vector<1x256xf32>
    %c0_46 = arith.constant 0 : index
    %c1_47 = arith.constant 1 : index
    %97 = vector.load %arg1[%c0_46, %c1_47] : memref<32x9xf32, #tpu.memory_space<vmem>>, vector<32x1xf32>
    %98 = vector.broadcast %97 : vector<32x1xf32> to vector<32x256xf32>
    %99 = vector.broadcast %96 : vector<1x256xf32> to vector<32x256xf32>
    %100 = arith.mulf %98, %99 : vector<32x256xf32>
    %101 = arith.addf %95, %100 : vector<32x256xf32>
    %c0_48 = arith.constant 0 : index
    %c113_49 = arith.constant 113 : index
    %102 = vector.load %arg8[%c0_48, %c113_49] : memref<1x512xf32, #tpu.memory_space<vmem>>, vector<1x256xf32>
    %103 = arith.mulf %102, %10 : vector<1x256xf32>
    %c0_50 = arith.constant 0 : index
    %c2_51 = arith.constant 2 : index
    %104 = vector.load %arg1[%c0_50, %c2_51] : memref<32x9xf32, #tpu.memory_space<vmem>>, vector<32x1xf32>
    %105 = vector.broadcast %104 : vector<32x1xf32> to vector<32x256xf32>
    %106 = vector.broadcast %103 : vector<1x256xf32> to vector<32x256xf32>
    %107 = arith.mulf %105, %106 : vector<32x256xf32>
    %108 = arith.addf %101, %107 : vector<32x256xf32>
    %c0_52 = arith.constant 0 : index
    %c127_53 = arith.constant 127 : index
    %109 = vector.load %arg8[%c0_52, %c127_53] : memref<1x512xf32, #tpu.memory_space<vmem>>, vector<1x256xf32>
    %110 = arith.mulf %109, %6 : vector<1x256xf32>
    %c0_54 = arith.constant 0 : index
    %c3_55 = arith.constant 3 : index
    %111 = vector.load %arg1[%c0_54, %c3_55] : memref<32x9xf32, #tpu.memory_space<vmem>>, vector<32x1xf32>
    %112 = vector.broadcast %111 : vector<32x1xf32> to vector<32x256xf32>
    %113 = vector.broadcast %110 : vector<1x256xf32> to vector<32x256xf32>
    %114 = arith.mulf %112, %113 : vector<32x256xf32>
    %115 = arith.addf %108, %114 : vector<32x256xf32>
    %c0_56 = arith.constant 0 : index
    %c128_57 = arith.constant 128 : index
    %116 = vector.load %arg8[%c0_56, %c128_57] : memref<1x512xf32, #tpu.memory_space<vmem>>, vector<1x256xf32>
    %c0_58 = arith.constant 0 : index
    %c4_59 = arith.constant 4 : index
    %117 = vector.load %arg1[%c0_58, %c4_59] : memref<32x9xf32, #tpu.memory_space<vmem>>, vector<32x1xf32>
    %118 = vector.broadcast %117 : vector<32x1xf32> to vector<32x256xf32>
    %119 = vector.broadcast %116 : vector<1x256xf32> to vector<32x256xf32>
    %120 = arith.mulf %118, %119 : vector<32x256xf32>
    %121 = arith.addf %115, %120 : vector<32x256xf32>
    %c0_60 = arith.constant 0 : index
    %c129_61 = arith.constant 129 : index
    %122 = vector.load %arg8[%c0_60, %c129_61] : memref<1x512xf32, #tpu.memory_space<vmem>>, vector<1x256xf32>
    %123 = arith.mulf %122, %10 : vector<1x256xf32>
    %c0_62 = arith.constant 0 : index
    %c5_63 = arith.constant 5 : index
    %124 = vector.load %arg1[%c0_62, %c5_63] : memref<32x9xf32, #tpu.memory_space<vmem>>, vector<32x1xf32>
    %125 = vector.broadcast %124 : vector<32x1xf32> to vector<32x256xf32>
    %126 = vector.broadcast %123 : vector<1x256xf32> to vector<32x256xf32>
    %127 = arith.mulf %125, %126 : vector<32x256xf32>
    %128 = arith.addf %121, %127 : vector<32x256xf32>
    %c0_64 = arith.constant 0 : index
    %c143_65 = arith.constant 143 : index
    %129 = vector.load %arg8[%c0_64, %c143_65] : memref<1x512xf32, #tpu.memory_space<vmem>>, vector<1x256xf32>
    %130 = arith.mulf %129, %6 : vector<1x256xf32>
    %c0_66 = arith.constant 0 : index
    %c6_67 = arith.constant 6 : index
    %131 = vector.load %arg1[%c0_66, %c6_67] : memref<32x9xf32, #tpu.memory_space<vmem>>, vector<32x1xf32>
    %132 = vector.broadcast %131 : vector<32x1xf32> to vector<32x256xf32>
    %133 = vector.broadcast %130 : vector<1x256xf32> to vector<32x256xf32>
    %134 = arith.mulf %132, %133 : vector<32x256xf32>
    %135 = arith.addf %128, %134 : vector<32x256xf32>
    %c0_68 = arith.constant 0 : index
    %c144_69 = arith.constant 144 : index
    %136 = vector.load %arg8[%c0_68, %c144_69] : memref<1x512xf32, #tpu.memory_space<vmem>>, vector<1x256xf32>
    %c0_70 = arith.constant 0 : index
    %c7_71 = arith.constant 7 : index
    %137 = vector.load %arg1[%c0_70, %c7_71] : memref<32x9xf32, #tpu.memory_space<vmem>>, vector<32x1xf32>
    %138 = vector.broadcast %137 : vector<32x1xf32> to vector<32x256xf32>
    %139 = vector.broadcast %136 : vector<1x256xf32> to vector<32x256xf32>
    %140 = arith.mulf %138, %139 : vector<32x256xf32>
    %141 = arith.addf %135, %140 : vector<32x256xf32>
    %c0_72 = arith.constant 0 : index
    %c145_73 = arith.constant 145 : index
    %142 = vector.load %arg8[%c0_72, %c145_73] : memref<1x512xf32, #tpu.memory_space<vmem>>, vector<1x256xf32>
    %143 = arith.mulf %142, %10 : vector<1x256xf32>
    %c0_74 = arith.constant 0 : index
    %c8_75 = arith.constant 8 : index
    %144 = vector.load %arg1[%c0_74, %c8_75] : memref<32x9xf32, #tpu.memory_space<vmem>>, vector<32x1xf32>
    %145 = vector.broadcast %144 : vector<32x1xf32> to vector<32x256xf32>
    %146 = vector.broadcast %143 : vector<1x256xf32> to vector<32x256xf32>
    %147 = arith.mulf %145, %146 : vector<32x256xf32>
    %148 = arith.addf %141, %147 : vector<32x256xf32>
    %c0_76 = arith.constant 0 : index
    %c0_77 = arith.constant 0 : index
    %149 = vector.load %arg2[%c0_76, %c0_77] : memref<32x1xf32, #tpu.memory_space<vmem>>, vector<32x1xf32>
    %150 = vector.broadcast %149 : vector<32x1xf32> to vector<32x256xf32>
    %151 = arith.addf %148, %150 : vector<32x256xf32>
    %cst_78 = arith.constant 0.000000e+00 : f32
    %152 = vector.broadcast %cst_78 : f32 to vector<32x256xf32>
    %153 = arith.maximumf %151, %152 : vector<32x256xf32>
    %c0_79 = arith.constant 0 : index
    %c256 = arith.constant 256 : index
    %154 = vector.load %arg11[%c0_79, %c256] : memref<32x512xf32, #tpu.memory_space<vmem>>, vector<32x256xf32>
    tpu.vector_store %arg11[%c0_79, %c256], %153 {strides = array<i32>} : memref<32x512xf32, #tpu.memory_space<vmem>>, vector<32x256xf32>,
    %c0_80 = arith.constant 0 : index
    %c0_81 = arith.constant 0 : index
    %155 = vector.load %arg11[%c0_80, %c0_81] : memref<32x512xf32, #tpu.memory_space<vmem>>, vector<32x512xf32>
    %cst_82 = arith.constant dense<0.000000e+00> : vector<32xf32>
    %156 = vector.multi_reduction <add>, %155, %cst_82 [1] : vector<32x512xf32> to vector<32xf32>
    %157 = vector.shape_cast %156 : vector<32xf32> to vector<32x1xf32>
    %cst_83 = arith.constant 0.001953125 : f32
    %158 = vector.broadcast %cst_83 : f32 to vector<32x1xf32>
    %159 = arith.mulf %157, %158 : vector<32x1xf32>
    %160 = vector.broadcast %159 : vector<32x1xf32> to vector<32x512xf32>
    %161 = arith.subf %155, %160 : vector<32x512xf32>
    %162 = arith.mulf %161, %161 : vector<32x512xf32>
    %cst_84 = arith.constant dense<0.000000e+00> : vector<32xf32>
    %163 = vector.multi_reduction <add>, %162, %cst_84 [1] : vector<32x512xf32> to vector<32xf32>
    %164 = vector.shape_cast %163 : vector<32xf32> to vector<32x1xf32>
    %cst_85 = arith.constant 0.001953125 : f32
    %165 = vector.broadcast %cst_85 : f32 to vector<32x1xf32>
    %166 = arith.mulf %164, %165 : vector<32x1xf32>
    %cst_86 = arith.constant 9.99999974E-6 : f32
    %167 = vector.broadcast %cst_86 : f32 to vector<32x1xf32>
    %168 = arith.addf %166, %167 : vector<32x1xf32>
    %169 = math.rsqrt %168 : vector<32x1xf32>
    %c0_87 = arith.constant 0 : index
    %c0_88 = arith.constant 0 : index
    %170 = vector.load %arg11[%c0_87, %c0_88] : memref<32x512xf32, #tpu.memory_space<vmem>>, vector<32x256xf32>
    %171 = vector.broadcast %159 : vector<32x1xf32> to vector<32x256xf32>
    %172 = arith.subf %170, %171 : vector<32x256xf32>
    %173 = vector.broadcast %169 : vector<32x1xf32> to vector<32x256xf32>
    %174 = arith.mulf %172, %173 : vector<32x256xf32>
    %c0_89 = arith.constant 0 : index
    %c128_90 = arith.constant 128 : index
    %175 = vector.load %arg9[%c0_89, %c128_90] : memref<32x512xf32, #tpu.memory_space<vmem>>, vector<32x256xf32>
    tpu.vector_store %arg9[%c0_89, %c128_90], %174 {strides = array<i32>} : memref<32x512xf32, #tpu.memory_space<vmem>>, vector<32x256xf32>,
    %c0_91 = arith.constant 0 : index
    %c111_92 = arith.constant 111 : index
    %176 = vector.load %arg9[%c0_91, %c111_92] : memref<32x512xf32, #tpu.memory_space<vmem>>, vector<32x256xf32>
    %177 = vector.broadcast %6 : vector<1x256xf32> to vector<32x256xf32>
    %178 = arith.mulf %176, %177 : vector<32x256xf32>
    %c0_93 = arith.constant 0 : index
    %c0_94 = arith.constant 0 : index
    %179 = vector.load %arg10[%c0_93, %c0_94] : memref<288x256xf32, #tpu.memory_space<vmem>>, vector<32x256xf32>
    tpu.vector_store %arg10[%c0_93, %c0_94], %178 {strides = array<i32>} : memref<288x256xf32, #tpu.memory_space<vmem>>, vector<32x256xf32>,
    %c0_95 = arith.constant 0 : index
    %c112_96 = arith.constant 112 : index
    %180 = vector.load %arg9[%c0_95, %c112_96] : memref<32x512xf32, #tpu.memory_space<vmem>>, vector<32x256xf32>
    %c32 = arith.constant 32 : index
    %c0_97 = arith.constant 0 : index
    %181 = vector.load %arg10[%c32, %c0_97] : memref<288x256xf32, #tpu.memory_space<vmem>>, vector<32x256xf32>
    tpu.vector_store %arg10[%c32, %c0_97], %180 {strides = array<i32>} : memref<288x256xf32, #tpu.memory_space<vmem>>, vector<32x256xf32>,
    %c0_98 = arith.constant 0 : index
    %c113_99 = arith.constant 113 : index
    %182 = vector.load %arg9[%c0_98, %c113_99] : memref<32x512xf32, #tpu.memory_space<vmem>>, vector<32x256xf32>
    %183 = vector.broadcast %10 : vector<1x256xf32> to vector<32x256xf32>
    %184 = arith.mulf %182, %183 : vector<32x256xf32>
    %c64 = arith.constant 64 : index
    %c0_100 = arith.constant 0 : index
    %185 = vector.load %arg10[%c64, %c0_100] : memref<288x256xf32, #tpu.memory_space<vmem>>, vector<32x256xf32>
    tpu.vector_store %arg10[%c64, %c0_100], %184 {strides = array<i32>} : memref<288x256xf32, #tpu.memory_space<vmem>>, vector<32x256xf32>,
    %c0_101 = arith.constant 0 : index
    %c127_102 = arith.constant 127 : index
    %186 = vector.load %arg9[%c0_101, %c127_102] : memref<32x512xf32, #tpu.memory_space<vmem>>, vector<32x256xf32>
    %187 = vector.broadcast %6 : vector<1x256xf32> to vector<32x256xf32>
    %188 = arith.mulf %186, %187 : vector<32x256xf32>
    %c96 = arith.constant 96 : index
    %c0_103 = arith.constant 0 : index
    %189 = vector.load %arg10[%c96, %c0_103] : memref<288x256xf32, #tpu.memory_space<vmem>>, vector<32x256xf32>
    tpu.vector_store %arg10[%c96, %c0_103], %188 {strides = array<i32>} : memref<288x256xf32, #tpu.memory_space<vmem>>, vector<32x256xf32>,
    %c0_104 = arith.constant 0 : index
    %c128_105 = arith.constant 128 : index
    %190 = vector.load %arg9[%c0_104, %c128_105] : memref<32x512xf32, #tpu.memory_space<vmem>>, vector<32x256xf32>
    %c128_106 = arith.constant 128 : index
    %c0_107 = arith.constant 0 : index
    %191 = vector.load %arg10[%c128_106, %c0_107] : memref<288x256xf32, #tpu.memory_space<vmem>>, vector<32x256xf32>
    tpu.vector_store %arg10[%c128_106, %c0_107], %190 {strides = array<i32>} : memref<288x256xf32, #tpu.memory_space<vmem>>, vector<32x256xf32>,
    %c0_108 = arith.constant 0 : index
    %c129_109 = arith.constant 129 : index
    %192 = vector.load %arg9[%c0_108, %c129_109] : memref<32x512xf32, #tpu.memory_space<vmem>>, vector<32x256xf32>
    %193 = vector.broadcast %10 : vector<1x256xf32> to vector<32x256xf32>
    %194 = arith.mulf %192, %193 : vector<32x256xf32>
    %c160 = arith.constant 160 : index
    %c0_110 = arith.constant 0 : index
    %195 = vector.load %arg10[%c160, %c0_110] : memref<288x256xf32, #tpu.memory_space<vmem>>, vector<32x256xf32>
    tpu.vector_store %arg10[%c160, %c0_110], %194 {strides = array<i32>} : memref<288x256xf32, #tpu.memory_space<vmem>>, vector<32x256xf32>,
    %c0_111 = arith.constant 0 : index
    %c143_112 = arith.constant 143 : index
    %196 = vector.load %arg9[%c0_111, %c143_112] : memref<32x512xf32, #tpu.memory_space<vmem>>, vector<32x256xf32>
    %197 = vector.broadcast %6 : vector<1x256xf32> to vector<32x256xf32>
    %198 = arith.mulf %196, %197 : vector<32x256xf32>
    %c192 = arith.constant 192 : index
    %c0_113 = arith.constant 0 : index
    %199 = vector.load %arg10[%c192, %c0_113] : memref<288x256xf32, #tpu.memory_space<vmem>>, vector<32x256xf32>
    tpu.vector_store %arg10[%c192, %c0_113], %198 {strides = array<i32>} : memref<288x256xf32, #tpu.memory_space<vmem>>, vector<32x256xf32>,
    %c0_114 = arith.constant 0 : index
    %c144_115 = arith.constant 144 : index
    %200 = vector.load %arg9[%c0_114, %c144_115] : memref<32x512xf32, #tpu.memory_space<vmem>>, vector<32x256xf32>
    %c224 = arith.constant 224 : index
    %c0_116 = arith.constant 0 : index
    %201 = vector.load %arg10[%c224, %c0_116] : memref<288x256xf32, #tpu.memory_space<vmem>>, vector<32x256xf32>
    tpu.vector_store %arg10[%c224, %c0_116], %200 {strides = array<i32>} : memref<288x256xf32, #tpu.memory_space<vmem>>, vector<32x256xf32>,
    %c0_117 = arith.constant 0 : index
    %c145_118 = arith.constant 145 : index
    %202 = vector.load %arg9[%c0_117, %c145_118] : memref<32x512xf32, #tpu.memory_space<vmem>>, vector<32x256xf32>
    %203 = vector.broadcast %10 : vector<1x256xf32> to vector<32x256xf32>
    %204 = arith.mulf %202, %203 : vector<32x256xf32>
    %c256_119 = arith.constant 256 : index
    %c0_120 = arith.constant 0 : index
    %205 = vector.load %arg10[%c256_119, %c0_120] : memref<288x256xf32, #tpu.memory_space<vmem>>, vector<32x256xf32>
    tpu.vector_store %arg10[%c256_119, %c0_120], %204 {strides = array<i32>} : memref<288x256xf32, #tpu.memory_space<vmem>>, vector<32x256xf32>,
    %c0_121 = arith.constant 0 : index
    %c0_122 = arith.constant 0 : index
    %206 = vector.load %arg3[%c0_121, %c0_122] : memref<32x288xf32, #tpu.memory_space<vmem>>, vector<32x288xf32>
    %c0_123 = arith.constant 0 : index
    %c0_124 = arith.constant 0 : index
    %207 = vector.load %arg10[%c0_123, %c0_124] : memref<288x256xf32, #tpu.memory_space<vmem>>, vector<288x256xf32>
    %cst_125 = arith.constant dense<0.000000e+00> : vector<32x256xf32>
    %208 = tpu.matmul %206, %207, %cst_125 {dimension_numbers = #tpu.dot_dimension_numbers<[1], [0], [0], [1], [0, 0, 1, 1], [], []>} : vector<32x288xf32>, vector<288x256xf32>, vector<32x256xf32> -> vector<32x256xf32>
    %c0_126 = arith.constant 0 : index
    %c0_127 = arith.constant 0 : index
    %209 = vector.load %arg4[%c0_126, %c0_127] : memref<32x1xf32, #tpu.memory_space<vmem>>, vector<32x1xf32>
    %210 = vector.broadcast %209 : vector<32x1xf32> to vector<32x256xf32>
    %211 = arith.addf %208, %210 : vector<32x256xf32>
    %cst_128 = arith.constant 0.000000e+00 : f32
    %212 = vector.broadcast %cst_128 : f32 to vector<32x256xf32>
    %213 = arith.maximumf %211, %212 : vector<32x256xf32>
    %c0_129 = arith.constant 0 : index
    %c0_130 = arith.constant 0 : index
    %214 = vector.load %arg12[%c0_129, %c0_130] : memref<32x512xf32, #tpu.memory_space<vmem>>, vector<32x256xf32>
    tpu.vector_store %arg12[%c0_129, %c0_130], %213 {strides = array<i32>} : memref<32x512xf32, #tpu.memory_space<vmem>>, vector<32x256xf32>,
    %c0_131 = arith.constant 0 : index
    %c256_132 = arith.constant 256 : index
    %215 = vector.load %arg11[%c0_131, %c256_132] : memref<32x512xf32, #tpu.memory_space<vmem>>, vector<32x256xf32>
    %216 = vector.broadcast %159 : vector<32x1xf32> to vector<32x256xf32>
    %217 = arith.subf %215, %216 : vector<32x256xf32>
    %218 = vector.broadcast %169 : vector<32x1xf32> to vector<32x256xf32>
    %219 = arith.mulf %217, %218 : vector<32x256xf32>
    %c0_133 = arith.constant 0 : index
    %c128_134 = arith.constant 128 : index
    %220 = vector.load %arg9[%c0_133, %c128_134] : memref<32x512xf32, #tpu.memory_space<vmem>>, vector<32x256xf32>
    tpu.vector_store %arg9[%c0_133, %c128_134], %219 {strides = array<i32>} : memref<32x512xf32, #tpu.memory_space<vmem>>, vector<32x256xf32>,
    %c0_135 = arith.constant 0 : index
    %c111_136 = arith.constant 111 : index
    %221 = vector.load %arg9[%c0_135, %c111_136] : memref<32x512xf32, #tpu.memory_space<vmem>>, vector<32x256xf32>
    %222 = vector.broadcast %6 : vector<1x256xf32> to vector<32x256xf32>
    %223 = arith.mulf %221, %222 : vector<32x256xf32>
    %c0_137 = arith.constant 0 : index
    %c0_138 = arith.constant 0 : index
    %224 = vector.load %arg10[%c0_137, %c0_138] : memref<288x256xf32, #tpu.memory_space<vmem>>, vector<32x256xf32>
    tpu.vector_store %arg10[%c0_137, %c0_138], %223 {strides = array<i32>} : memref<288x256xf32, #tpu.memory_space<vmem>>, vector<32x256xf32>,
    %c0_139 = arith.constant 0 : index
    %c112_140 = arith.constant 112 : index
    %225 = vector.load %arg9[%c0_139, %c112_140] : memref<32x512xf32, #tpu.memory_space<vmem>>, vector<32x256xf32>
    %c32_141 = arith.constant 32 : index
    %c0_142 = arith.constant 0 : index
    %226 = vector.load %arg10[%c32_141, %c0_142] : memref<288x256xf32, #tpu.memory_space<vmem>>, vector<32x256xf32>
    tpu.vector_store %arg10[%c32_141, %c0_142], %225 {strides = array<i32>} : memref<288x256xf32, #tpu.memory_space<vmem>>, vector<32x256xf32>,
    %c0_143 = arith.constant 0 : index
    %c113_144 = arith.constant 113 : index
    %227 = vector.load %arg9[%c0_143, %c113_144] : memref<32x512xf32, #tpu.memory_space<vmem>>, vector<32x256xf32>
    %228 = vector.broadcast %10 : vector<1x256xf32> to vector<32x256xf32>
    %229 = arith.mulf %227, %228 : vector<32x256xf32>
    %c64_145 = arith.constant 64 : index
    %c0_146 = arith.constant 0 : index
    %230 = vector.load %arg10[%c64_145, %c0_146] : memref<288x256xf32, #tpu.memory_space<vmem>>, vector<32x256xf32>
    tpu.vector_store %arg10[%c64_145, %c0_146], %229 {strides = array<i32>} : memref<288x256xf32, #tpu.memory_space<vmem>>, vector<32x256xf32>,
    %c0_147 = arith.constant 0 : index
    %c127_148 = arith.constant 127 : index
    %231 = vector.load %arg9[%c0_147, %c127_148] : memref<32x512xf32, #tpu.memory_space<vmem>>, vector<32x256xf32>
    %232 = vector.broadcast %6 : vector<1x256xf32> to vector<32x256xf32>
    %233 = arith.mulf %231, %232 : vector<32x256xf32>
    %c96_149 = arith.constant 96 : index
    %c0_150 = arith.constant 0 : index
    %234 = vector.load %arg10[%c96_149, %c0_150] : memref<288x256xf32, #tpu.memory_space<vmem>>, vector<32x256xf32>
    tpu.vector_store %arg10[%c96_149, %c0_150], %233 {strides = array<i32>} : memref<288x256xf32, #tpu.memory_space<vmem>>, vector<32x256xf32>,
    %c0_151 = arith.constant 0 : index
    %c128_152 = arith.constant 128 : index
    %235 = vector.load %arg9[%c0_151, %c128_152] : memref<32x512xf32, #tpu.memory_space<vmem>>, vector<32x256xf32>
    %c128_153 = arith.constant 128 : index
    %c0_154 = arith.constant 0 : index
    %236 = vector.load %arg10[%c128_153, %c0_154] : memref<288x256xf32, #tpu.memory_space<vmem>>, vector<32x256xf32>
    tpu.vector_store %arg10[%c128_153, %c0_154], %235 {strides = array<i32>} : memref<288x256xf32, #tpu.memory_space<vmem>>, vector<32x256xf32>,
    %c0_155 = arith.constant 0 : index
    %c129_156 = arith.constant 129 : index
    %237 = vector.load %arg9[%c0_155, %c129_156] : memref<32x512xf32, #tpu.memory_space<vmem>>, vector<32x256xf32>
    %238 = vector.broadcast %10 : vector<1x256xf32> to vector<32x256xf32>
    %239 = arith.mulf %237, %238 : vector<32x256xf32>
    %c160_157 = arith.constant 160 : index
    %c0_158 = arith.constant 0 : index
    %240 = vector.load %arg10[%c160_157, %c0_158] : memref<288x256xf32, #tpu.memory_space<vmem>>, vector<32x256xf32>
    tpu.vector_store %arg10[%c160_157, %c0_158], %239 {strides = array<i32>} : memref<288x256xf32, #tpu.memory_space<vmem>>, vector<32x256xf32>,
    %c0_159 = arith.constant 0 : index
    %c143_160 = arith.constant 143 : index
    %241 = vector.load %arg9[%c0_159, %c143_160] : memref<32x512xf32, #tpu.memory_space<vmem>>, vector<32x256xf32>
    %242 = vector.broadcast %6 : vector<1x256xf32> to vector<32x256xf32>
    %243 = arith.mulf %241, %242 : vector<32x256xf32>
    %c192_161 = arith.constant 192 : index
    %c0_162 = arith.constant 0 : index
    %244 = vector.load %arg10[%c192_161, %c0_162] : memref<288x256xf32, #tpu.memory_space<vmem>>, vector<32x256xf32>
    tpu.vector_store %arg10[%c192_161, %c0_162], %243 {strides = array<i32>} : memref<288x256xf32, #tpu.memory_space<vmem>>, vector<32x256xf32>,
    %c0_163 = arith.constant 0 : index
    %c144_164 = arith.constant 144 : index
    %245 = vector.load %arg9[%c0_163, %c144_164] : memref<32x512xf32, #tpu.memory_space<vmem>>, vector<32x256xf32>
    %c224_165 = arith.constant 224 : index
    %c0_166 = arith.constant 0 : index
    %246 = vector.load %arg10[%c224_165, %c0_166] : memref<288x256xf32, #tpu.memory_space<vmem>>, vector<32x256xf32>
    tpu.vector_store %arg10[%c224_165, %c0_166], %245 {strides = array<i32>} : memref<288x256xf32, #tpu.memory_space<vmem>>, vector<32x256xf32>,
    %c0_167 = arith.constant 0 : index
    %c145_168 = arith.constant 145 : index
    %247 = vector.load %arg9[%c0_167, %c145_168] : memref<32x512xf32, #tpu.memory_space<vmem>>, vector<32x256xf32>
    %248 = vector.broadcast %10 : vector<1x256xf32> to vector<32x256xf32>
    %249 = arith.mulf %247, %248 : vector<32x256xf32>
    %c256_169 = arith.constant 256 : index
    %c0_170 = arith.constant 0 : index
    %250 = vector.load %arg10[%c256_169, %c0_170] : memref<288x256xf32, #tpu.memory_space<vmem>>, vector<32x256xf32>
    tpu.vector_store %arg10[%c256_169, %c0_170], %249 {strides = array<i32>} : memref<288x256xf32, #tpu.memory_space<vmem>>, vector<32x256xf32>,
    %c0_171 = arith.constant 0 : index
    %c0_172 = arith.constant 0 : index
    %251 = vector.load %arg3[%c0_171, %c0_172] : memref<32x288xf32, #tpu.memory_space<vmem>>, vector<32x288xf32>
    %c0_173 = arith.constant 0 : index
    %c0_174 = arith.constant 0 : index
    %252 = vector.load %arg10[%c0_173, %c0_174] : memref<288x256xf32, #tpu.memory_space<vmem>>, vector<288x256xf32>
    %cst_175 = arith.constant dense<0.000000e+00> : vector<32x256xf32>
    %253 = tpu.matmul %251, %252, %cst_175 {dimension_numbers = #tpu.dot_dimension_numbers<[1], [0], [0], [1], [0, 0, 1, 1], [], []>} : vector<32x288xf32>, vector<288x256xf32>, vector<32x256xf32> -> vector<32x256xf32>
    %c0_176 = arith.constant 0 : index
    %c0_177 = arith.constant 0 : index
    %254 = vector.load %arg4[%c0_176, %c0_177] : memref<32x1xf32, #tpu.memory_space<vmem>>, vector<32x1xf32>
    %255 = vector.broadcast %254 : vector<32x1xf32> to vector<32x256xf32>
    %256 = arith.addf %253, %255 : vector<32x256xf32>
    %cst_178 = arith.constant 0.000000e+00 : f32
    %257 = vector.broadcast %cst_178 : f32 to vector<32x256xf32>
    %258 = arith.maximumf %256, %257 : vector<32x256xf32>
    %c0_179 = arith.constant 0 : index
    %c256_180 = arith.constant 256 : index
    %259 = vector.load %arg12[%c0_179, %c256_180] : memref<32x512xf32, #tpu.memory_space<vmem>>, vector<32x256xf32>
    tpu.vector_store %arg12[%c0_179, %c256_180], %258 {strides = array<i32>} : memref<32x512xf32, #tpu.memory_space<vmem>>, vector<32x256xf32>,
    %c0_181 = arith.constant 0 : index
    %c0_182 = arith.constant 0 : index
    %260 = vector.load %arg12[%c0_181, %c0_182] : memref<32x512xf32, #tpu.memory_space<vmem>>, vector<32x512xf32>
    %cst_183 = arith.constant dense<0.000000e+00> : vector<32xf32>
    %261 = vector.multi_reduction <add>, %260, %cst_183 [1] : vector<32x512xf32> to vector<32xf32>
    %262 = vector.shape_cast %261 : vector<32xf32> to vector<32x1xf32>
    %cst_184 = arith.constant 0.001953125 : f32
    %263 = vector.broadcast %cst_184 : f32 to vector<32x1xf32>
    %264 = arith.mulf %262, %263 : vector<32x1xf32>
    %265 = vector.broadcast %264 : vector<32x1xf32> to vector<32x512xf32>
    %266 = arith.subf %260, %265 : vector<32x512xf32>
    %267 = arith.mulf %266, %266 : vector<32x512xf32>
    %cst_185 = arith.constant dense<0.000000e+00> : vector<32xf32>
    %268 = vector.multi_reduction <add>, %267, %cst_185 [1] : vector<32x512xf32> to vector<32xf32>
    %269 = vector.shape_cast %268 : vector<32xf32> to vector<32x1xf32>
    %cst_186 = arith.constant 0.001953125 : f32
    %270 = vector.broadcast %cst_186 : f32 to vector<32x1xf32>
    %271 = arith.mulf %269, %270 : vector<32x1xf32>
    %cst_187 = arith.constant 9.99999974E-6 : f32
    %272 = vector.broadcast %cst_187 : f32 to vector<32x1xf32>
    %273 = arith.addf %271, %272 : vector<32x1xf32>
    %274 = math.rsqrt %273 : vector<32x1xf32>
    %c0_188 = arith.constant 0 : index
    %c0_189 = arith.constant 0 : index
    %275 = vector.load %arg12[%c0_188, %c0_189] : memref<32x512xf32, #tpu.memory_space<vmem>>, vector<32x256xf32>
    %276 = vector.broadcast %264 : vector<32x1xf32> to vector<32x256xf32>
    %277 = arith.subf %275, %276 : vector<32x256xf32>
    %278 = vector.broadcast %274 : vector<32x1xf32> to vector<32x256xf32>
    %279 = arith.mulf %277, %278 : vector<32x256xf32>
    %c0_190 = arith.constant 0 : index
    %c0_191 = arith.constant 0 : index
    %280 = vector.load %arg5[%c0_190, %c0_191] : memref<2x32xf32, #tpu.memory_space<vmem>>, vector<2x32xf32>
    %cst_192 = arith.constant dense<0.000000e+00> : vector<2x256xf32>
    %281 = tpu.matmul %280, %279, %cst_192 {dimension_numbers = #tpu.dot_dimension_numbers<[1], [0], [0], [1], [0, 0, 1, 1], [], []>} : vector<2x32xf32>, vector<32x256xf32>, vector<2x256xf32> -> vector<2x256xf32>
    %c0_193 = arith.constant 0 : index
    %c0_194 = arith.constant 0 : index
    %282 = vector.load %arg6[%c0_193, %c0_194] : memref<2x1xf32, #tpu.memory_space<vmem>>, vector<2x1xf32>
    %283 = vector.broadcast %282 : vector<2x1xf32> to vector<2x256xf32>
    %284 = arith.addf %281, %283 : vector<2x256xf32>
    %c0_195 = arith.constant 0 : index
    %c0_196 = arith.constant 0 : index
    %c0_197 = arith.constant 0 : index
    %285 = vector.load %arg7[%c0_195, %c0_196, %c0_197] : memref<2x2x256xf32, #tpu.memory_space<vmem>>, vector<1x2x256xf32>
    %286 = vector.shape_cast %285 : vector<1x2x256xf32> to vector<2x256xf32>
    %287 = vector.shape_cast %284 : vector<2x256xf32> to vector<1x2x256xf32>
    tpu.vector_store %arg7[%c0_195, %c0_196, %c0_197], %287 {strides = array<i32>} : memref<2x2x256xf32, #tpu.memory_space<vmem>>, vector<1x2x256xf32>,
    %c0_198 = arith.constant 0 : index
    %c256_199 = arith.constant 256 : index
    %288 = vector.load %arg12[%c0_198, %c256_199] : memref<32x512xf32, #tpu.memory_space<vmem>>, vector<32x256xf32>
    %289 = vector.broadcast %264 : vector<32x1xf32> to vector<32x256xf32>
    %290 = arith.subf %288, %289 : vector<32x256xf32>
    %291 = vector.broadcast %274 : vector<32x1xf32> to vector<32x256xf32>
    %292 = arith.mulf %290, %291 : vector<32x256xf32>
    %c0_200 = arith.constant 0 : index
    %c0_201 = arith.constant 0 : index
    %293 = vector.load %arg5[%c0_200, %c0_201] : memref<2x32xf32, #tpu.memory_space<vmem>>, vector<2x32xf32>
    %cst_202 = arith.constant dense<0.000000e+00> : vector<2x256xf32>
    %294 = tpu.matmul %293, %292, %cst_202 {dimension_numbers = #tpu.dot_dimension_numbers<[1], [0], [0], [1], [0, 0, 1, 1], [], []>} : vector<2x32xf32>, vector<32x256xf32>, vector<2x256xf32> -> vector<2x256xf32>
    %c0_203 = arith.constant 0 : index
    %c0_204 = arith.constant 0 : index
    %295 = vector.load %arg6[%c0_203, %c0_204] : memref<2x1xf32, #tpu.memory_space<vmem>>, vector<2x1xf32>
    %296 = vector.broadcast %295 : vector<2x1xf32> to vector<2x256xf32>
    %297 = arith.addf %294, %296 : vector<2x256xf32>
    %c1_205 = arith.constant 1 : index
    %c0_206 = arith.constant 0 : index
    %c0_207 = arith.constant 0 : index
    %298 = vector.load %arg7[%c1_205, %c0_206, %c0_207] : memref<2x2x256xf32, #tpu.memory_space<vmem>>, vector<1x2x256xf32>
    %299 = vector.shape_cast %298 : vector<1x2x256xf32> to vector<2x256xf32>
    %300 = vector.shape_cast %297 : vector<2x256xf32> to vector<1x2x256xf32>
    tpu.vector_store %arg7[%c1_205, %c0_206, %c0_207], %300 {strides = array<i32>} : memref<2x2x256xf32, #tpu.memory_space<vmem>>, vector<1x2x256xf32>,
    return
  }
}

</mosaic_0001>

<bundles_post_ra>
// kernel: unet_forward.1
= control target key start
LH: loop header
LB: loop body
LE: loop exit
PB: predicated region body
PF: predicated region fallthrough
CT: control target
= control target key end

     0   :  { %v26_v0 = vlaneseq  ;;  %v8373_v1 = vmov 0   ;;  %v8363_v7 = vmov 0.0   ;;  %v8371_v8 = vmov 1   ;;  %s5227_s11 = smov 111   ;;  %s5229_s12 = smov 113   ;;  %s8355_s1 = inlined_call_operand.vmem [shape: f32[32,9], index: 1, kind: input, shape index: {}]   ;;  %s8356_s0 = inlined_call_operand.vmem [shape: f32[2,1,256], index: 0, kind: input, shape index: {}]   ;;  %s8357_s2 = inlined_call_operand.vmem [shape: f32[32,1], index: 2, kind: input, shape index: {}]   ;;  %s8358_s3 = inlined_call_operand.vmem [shape: f32[32,288], index: 3, kind: input, shape index: {}]   ;;  %s8359_s4 = inlined_call_operand.vmem [shape: f32[32,1], index: 4, kind: input, shape index: {}]   ;;  %s8360_s6 = inlined_call_operand.vmem [shape: f32[2,1], index: 6, kind: input, shape index: {}]   ;;  %s8361_s5 = inlined_call_operand.vmem [shape: f32[2,32], index: 5, kind: input, shape index: {}]   ;;  %s8362_s7 = inlined_call_operand.vmem [shape: f32[2,2,256], index: 7, kind: output, shape index: {}]  }
   0x1   :  { %4640 = vset.pattern.permute.xlu2 %v8373_v1  ;;  %4639 = vset.pattern.permute.xlu1 %v8373_v1  ;;  %v5292_v2 = vld [vmem:[%s8355_s1 + $0x18] sm:$0xff]  ;;  %v5297_v3 = vld [vmem:[%s8355_s1 + $0x8] sm:$0xff]  ;;  %v76_v6 = vld [vmem:[%s8356_s0] sm:$0x3]  ;;  %vm84_vm4 = vcmask 1040384   ;;  %v8369_v24 = vmov 2  }
   0x2   :  { %114 = vperm.xlu2 %4640, %v5292_v2   ;;  %104 = vperm.xlu1 %4639, %v5297_v3   ;;  %v27_v4 = vand.u32 127, %v26_v0  ;;  %vm57_vm0 = vcmp.lt.s32.totalorder %v26_v0, 512  ;;  %vm5301_vm1 = vcmp.lt.s32.totalorder %v26_v0, 256  ;;  %v5315_v12 = vld [vmem:[%s8355_s1 + $0x10] sm:$0xff]  ;;  %v5320_v13 = vld [vmem:[%s8355_s1] sm:$0xff]  ;;  %v8367_v25 = vmov 3  }
   0x3   :  { %59 = vst.msk [vmem:[#allocation2] sm:$0xf] %vm57_vm0, %v8363_v7  ;;  %4648 = vset.pattern.permute.xlu0 %v8371_v8  ;;  %s5231_s13 = smov 127   ;;  %v4594_v31 = vld [vmem:[%s8356_s0 + $0x2] sm:$0x3]  ;;  %vm259_vm7 = vcmask 924672  }
   0x4   :  { %v28_v9 = vadd.s32 128, %v27_v4  ;;  %v33_v10 = vand.u32 15, %v27_v4  ;;  %79 = vst.msk [vmem:[#allocation2 + $0x1] sm:$0x3] %vm5301_vm1, %v76_v6  ;;  %s5232_s0 = smov 126   ;;  %vm219_vm8 = vcmask 1039360  }
   0x5   :  { %s5234_s16 = smov 112   ;;  %s5236_s17 = smov 1   ;;  %vm563_vm9 = vcmask 7168   ;;  %vm674_vm10 = vcmask 121856   ;;  %vm889_vm11 = vcmask 138240   ;;  %vm89_vm12 = vcmask 908288  }
   0x6   :  { %v40_v11 = vand.u32 15, %v28_v9  ;;  %vm43_vm2 = vcmp.ne.s32.totalorder %v33_v10, 0  ;;  %vm49_vm6 = vcmp.ne.s32.totalorder %v33_v10, 15  ;;  %s5238_s18 = smov 110   ;;  %s5239_s19 = smov 15   ;;  %vm334_vm13 = vcmask 1031168  }
   0x7   :  { %v5323_v14 = vsel %vm43_vm2, 1.0, %v8363_v7  ;;  %v5344_v21 = vsel %vm49_vm6, 1.0, %v8363_v7  ;;  %s5241_s20 = smov 96   ;;  %s5243_s21 = smov 95   ;;  %vm444_vm14 = vcmask 916480   ;;  %vm638_vm15 = vcmask 900096  }
   0x8   :  { %vm44_vm3 = vcmp.ne.s32.totalorder %v40_v11, 0  ;;  %8532 = vst [vmem:[#allocation7_spill] sm:$0xff] %v5323_v14  ;;  %vm50_vm5 = vcmp.ne.s32.totalorder %v40_v11, 15  ;;  %s5244_s22 = smov 17   ;;  %s5245_s23 = smov 94   ;;  %vm749_vm0 = vcmask 785408  }
   0x9   :  { %v5326_v15 = vsel %vm44_vm3, 1.0, %v8363_v7  ;;  %v5339_v19 = vsel %vm50_vm5, 1.0, %v8363_v7  ;;  %8535 = vst [vmem:[#allocation10_spill] sm:$0xff] %v5344_v21  ;;  %vm964_vm2 = vcmask 769024  }
   0xa   :  { %8533 = vst [vmem:[#allocation8_spill] sm:$0xff] %v5326_v15  ;;  %4641 = vset.pattern.permute.xlu2 %v8371_v8  ;;  %109 = vperm.xlu1 %4639, %v5315_v12   ;;  %v83_v16 = vrot.slane %v5326_v15, 7  ;;  %v254_v20 = vrot.slane %v5339_v19, 7 }
   0xb   :  { %149 = vperm.xlu2 %4641, %v5320_v13   ;;  %8534 = vst [vmem:[#allocation9_spill] sm:$0xff] %v5339_v19  ;;  %v5377_v27 = vld [vmem:[#allocation2] sm:$0x7] }
   0xc   :  { %v5334_v17 = vsel %vm84_vm4, %v5323_v14, %v83_v16  ;;  %v5351_v22 = vsel %vm84_vm4, %v5344_v21, %v254_v20  ;;  %v165_v28 = vperm.slane %v5377_v27, 0  ;;  %v166_v29 = vperm.slane %v5377_v27, 1  ;;  %v5381_v30 = vld [vmem:[#allocation2 + $0x1] sm:$0x7] }
   0xd   :  { %v4643_v18 = vpack.i.bf16 %v5323_v14, %v5334_v17  ;;  %v5356_v23 = vpack.i.bf16 %v5344_v21, %v5351_v22  ;;  %v5386_v35 = vld [vmem:[#allocation2 + $0x1] sm:$0x3]  ;;  %v167_v36 = vperm.slane %v5377_v27, 2 }
   0xe   :  { %1107 = vst.msk [vmem:[#allocation2 + $0x1] sm:$0x3] %vm5301_vm1, %v4594_v31  ;;  %vm853_vm1 = vcmask 777216  }
   0xf   :  { %4644 = vrot.lane.b32.xlu0 %v4643_v18, %s5227_s11 }
  0x12   :  { %4642 = vset.pattern.permute.xlu1 %v8371_v8 }
  0x13   :  { %153 = vperm.xlu1 %4642, %v5297_v3   ;;  %157 = vperm.xlu2 %4641, %v5315_v12  }
  0x17   :  { %161 = vperm.xlu0 %4648, %v5292_v2  }
  0x1b   :  { %4655 = vset.pattern.permute.xlu1 %v8369_v24  ;;  %4650 = vrot.lane.b32.xlu2 %v5356_v23, %s5229_s12 }
  0x1c   :  { %268 = vperm.xlu1 %4655, %v5297_v3   ;;  %4656 = vset.pattern.permute.xlu2 %v8369_v24 }
  0x1f   :  { %4654 = vset.pattern.permute.xlu0 %v8369_v24 }
  0x20   :  { %264 = vperm.xlu0 %4654, %v5320_v13  }
  0x23   :  { %272 = vperm.xlu2 %4656, %v5315_v12  }
  0x24   :  { %276 = vperm.xlu1 %4655, %v5292_v2  }
  0x28   :  { %4662 = vset.pattern.permute.xlu0 %v8367_v25 }
  0x29   :  { %374 = vperm.xlu0 %4662, %v5320_v13  }
  0x2b   :  { %4658 = vrot.lane.b32.xlu2 %v4643_v18, %s5231_s13 }
  0x2c   :  { %4663 = vset.pattern.permute.xlu1 %v8367_v25  ;;  %4664 = vset.pattern.permute.xlu2 %v8367_v25 }
  0x2d   :  { %378 = vperm.xlu1 %4663, %v5297_v3  }
  0x33   :  { %382 = vperm.xlu2 %4664, %v5315_v12  }
  0x35   :  { %386 = vperm.xlu1 %4663, %v5292_v2  }
  0x5c   :  { %v5375_v26 = vpop.permute.xlu2 %114 }
  0x65   :  { %v150_v32 = vpop.permute.xlu2 %149 }
  0x66   :  { %v171_v33 = vmul.f32 %v165_v28, %v150_v32  ;;  %v172_v34 = vmul.f32 %v166_v29, %v150_v32  ;;  %v173_v37 = vmul.f32 %v167_v36, %v150_v32 }
  0x68   :  { %195 = vrot.lane.b32.xlu1 %v171_v33, %s5231_s13  ;;  %197 = vrot.lane.b32.xlu2 %v172_v34, %s5231_s13 }
  0x6d   :  { %v158_v40 = vpop.permute.xlu2 %157 }
  0x6e   :  { %v178_v48 = vmul.f32 %v166_v29, %v158_v40  ;;  %v177_v49 = vmul.f32 %v165_v28, %v158_v40  ;;  %v179_v50 = vmul.f32 %v167_v36, %v158_v40 }
  0x70   :  { %199 = vrot.lane.b32.xlu1 %v173_v37, %s5231_s13 }
  0x74   :  { %v5394_v38 = vpop.permute.xlu1 %104 }
  0x75   :  { %v5400_v45 = vpop.permute.xlu2 %4650 }
  0x76   :  { %8536 = vst [vmem:[#allocation11_spill] sm:$0xff] %v5400_v45  ;;  %v4652_v47 = vunpack.i.l.bf16 %v5400_v45 }
  0x78   :  { %v258_v51 = vrot.slane %v4652_v47, 7 }
  0x7a   :  { %v5410_v53 = vsel %vm259_vm7, %v258_v51, %v4652_v47 }
  0x7b   :  { %8538 = vst [vmem:[#allocation13_spill] sm:$0xff] %v5410_v53  ;;  %v262_v57 = vmul.f32 %v5410_v53, %v5377_v27 }
  0x7c   :  { %v5396_v39 = vpop.permute.xlu1 %109 }
  0x7d   :  { %v281_v58 = vperm.slane %v262_v57, 1  ;;  %v280_v59 = vperm.slane %v262_v57, 0  ;;  %v282_v61 = vperm.slane %v262_v57, 2  ;;  %v273_v4 = vpop.permute.xlu2 %272 }
  0x7f   :  { %v293_v18 = vmul.f32 %v281_v58, %v273_v4  ;;  %v292_v20 = vmul.f32 %v280_v59, %v273_v4 }
  0x81   :  { %v5402_v46 = vpop.permute.xlu0 %4644 }
  0x82   :  { %8537 = vst [vmem:[#allocation12_spill] sm:$0xff] %v5402_v46 }
  0x85   :  { %v154_v41 = vpop.permute.xlu1 %153  ;;  %v5422_v11 = vpop.permute.xlu2 %4658 }
  0x86   :  { %v175_v42 = vmul.f32 %v166_v29, %v154_v41  ;;  %v174_v43 = vmul.f32 %v165_v28, %v154_v41  ;;  %v176_v44 = vmul.f32 %v167_v36, %v154_v41  ;;  %8539 = vst [vmem:[#allocation14_spill] sm:$0xff] %v5422_v11  ;;  %v4660_v16 = vunpack.i.l.bf16 %v5422_v11 }
  0x88   :  { %203 = vrot.lane.b32.xlu0 %v175_v42, %s5231_s13  ;;  %201 = vrot.lane.b32.xlu2 %v174_v43, %s5231_s13 }
  0x89   :  { %205 = vrot.lane.b32.xlu1 %v176_v44, %s5231_s13  ;;  %v162_v52 = vpop.permute.xlu0 %161  ;;  %v8365_v44 = vmov 4  }
  0x8a   :  { %v181_v54 = vmul.f32 %v166_v29, %v162_v52  ;;  %v180_v55 = vmul.f32 %v165_v28, %v162_v52  ;;  %v182_v56 = vmul.f32 %v167_v36, %v162_v52  ;;  %v294_v28 = vmul.f32 %v282_v61, %v273_v4  ;;  %4667 = vset.pattern.permute.xlu1 %v8365_v44 }
  0x8b   :  { %v369_v29 = vrot.slane %v4660_v16, 7  ;;  %4666 = vset.pattern.permute.xlu0 %v8365_v44  ;;  %4665 = vset.pattern.permute.xlu2 %v8365_v44  ;;  %v8376_v44 = vmov 5  }
  0x8d   :  { %v5430_v32 = vsel %vm219_vm8, %v369_v29, %v4660_v16 }
  0x8e   :  { %v269_v5 = vpop.permute.xlu1 %268  ;;  %8540 = vst [vmem:[#allocation15_spill] sm:$0xff] %v5430_v32  ;;  %v372_v33 = vmul.f32 %v5430_v32, %v5377_v27  ;;  %v8395_v32 = vmov 6  }
  0x8f   :  { %v290_v6 = vmul.f32 %v281_v58, %v269_v5  ;;  %v289_v9 = vmul.f32 %v280_v59, %v269_v5  ;;  %v291_v10 = vmul.f32 %v282_v61, %v269_v5 }
  0x90   :  { %209 = vrot.lane.b32.xlu0 %v178_v48, %s5231_s13  ;;  %207 = vrot.lane.b32.xlu2 %v177_v49, %s5231_s13  ;;  %v391_v40 = vperm.slane %v372_v33, 1  ;;  %v390_v41 = vperm.slane %v372_v33, 0  ;;  %v392_v43 = vperm.slane %v372_v33, 2 }
  0x91   :  { %211 = vrot.lane.b32.xlu1 %v179_v50, %s5231_s13 }
  0x92   :  { %v265_v60 = vpop.permute.xlu0 %264 }
  0x93   :  { %v287_v62 = vmul.f32 %v281_v58, %v265_v60  ;;  %v286_v63 = vmul.f32 %v280_v59, %v265_v60  ;;  %v288_v0 = vmul.f32 %v282_v61, %v265_v60 }
  0x96   :  { %v277_v31 = vpop.permute.xlu1 %276 }
  0x97   :  { %v296_v34 = vmul.f32 %v281_v58, %v277_v31  ;;  %v295_v36 = vmul.f32 %v280_v59, %v277_v31  ;;  %v297_v37 = vmul.f32 %v282_v61, %v277_v31 }
  0x98   :  { %215 = vrot.lane.b32.xlu0 %v181_v54, %s5231_s13  ;;  %213 = vrot.lane.b32.xlu2 %v180_v55, %s5231_s13  ;;  %v383_v55 = vpop.permute.xlu2 %382 }
  0x99   :  { %217 = vrot.lane.b32.xlu1 %v182_v56, %s5231_s13  ;;  %v403_v56 = vmul.f32 %v391_v40, %v383_v55  ;;  %v402_v57 = vmul.f32 %v390_v41, %v383_v55  ;;  %v404_v58 = vmul.f32 %v392_v43, %v383_v55 }
  0x9b   :  { %v375_v42 = vpop.permute.xlu0 %374 }
  0x9c   :  { %v397_v47 = vmul.f32 %v391_v40, %v375_v42  ;;  %v396_v48 = vmul.f32 %v390_v41, %v375_v42  ;;  %v398_v49 = vmul.f32 %v392_v43, %v375_v42 }
  0x9f   :  { %v379_v50 = vpop.permute.xlu1 %378 }
  0xa0   :  { %312 = vrot.lane.b32.xlu0 %v287_v62, %s5232_s0  ;;  %310 = vrot.lane.b32.xlu2 %v286_v63, %s5232_s0  ;;  %v400_v51 = vmul.f32 %v391_v40, %v379_v50  ;;  %v399_v52 = vmul.f32 %v390_v41, %v379_v50  ;;  %v401_v54 = vmul.f32 %v392_v43, %v379_v50 }
  0xa1   :  { %314 = vrot.lane.b32.xlu1 %v288_v0, %s5232_s0 }
  0xa7   :  { %v387_v59 = vpop.permute.xlu1 %386 }
  0xa8   :  { %318 = vrot.lane.b32.xlu0 %v290_v6, %s5232_s0  ;;  %316 = vrot.lane.b32.xlu2 %v289_v9, %s5232_s0  ;;  %v406_v60 = vmul.f32 %v391_v40, %v387_v59  ;;  %v405_v61 = vmul.f32 %v390_v41, %v387_v59  ;;  %v407_v62 = vmul.f32 %v392_v43, %v387_v59 }
  0xa9   :  { %320 = vrot.lane.b32.xlu1 %v291_v10, %s5232_s0 }
  0xb0   :  { %324 = vrot.lane.b32.xlu0 %v293_v18, %s5232_s0  ;;  %322 = vrot.lane.b32.xlu2 %v292_v20, %s5232_s0 }
  0xb1   :  { %326 = vrot.lane.b32.xlu1 %v294_v28, %s5232_s0 }
  0xb8   :  { %330 = vrot.lane.b32.xlu0 %v296_v34, %s5232_s0  ;;  %328 = vrot.lane.b32.xlu2 %v295_v36, %s5232_s0 }
  0xb9   :  { %332 = vrot.lane.b32.xlu1 %v297_v37, %s5232_s0 }
  0xc0   :  { %422 = vrot.lane.b32.xlu0 %v397_v47, %s5234_s16  ;;  %420 = vrot.lane.b32.xlu2 %v396_v48, %s5234_s16 }
  0xc1   :  { %424 = vrot.lane.b32.xlu1 %v398_v49, %s5234_s16 }
  0xc2   :  { %v5451_v63 = vpop.permute.xlu2 %197 }
  0xc8   :  { %428 = vrot.lane.b32.xlu0 %v400_v51, %s5234_s16  ;;  %426 = vrot.lane.b32.xlu2 %v399_v52, %s5234_s16 }
  0xc9   :  { %430 = vrot.lane.b32.xlu1 %v401_v54, %s5234_s16 }
  0xd0   :  { %434 = vrot.lane.b32.xlu0 %v403_v56, %s5234_s16  ;;  %432 = vrot.lane.b32.xlu2 %v402_v57, %s5234_s16  ;;  %v495_v57 = vperm.slane %v5386_v35, 0 }
  0xd1   :  { %436 = vrot.lane.b32.xlu1 %v404_v58, %s5234_s16  ;;  %v496_v58 = vperm.slane %v5386_v35, 1 }
  0xd8   :  { %440 = vrot.lane.b32.xlu0 %v406_v60, %s5234_s16  ;;  %438 = vrot.lane.b32.xlu2 %v405_v61, %s5234_s16 }
  0xd9   :  { %442 = vrot.lane.b32.xlu1 %v407_v62, %s5234_s16 }
  0xda   :  { %v5460_v4 = vpop.permute.xlu1 %195 }
  0xe0   :  { %483 = vperm.xlu0 %4666, %v5297_v3   ;;  %479 = vperm.xlu2 %4665, %v5320_v13  }
  0xe1   :  { %487 = vperm.xlu1 %4667, %v5315_v12  }
  0xe2   :  { %v5457_v0 = vpop.permute.xlu2 %201  ;;  %v5466_v9 = vpop.permute.xlu1 %199 }
  0xe8   :  { %491 = vperm.xlu2 %4665, %v5292_v2   ;;  %4675 = vset.pattern.permute.xlu0 %v8376_v44 }
  0xe9   :  { %4673 = vset.pattern.permute.xlu1 %v8376_v44 }
  0xea   :  { %v5462_v5 = vpop.permute.xlu2 %207 }
  0xf0   :  { %4674 = vset.pattern.permute.xlu2 %v8376_v44 }
  0xf2   :  { %v5464_v6 = vpop.permute.xlu2 %213 }
  0xfa   :  { %v5468_v10 = vpop.permute.xlu0 %203  ;;  %v5470_v16 = vpop.permute.xlu2 %310 }
  0xfb   :  { %v5472_v18 = vpop.permute.xlu1 %205 }
 0x102   :  { %v5474_v20 = vpop.permute.xlu0 %209  ;;  %v5476_v28 = vpop.permute.xlu2 %316 }
 0x103   :  { %v5478_v29 = vpop.permute.xlu1 %211 }
 0x10a   :  { %v5480_v31 = vpop.permute.xlu0 %215  ;;  %v5482_v33 = vpop.permute.xlu2 %322 }
 0x10b   :  { %v5484_v34 = vpop.permute.xlu1 %217 }
 0x112   :  { %v5486_v36 = vpop.permute.xlu0 %312  ;;  %v5488_v37 = vpop.permute.xlu2 %328 }
 0x113   :  { %v5490_v40 = vpop.permute.xlu1 %314 }
 0x11a   :  { %v5492_v41 = vpop.permute.xlu0 %318  ;;  %v5494_v42 = vpop.permute.xlu2 %420 }
 0x11b   :  { %v5496_v43 = vpop.permute.xlu1 %320 }
 0x122   :  { %v5498_v47 = vpop.permute.xlu0 %324  ;;  %v5500_v48 = vpop.permute.xlu2 %426 }
 0x123   :  { %v5502_v49 = vpop.permute.xlu1 %326 }
 0x12a   :  { %v5504_v50 = vpop.permute.xlu0 %330  ;;  %v5506_v51 = vpop.permute.xlu2 %432 }
 0x12b   :  { %v5508_v52 = vpop.permute.xlu1 %332 }
 0x132   :  { %v5510_v54 = vpop.permute.xlu0 %422  ;;  %v5512_v55 = vpop.permute.xlu2 %438 }
 0x133   :  { %8541 = vst [vmem:[#allocation16_spill] sm:$0xff] %v5512_v55  ;;  %v5514_v56 = vpop.permute.xlu1 %424  ;;  %v8399_v55 = vunpack.i.h.bf16 %v5400_v45 }
 0x13a   :  { %v5518_v59 = vpop.permute.xlu0 %428  ;;  %v480_v60 = vpop.permute.xlu2 %479 }
 0x13b   :  { %v5520_v61 = vpop.permute.xlu1 %430  ;;  %v499_v62 = vmul.f32 %v495_v57, %v480_v60  ;;  %v500_v7 = vmul.f32 %v496_v58, %v480_v60 }
 0x13c   :  { %8542 = vst [vmem:[#allocation17_spill] sm:$0xff] %v5520_v61 }
 0x13d   :  { %515 = vrot.lane.b32.xlu1 %v499_v62, %s5227_s11  ;;  %517 = vrot.lane.b32.xlu2 %v500_v7, %s5227_s11 }
 0x142   :  { %v5527_v25 = vpop.permute.xlu0 %434  ;;  %v492_v44 = vpop.permute.xlu2 %491 }
 0x143   :  { %v5529_v35 = vpop.permute.xlu1 %436  ;;  %v505_v19 = vmul.f32 %v495_v57, %v492_v44  ;;  %v506_v21 = vmul.f32 %v496_v58, %v492_v44 }
 0x144   :  { %8543 = vst [vmem:[#allocation18_spill] sm:$0xff] %v5529_v35 }
 0x14a   :  { %v5531_v24 = vpop.permute.xlu0 %440 }
 0x14b   :  { %8544 = vst [vmem:[#allocation19_spill] sm:$0xff] %v5531_v24  ;;  %v5533_v8 = vpop.permute.xlu1 %442 }
 0x14c   :  { %8545 = vst [vmem:[#allocation20_spill] sm:$0xff] %v5533_v8 }
 0x152   :  { %v484_v60 = vpop.permute.xlu0 %483 }
 0x153   :  { %v501_v1 = vmul.f32 %v495_v57, %v484_v60  ;;  %v502_v62 = vmul.f32 %v496_v58, %v484_v60  ;;  %v488_v11 = vpop.permute.xlu1 %487 }
 0x154   :  { %v503_v7 = vmul.f32 %v495_v57, %v488_v11  ;;  %v504_v14 = vmul.f32 %v496_v58, %v488_v11 }
 0x155   :  { %519 = vrot.lane.b32.xlu0 %v501_v1, %s5227_s11  ;;  %521 = vrot.lane.b32.xlu1 %v502_v62, %s5227_s11 }
 0x156   :  { %523 = vrot.lane.b32.xlu2 %v503_v7, %s5227_s11 }
 0x15d   :  { %527 = vrot.lane.b32.xlu1 %v505_v19, %s5227_s11  ;;  %525 = vrot.lane.b32.xlu0 %v504_v14, %s5227_s11 }
 0x15e   :  { %529 = vrot.lane.b32.xlu2 %v506_v21, %s5227_s11 }
 0x165   :  { %4669 = vrot.lane.b32.xlu0 %v5356_v23, %s5236_s17  ;;  %568 = vperm.xlu1 %4673, %v5320_v13  }
 0x166   :  { %572 = vperm.xlu2 %4674, %v5297_v3  }
 0x16d   :  { %580 = vperm.xlu1 %4673, %v5292_v2   ;;  %576 = vperm.xlu0 %4675, %v5315_v12  }
 0x16e   :  { %4682 = vset.pattern.permute.xlu2 %v8395_v32 }
 0x175   :  { %4681 = vset.pattern.permute.xlu1 %v8395_v32  ;;  %4683 = vset.pattern.permute.xlu0 %v8395_v32 }
 0x197   :  { %v5547_v1 = vpop.permute.xlu2 %517 }
 0x1af   :  { %v5549_v11 = vpop.permute.xlu1 %515 }
 0x1b0   :  { %v5553_v14 = vpop.permute.xlu2 %523 }
 0x1b1   :  { %8547 = vst [vmem:[#allocation22_spill] sm:$0xff] %v5553_v14 }
 0x1b8   :  { %v5559_v23 = vpop.permute.xlu2 %529 }
 0x1b9   :  { %8550 = vst [vmem:[#allocation25_spill] sm:$0xff] %v5559_v23 }
 0x1c0   :  { %v573_v53 = vpop.permute.xlu2 %572 }
 0x1c7   :  { %v5551_v19 = vpop.permute.xlu0 %519  ;;  %v5555_v21 = vpop.permute.xlu1 %521 }
 0x1c8   :  { %8546 = vst [vmem:[#allocation21_spill] sm:$0xff] %v5551_v19 }
 0x1c9   :  { %8548 = vst [vmem:[#allocation23_spill] sm:$0xff] %v5555_v21 }
 0x1cf   :  { %v5557_v44 = vpop.permute.xlu0 %525  ;;  %v5561_v57 = vpop.permute.xlu1 %527 }
 0x1d0   :  { %8549 = vst [vmem:[#allocation24_spill] sm:$0xff] %v5557_v44 }
 0x1d1   :  { %8551 = vst [vmem:[#allocation26_spill] sm:$0xff] %v5561_v57 }
 0x1d7   :  { %v5563_v58 = vpop.permute.xlu0 %4669  ;;  %v569_v44 = vpop.permute.xlu1 %568 }
 0x1d8   :  { %8552 = vst [vmem:[#allocation27_spill] sm:$0xff] %v5563_v58  ;;  %v4671_v60 = vunpack.i.l.bf16 %v5563_v58 }
 0x1da   :  { %v562_v62 = vrot.slane %v4671_v60, 7 }
 0x1dc   :  { %v5567_v7 = vsel %vm563_vm9, %v562_v62, %v4671_v60 }
 0x1dd   :  { %8553 = vst [vmem:[#allocation28_spill] sm:$0xff] %v5567_v7  ;;  %v566_v15 = vmul.f32 %v5567_v7, %v5381_v30 }
 0x1df   :  { %v584_v57 = vperm.slane %v566_v15, 0  ;;  %v585_v23 = vperm.slane %v566_v15, 1  ;;  %v586_v60 = vperm.slane %v566_v15, 2  ;;  %v577_v62 = vpop.permute.xlu0 %576  ;;  %v581_v32 = vpop.permute.xlu1 %580  ;;  %v5586_v15 = vmul.f32 0.0, %v8399_v55 }
 0x1e1   :  { %v593_v58 = vmul.f32 %v584_v57, %v573_v53  ;;  %v590_v14 = vmul.f32 %v584_v57, %v569_v44  ;;  %v591_v19 = vmul.f32 %v585_v23, %v569_v44  ;;  %v596_v7 = vmul.f32 %v584_v57, %v577_v62  ;;  %8554 = vst [vmem:[#allocation29_spill] sm:$0xff] %v5586_v15 }
 0x1e2   :  { %v592_v21 = vmul.f32 %v586_v60, %v569_v44  ;;  %v594_v8 = vmul.f32 %v585_v23, %v573_v53  ;;  %v595_v24 = vmul.f32 %v586_v60, %v573_v53  ;;  %v597_v35 = vmul.f32 %v585_v23, %v577_v62 }
 0x1e3   :  { %620 = vrot.lane.b32.xlu0 %v593_v58, %s5238_s18  ;;  %614 = vrot.lane.b32.xlu2 %v590_v14, %s5238_s18  ;;  %v599_v58 = vmul.f32 %v584_v57, %v581_v32  ;;  %v600_v14 = vmul.f32 %v585_v23, %v581_v32 }
 0x1e4   :  { %616 = vrot.lane.b32.xlu1 %v591_v19, %s5238_s18  ;;  %v598_v19 = vmul.f32 %v586_v60, %v577_v62  ;;  %v8405_v62 = vmov 7  }
 0x1eb   :  { %626 = vrot.lane.b32.xlu0 %v596_v7, %s5238_s18  ;;  %618 = vrot.lane.b32.xlu2 %v592_v21, %s5238_s18 }
 0x1ec   :  { %622 = vrot.lane.b32.xlu1 %v594_v8, %s5238_s18  ;;  %v4676_v8 = vpack.i.bf16 %v5586_v15, %v5334_v17 }
 0x1f3   :  { %624 = vrot.lane.b32.xlu2 %v595_v24, %s5238_s18  ;;  %632 = vrot.lane.b32.xlu0 %v599_v58, %s5238_s18  ;;  %v601_v24 = vmul.f32 %v586_v60, %v581_v32 }
 0x1f4   :  { %628 = vrot.lane.b32.xlu1 %v597_v35, %s5238_s18 }
 0x1fb   :  { %630 = vrot.lane.b32.xlu2 %v598_v19, %s5238_s18  ;;  %4677 = vrot.lane.b32.xlu0 %v4676_v8, %s5239_s19 }
 0x1fc   :  { %634 = vrot.lane.b32.xlu1 %v600_v14, %s5238_s18 }
 0x203   :  { %636 = vrot.lane.b32.xlu2 %v601_v24, %s5238_s18  ;;  %687 = vperm.xlu0 %4683, %v5315_v12  }
 0x204   :  { %679 = vperm.xlu1 %4681, %v5320_v13  }
 0x20b   :  { %683 = vperm.xlu2 %4682, %v5297_v3   ;;  %4684 = vset.pattern.permute.xlu0 %v8405_v62 }
 0x20c   :  { %691 = vperm.xlu1 %4681, %v5292_v2  }
 0x213   :  { %4686 = vset.pattern.permute.xlu2 %v8405_v62 }
 0x214   :  { %4685 = vset.pattern.permute.xlu1 %v8405_v62 }
 0x23d   :  { %v5598_v17 = vpop.permute.xlu2 %614 }
 0x245   :  { %v5600_v53 = vpop.permute.xlu2 %618 }
 0x24d   :  { %v5606_v44 = vpop.permute.xlu2 %624 }
 0x24e   :  { %8556 = vst [vmem:[#allocation31_spill] sm:$0xff] %v5606_v44 }
 0x255   :  { %v5602_v35 = vpop.permute.xlu0 %620  ;;  %v5612_v57 = vpop.permute.xlu2 %630 }
 0x256   :  { %8555 = vst [vmem:[#allocation30_spill] sm:$0xff] %v5602_v35  ;;  %v5604_v21 = vpop.permute.xlu1 %616 }
 0x257   :  { %8559 = vst [vmem:[#allocation34_spill] sm:$0xff] %v5612_v57 }
 0x25d   :  { %v5608_v32 = vpop.permute.xlu0 %626  ;;  %v5620_v58 = vpop.permute.xlu2 %636 }
 0x25e   :  { %8557 = vst [vmem:[#allocation32_spill] sm:$0xff] %v5608_v32  ;;  %v5610_v23 = vpop.permute.xlu1 %622 }
 0x25f   :  { %8558 = vst [vmem:[#allocation33_spill] sm:$0xff] %v5610_v23 }
 0x260   :  { %8562 = vst [vmem:[#allocation37_spill] sm:$0xff] %v5620_v58 }
 0x265   :  { %v5614_v7 = vpop.permute.xlu0 %632  ;;  %v684_v45 = vpop.permute.xlu2 %683 }
 0x266   :  { %8560 = vst [vmem:[#allocation35_spill] sm:$0xff] %v5614_v7  ;;  %v5616_v60 = vpop.permute.xlu1 %628 }
 0x267   :  { %8561 = vst [vmem:[#allocation36_spill] sm:$0xff] %v5616_v60 }
 0x26d   :  { %v5623_v19 = vpop.permute.xlu0 %4677 }
 0x26e   :  { %8563 = vst [vmem:[#allocation38_spill] sm:$0xff] %v5623_v19  ;;  %v4679_v8 = vunpack.i.l.bf16 %v5623_v19  ;;  %v5626_v14 = vpop.permute.xlu1 %634 }
 0x26f   :  { %8564 = vst [vmem:[#allocation39_spill] sm:$0xff] %v5626_v14 }
 0x270   :  { %v673_v24 = vrot.slane %v4679_v8, 7 }
 0x272   :  { %v5629_v55 = vsel %vm674_vm10, %v673_v24, %v4679_v8 }
 0x273   :  { %8565 = vst [vmem:[#allocation40_spill] sm:$0xff] %v5629_v55  ;;  %v677_v15 = vmul.f32 %v5629_v55, %v5381_v30 }
 0x275   :  { %v695_v7 = vperm.slane %v677_v15, 0  ;;  %v696_v58 = vperm.slane %v677_v15, 1  ;;  %v697_v19 = vperm.slane %v677_v15, 2  ;;  %v688_v8 = vpop.permute.xlu0 %687 }
 0x276   :  { %v680_v57 = vpop.permute.xlu1 %679 }
 0x277   :  { %v704_v32 = vmul.f32 %v695_v7, %v684_v45  ;;  %v701_v62 = vmul.f32 %v695_v7, %v680_v57  ;;  %v702_v60 = vmul.f32 %v696_v58, %v680_v57  ;;  %v707_v24 = vmul.f32 %v695_v7, %v688_v8 }
 0x278   :  { %v703_v14 = vmul.f32 %v697_v19, %v680_v57  ;;  %v705_v44 = vmul.f32 %v696_v58, %v684_v45  ;;  %v706_v35 = vmul.f32 %v697_v19, %v684_v45  ;;  %v708_v61 = vmul.f32 %v696_v58, %v688_v8 }
 0x279   :  { %731 = vrot.lane.b32.xlu0 %v704_v32, %s5241_s20  ;;  %725 = vrot.lane.b32.xlu2 %v701_v62, %s5241_s20  ;;  %v709_v15 = vmul.f32 %v697_v19, %v688_v8  ;;  %v799_v8 = vperm.slane %v5381_v30, 0 }
 0x27a   :  { %727 = vrot.lane.b32.xlu1 %v702_v60, %s5241_s20 }
 0x27e   :  { %v692_v55 = vpop.permute.xlu1 %691 }
 0x27f   :  { %v710_v23 = vmul.f32 %v695_v7, %v692_v55  ;;  %v711_v32 = vmul.f32 %v696_v58, %v692_v55  ;;  %v712_v57 = vmul.f32 %v697_v19, %v692_v55  ;;  %v801_v19 = vperm.slane %v5381_v30, 2 }
 0x281   :  { %737 = vrot.lane.b32.xlu0 %v707_v24, %s5241_s20  ;;  %729 = vrot.lane.b32.xlu2 %v703_v14, %s5241_s20  ;;  %v800_v14 = vperm.slane %v5381_v30, 1  ;;  %v8419_v24 = vmov 8  }
 0x282   :  { %733 = vrot.lane.b32.xlu1 %v705_v44, %s5241_s20 }
 0x289   :  { %735 = vrot.lane.b32.xlu2 %v706_v35, %s5241_s20  ;;  %743 = vrot.lane.b32.xlu0 %v710_v23, %s5241_s20 }
 0x28a   :  { %739 = vrot.lane.b32.xlu1 %v708_v61, %s5241_s20 }
 0x291   :  { %741 = vrot.lane.b32.xlu2 %v709_v15, %s5241_s20  ;;  %783 = vperm.xlu0 %4684, %v5320_v13  }
 0x292   :  { %745 = vrot.lane.b32.xlu1 %v711_v32, %s5241_s20 }
 0x299   :  { %747 = vrot.lane.b32.xlu2 %v712_v57, %s5241_s20  ;;  %4692 = vset.pattern.permute.xlu0 %v8419_v24 }
 0x29a   :  { %787 = vperm.xlu1 %4685, %v5297_v3  }
 0x2a1   :  { %791 = vperm.xlu2 %4686, %v5315_v12  }
 0x2a2   :  { %795 = vperm.xlu1 %4685, %v5292_v2  }
 0x2a9   :  { %4695 = vset.pattern.permute.xlu2 %v8419_v24 }
 0x2aa   :  { %4694 = vset.pattern.permute.xlu1 %v8419_v24 }
 0x2d3   :  { %v5649_v45 = vpop.permute.xlu2 %725 }
 0x2db   :  { %v5651_v61 = vpop.permute.xlu2 %729 }
 0x2e3   :  { %v5659_v7 = vpop.permute.xlu2 %735 }
 0x2e4   :  { %8568 = vst [vmem:[#allocation43_spill] sm:$0xff] %v5659_v7 }
 0x2eb   :  { %v5653_v35 = vpop.permute.xlu0 %731  ;;  %v5667_v58 = vpop.permute.xlu2 %741 }
 0x2ec   :  { %8566 = vst [vmem:[#allocation41_spill] sm:$0xff] %v5653_v35  ;;  %v5655_v44 = vpop.permute.xlu1 %727 }
 0x2ed   :  { %8572 = vst [vmem:[#allocation47_spill] sm:$0xff] %v5667_v58 }
 0x2f3   :  { %v5657_v23 = vpop.permute.xlu0 %737  ;;  %v5680_v58 = vpop.permute.xlu2 %747 }
 0x2f4   :  { %8567 = vst [vmem:[#allocation42_spill] sm:$0xff] %v5657_v23  ;;  %v5661_v55 = vpop.permute.xlu1 %733 }
 0x2f5   :  { %8569 = vst [vmem:[#allocation44_spill] sm:$0xff] %v5661_v55 }
 0x2f6   :  { %8574 = vst [vmem:[#allocation49_spill] sm:$0xff] %v5680_v58 }
 0x2fb   :  { %v5663_v60 = vpop.permute.xlu0 %743 }
 0x2fc   :  { %8570 = vst [vmem:[#allocation45_spill] sm:$0xff] %v5663_v60  ;;  %v5665_v62 = vpop.permute.xlu1 %739 }
 0x2fd   :  { %8571 = vst [vmem:[#allocation46_spill] sm:$0xff] %v5665_v62 }
 0x303   :  { %v784_v15 = vpop.permute.xlu0 %783 }
 0x304   :  { %v5675_v32 = vpop.permute.xlu1 %745  ;;  %v807_v57 = vmul.f32 %v801_v19, %v784_v15  ;;  %v806_v60 = vmul.f32 %v800_v14, %v784_v15  ;;  %v805_v23 = vmul.f32 %v799_v8, %v784_v15  ;;  %v792_v15 = vpop.permute.xlu2 %791 }
 0x305   :  { %8573 = vst [vmem:[#allocation48_spill] sm:$0xff] %v5675_v32  ;;  %v813_v24 = vmul.f32 %v801_v19, %v792_v15  ;;  %v812_v32 = vmul.f32 %v800_v14, %v792_v15 }
 0x306   :  { %833 = vrot.lane.b32.xlu1 %v807_v57, %s5243_s21  ;;  %831 = vrot.lane.b32.xlu0 %v806_v60, %s5243_s21  ;;  %v811_v57 = vmul.f32 %v799_v8, %v792_v15 }
 0x307   :  { %829 = vrot.lane.b32.xlu2 %v805_v23, %s5243_s21 }
 0x30c   :  { %v788_v62 = vpop.permute.xlu1 %787 }
 0x30d   :  { %v810_v7 = vmul.f32 %v801_v19, %v788_v62  ;;  %v809_v35 = vmul.f32 %v800_v14, %v788_v62  ;;  %v808_v55 = vmul.f32 %v799_v8, %v788_v62  ;;  %v8422_v62 = vunpack.i.h.bf16 %v5402_v46 }
 0x30f   :  { %839 = vrot.lane.b32.xlu1 %v810_v7, %s5243_s21  ;;  %837 = vrot.lane.b32.xlu0 %v809_v35, %s5243_s21  ;;  %v5694_v35 = vmul.f32 0.0, %v8422_v62 }
 0x310   :  { %835 = vrot.lane.b32.xlu2 %v808_v55, %s5243_s21 }
 0x311   :  { %8575 = vst [vmem:[#allocation50_spill] sm:$0xff] %v5694_v35  ;;  %v4687_v55 = vpack.i.bf16 %v5694_v35, %v5351_v22 }
 0x314   :  { %v796_v23 = vpop.permute.xlu1 %795 }
 0x315   :  { %v816_v60 = vmul.f32 %v801_v19, %v796_v23  ;;  %v815_v58 = vmul.f32 %v800_v14, %v796_v23  ;;  %v814_v7 = vmul.f32 %v799_v8, %v796_v23  ;;  %v8576_v19 = vmov 0  }
 0x317   :  { %845 = vrot.lane.b32.xlu1 %v813_v24, %s5243_s21  ;;  %843 = vrot.lane.b32.xlu0 %v812_v32, %s5243_s21 }
 0x318   :  { %841 = vrot.lane.b32.xlu2 %v811_v57, %s5243_s21 }
 0x31f   :  { %851 = vrot.lane.b32.xlu1 %v816_v60, %s5243_s21  ;;  %849 = vrot.lane.b32.xlu0 %v815_v58, %s5243_s21 }
 0x320   :  { %847 = vrot.lane.b32.xlu2 %v814_v7, %s5243_s21 }
 0x327   :  { %898 = vperm.xlu1 %4694, %v5297_v3   ;;  %894 = vperm.xlu0 %4692, %v5320_v13  }
 0x328   :  { %4688 = vrot.lane.b32.xlu2 %v4687_v55, %s5244_s22 }
 0x32f   :  { %906 = vperm.xlu1 %4694, %v5292_v2   ;;  %4693 = vset.pattern.permute.xlu0 %v8576_v19 }
 0x330   :  { %99 = vperm.xlu0 %4693, %v5320_v13   ;;  %902 = vperm.xlu2 %4695, %v5315_v12  }
 0x337   :  { %4697 = vset.pattern.permute.xlu1 %v8576_v19 }
 0x338   :  { %4696 = vset.pattern.permute.xlu2 %v8576_v19 }
 0x361   :  { %v5707_v22 = vpop.permute.xlu2 %829 }
 0x36a   :  { %v5709_v3 = vpop.permute.xlu2 %835 }
 0x372   :  { %v5711_v58 = vpop.permute.xlu2 %841 }
 0x373   :  { %8577 = vst [vmem:[#allocation51_spill] sm:$0xff] %v5711_v58 }
 0x378   :  { %v5713_v14 = vpop.permute.xlu0 %831  ;;  %v5715_v8 = vpop.permute.xlu1 %833 }
 0x37a   :  { %v5717_v2 = vpop.permute.xlu2 %847 }
 0x37b   :  { %8578 = vst [vmem:[#allocation52_spill] sm:$0xff] %v5717_v2 }
 0x381   :  { %v5719_v24 = vpop.permute.xlu0 %837  ;;  %v5721_v13 = vpop.permute.xlu1 %839 }
 0x382   :  { %8579 = vst [vmem:[#allocation53_spill] sm:$0xff] %v5721_v13  ;;  %v5723_v12 = vpop.permute.xlu2 %4688 }
 0x383   :  { %8580 = vst [vmem:[#allocation54_spill] sm:$0xff] %v5723_v12  ;;  %v4690_v32 = vunpack.i.l.bf16 %v5723_v12 }
 0x385   :  { %v888_v23 = vrot.slane %v4690_v32, 7 }
 0x387   :  { %v5731_v60 = vsel %vm889_vm11, %v888_v23, %v4690_v32 }
 0x388   :  { %8582 = vst [vmem:[#allocation56_spill] sm:$0xff] %v5731_v60  ;;  %v892_v55 = vmul.f32 %v5731_v60, %v5381_v30 }
 0x389   :  { %v5726_v15 = vpop.permute.xlu0 %843  ;;  %v5728_v57 = vpop.permute.xlu1 %845 }
 0x38a   :  { %8581 = vst [vmem:[#allocation55_spill] sm:$0xff] %v5726_v15  ;;  %v912_v35 = vperm.slane %v892_v55, 2  ;;  %v911_v19 = vperm.slane %v892_v55, 1  ;;  %v910_v2 = vperm.slane %v892_v55, 0  ;;  %v903_v55 = vpop.permute.xlu2 %902 }
 0x38c   :  { %v924_v60 = vmul.f32 %v912_v35, %v903_v55 }
 0x391   :  { %v5733_v7 = vpop.permute.xlu0 %849  ;;  %v5737_v62 = vpop.permute.xlu1 %851 }
 0x392   :  { %8583 = vst [vmem:[#allocation57_spill] sm:$0xff] %v5733_v7 }
 0x393   :  { %8584 = vst [vmem:[#allocation58_spill] sm:$0xff] %v5737_v62  ;;  %v922_v62 = vmul.f32 %v910_v2, %v903_v55 }
 0x399   :  { %v895_v12 = vpop.permute.xlu0 %894  ;;  %v899_v32 = vpop.permute.xlu1 %898 }
 0x39a   :  { %v918_v58 = vmul.f32 %v912_v35, %v895_v12  ;;  %v917_v15 = vmul.f32 %v911_v19, %v895_v12  ;;  %v916_v13 = vmul.f32 %v910_v2, %v895_v12  ;;  %v921_v23 = vmul.f32 %v912_v35, %v899_v32 }
 0x39b   :  { %v920_v7 = vmul.f32 %v911_v19, %v899_v32  ;;  %v919_v30 = vmul.f32 %v910_v2, %v899_v32  ;;  %v923_v12 = vmul.f32 %v911_v19, %v903_v55 }
 0x39c   :  { %944 = vrot.lane.b32.xlu1 %v918_v58, %s5245_s23  ;;  %942 = vrot.lane.b32.xlu0 %v917_v15, %s5245_s23 }
 0x39d   :  { %940 = vrot.lane.b32.xlu2 %v916_v13, %s5245_s23 }
 0x3a1   :  { %v907_v58 = vpop.permute.xlu1 %906 }
 0x3a2   :  { %v927_v13 = vmul.f32 %v912_v35, %v907_v58  ;;  %v926_v15 = vmul.f32 %v911_v19, %v907_v58  ;;  %v925_v32 = vmul.f32 %v910_v2, %v907_v58  ;;  %v1000_v35 = vld [vmem:[%s8357_s2 + $0x18] sm:$0xff]  ;;  %v8585_v19 = vmov 1  }
 0x3a3   :  { %v4646_v2 = vunpack.i.l.bf16 %v5402_v46  ;;  %v335_v46 = vsel %vm334_vm13, %v5470_v16, %v5486_v36 }
 0x3a4   :  { %950 = vrot.lane.b32.xlu1 %v921_v23, %s5245_s23  ;;  %948 = vrot.lane.b32.xlu0 %v920_v7, %s5245_s23  ;;  %v999_v7 = vld [vmem:[%s8357_s2 + $0x10] sm:$0xff] }
 0x3a5   :  { %946 = vrot.lane.b32.xlu2 %v919_v30, %s5245_s23  ;;  %v88_v23 = vrot.slane %v4646_v2, 7 }
 0x3a7   :  { %v5766_v30 = vsel %vm89_vm12, %v88_v23, %v4646_v2 }
 0x3a8   :  { %8586 = vst [vmem:[#allocation59_spill] sm:$0xff] %v5766_v30  ;;  %v92_v55 = vmul.f32 %v5766_v30, %v5377_v27  ;;  %v221_v27 = vsel %vm219_vm8, %v5451_v63, %v5466_v9 }
 0x3aa   :  { %v5770_v58 = vperm.slane %v92_v55, 0 }
 0x3ac   :  { %956 = vrot.lane.b32.xlu1 %v924_v60, %s5245_s23  ;;  %954 = vrot.lane.b32.xlu0 %v923_v12, %s5245_s23  ;;  %v998_v60 = vld [vmem:[%s8357_s2 + $0x8] sm:$0xff]  ;;  %v100_v12 = vpop.permute.xlu0 %99 }
 0x3ad   :  { %952 = vrot.lane.b32.xlu2 %v922_v62, %s5245_s23  ;;  %v997_v62 = vld [vmem:[%s8357_s2] sm:$0xff] }
 0x3b4   :  { %962 = vrot.lane.b32.xlu1 %v927_v13, %s5245_s23  ;;  %960 = vrot.lane.b32.xlu0 %v926_v15, %s5245_s23  ;;  %v5772_v13 = vperm.slane %v92_v55, 1  ;;  %v5774_v15 = vperm.slane %v92_v55, 2 }
 0x3b5   :  { %958 = vrot.lane.b32.xlu2 %v925_v32, %s5245_s23 }
 0x3bc   :  { %1013 = vperm.xlu1 %4697, %v999_v7   ;;  %1008 = vperm.xlu0 %4693, %v998_v60   ;;  %v124_v7 = vmul.f32 %v5770_v58, %v100_v12  ;;  %v125_v60 = vmul.f32 %v5772_v13, %v100_v12 }
 0x3bd   :  { %1003 = vperm.xlu2 %4696, %v997_v62   ;;  %v126_v62 = vmul.f32 %v5774_v15, %v100_v12  ;;  %v336_v12 = vsel %vm334_vm13, %v5486_v36, %v5490_v40  ;;  %v531_v36 = vsel %vm89_vm12, %v5549_v11, %v5547_v1 }
 0x3be   :  { %v241_v23 = vadd.f32 %v221_v27, %v125_v60 }
 0x3bf   :  { %v242_v55 = vadd.f32 %v5466_v9, %v126_v62  ;;  %v446_v9 = vsel %vm444_vm14, %v5510_v54, %v5514_v56 }
 0x3c4   :  { %4699 = vset.pattern.permute.xlu0 %v8585_v19  ;;  %v356_v19 = vadd.f32 %v336_v12, %v241_v23 }
 0x3c5   :  { %1018 = vperm.xlu2 %4696, %v1000_v35   ;;  %v220_v35 = vsel %vm219_vm8, %v5460_v4, %v5451_v63  ;;  %v357_v63 = vadd.f32 %v5490_v40, %v242_v55 }
 0x3c6   :  { %v240_v2 = vadd.f32 %v220_v35, %v124_v7  ;;  %v445_v7 = vsel %vm444_vm14, %v5494_v42, %v5510_v54  ;;  %v466_v60 = vadd.f32 %v446_v9, %v356_v19  ;;  %v639_v54 = vsel %vm638_vm15, %v5598_v17, %v5604_v21 }
 0x3c7   :  { %v467_v62 = vadd.f32 %v5514_v56, %v357_v63  ;;  %v640_v56 = vsel %vm638_vm15, %v5604_v21, %v5600_v53  ;;  %v128_v63 = vmul.f32 %v5772_v13, %v5394_v38  ;;  %v855_v9 = vsel %vm853_vm1, %v5713_v14, %v5715_v8 }
 0x3c8   :  { %v355_v4 = vadd.f32 %v335_v46, %v240_v2  ;;  %v548_v35 = vadd.f32 %v531_v36, %v466_v60  ;;  %v131_v36 = vmul.f32 %v5772_v13, %v5396_v39 }
 0x3c9   :  { %v549_v42 = vadd.f32 %v5547_v1, %v467_v62  ;;  %v751_v1 = vsel %vm749_vm0, %v5655_v44, %v5651_v61  ;;  %v130_v61 = vmul.f32 %v5770_v58, %v5396_v39 }
 0x3ca   :  { %v465_v16 = vadd.f32 %v445_v7, %v355_v4  ;;  %v660_v27 = vadd.f32 %v639_v54, %v548_v35  ;;  %v127_v4 = vmul.f32 %v5770_v58, %v5394_v38  ;;  %v129_v7 = vmul.f32 %v5774_v15, %v5394_v38 }
 0x3cb   :  { %v661_v2 = vadd.f32 %v640_v56, %v549_v42  ;;  %v222_v38 = vsel %vm219_vm8, %v5457_v0, %v5468_v10  ;;  %v224_v0 = vsel %vm219_vm8, %v5462_v5, %v5474_v20  ;;  %v226_v5 = vsel %vm219_vm8, %v5464_v6, %v5480_v31 }
 0x3cc   :  { %v547_v40 = vadd.f32 %v5549_v11, %v465_v16  ;;  %v750_v11 = vsel %vm749_vm0, %v5649_v45, %v5655_v44  ;;  %v854_v44 = vsel %vm853_vm1, %v5707_v22, %v5713_v14  ;;  %v223_v14 = vsel %vm219_vm8, %v5468_v10, %v5472_v18 }
 0x3cd   :  { %v771_v21 = vadd.f32 %v750_v11, %v660_v27  ;;  %v225_v11 = vsel %vm219_vm8, %v5474_v20, %v5478_v29  ;;  %v338_v20 = vsel %vm334_vm13, %v5492_v41, %v5496_v43 }
 0x3ce   :  { %v659_v19 = vadd.f32 %v5598_v17, %v547_v40  ;;  %v772_v17 = vadd.f32 %v751_v1, %v661_v2  ;;  %v132_v40 = vmul.f32 %v5774_v15, %v5396_v39  ;;  %v134_v39 = vmul.f32 %v5772_v13, %v5375_v26 }
 0x3cf   :  { %v875_v60 = vadd.f32 %v854_v44, %v771_v21  ;;  %v243_v2 = vadd.f32 %v222_v38, %v127_v4  ;;  %v246_v1 = vadd.f32 %v224_v0, %v130_v61  ;;  %v337_v21 = vsel %vm334_vm13, %v5476_v28, %v5492_v41  ;;  %v8588_v38 = vld [vmem:[#allocation18_spill] sm:$0xff] }
 0x3d0   :  { %v770_v53 = vadd.f32 %v5649_v45, %v659_v19  ;;  %v876_v35 = vadd.f32 %v855_v9, %v772_v17  ;;  %v135_v19 = vmul.f32 %v5774_v15, %v5375_v26  ;;  %v247_v6 = vadd.f32 %v225_v11, %v131_v36  ;;  %v8596_v11 = vld [vmem:[#allocation30_spill] sm:$0xff] }
 0x3d1   :  { %v340_v28 = vsel %vm334_vm13, %v5498_v47, %v5502_v49  ;;  %v341_v41 = vsel %vm334_vm13, %v5488_v37, %v5504_v50  ;;  %v342_v44 = vsel %vm334_vm13, %v5504_v50, %v5508_v52  ;;  %v447_v37 = vsel %vm444_vm14, %v5500_v48, %v5518_v59 }
 0x3d2   :  { %v874_v16 = vadd.f32 %v5707_v22, %v770_v53  ;;  %v133_v22 = vmul.f32 %v5770_v58, %v5375_v26  ;;  %v245_v58 = vadd.f32 %v5472_v18, %v129_v7  ;;  %v227_v26 = vsel %vm219_vm8, %v5480_v31, %v5484_v34 }
 0x3d3   :  { %v248_v18 = vadd.f32 %v5478_v29, %v132_v40  ;;  %v250_v29 = vadd.f32 %v227_v26, %v134_v39  ;;  %v251_v31 = vadd.f32 %v5484_v34, %v135_v19  ;;  %v358_v7 = vadd.f32 %v337_v21, %v243_v2  ;;  %v8593_v39 = vld [vmem:[#allocation21_spill] sm:$0xff] }
 0x3d4   :  { %v249_v4 = vadd.f32 %v226_v5, %v133_v22  ;;  %v450_v36 = vsel %vm444_vm14, %v5527_v25, %v8588_v38  ;;  %v8591_v22 = vld [vmem:[#allocation20_spill] sm:$0xff] }
 0x3d5   :  { %v365_v40 = vadd.f32 %v342_v44, %v250_v29 }
 0x3f7   :  { %v941_v32 = vpop.permute.xlu2 %940 }
 0x3f8   :  { %v985_v8 = vadd.f32 %v941_v32, %v874_v16  ;;  %v449_v16 = vsel %vm444_vm14, %v5506_v51, %v5527_v25 }
 0x3ff   :  { %v5792_v30 = vpop.permute.xlu2 %946 }
 0x407   :  { %v5805_v46 = vpop.permute.xlu2 %952 }
 0x40e   :  { %v943_v23 = vpop.permute.xlu0 %942  ;;  %v945_v55 = vpop.permute.xlu1 %944 }
 0x40f   :  { %v5822_v12 = vpop.permute.xlu2 %958  ;;  %v965_v45 = vsel %vm964_vm2, %v941_v32, %v943_v23  ;;  %v966_v62 = vsel %vm964_vm2, %v943_v23, %v945_v55  ;;  %v244_v55 = vadd.f32 %v223_v14, %v128_v63  ;;  %v339_v63 = vsel %vm334_vm13, %v5482_v33, %v5498_v47  ;;  %v8590_v14 = vld [vmem:[#allocation16_spill] sm:$0xff] }
 0x410   :  { %v986_v42 = vadd.f32 %v965_v45, %v875_v60  ;;  %v987_v10 = vadd.f32 %v966_v62, %v876_v35  ;;  %v360_v33 = vadd.f32 %v5496_v43, %v245_v58  ;;  %v361_v9 = vadd.f32 %v339_v63, %v246_v1  ;;  %v8587_v62 = vld [vmem:[#allocation17_spill] sm:$0xff]  ;;  %v8589_v35 = vld [vmem:[#allocation19_spill] sm:$0xff] }
 0x411   :  { %v359_v61 = vadd.f32 %v338_v20, %v244_v55  ;;  %v363_v47 = vadd.f32 %v5502_v49, %v248_v18  ;;  %v362_v43 = vadd.f32 %v340_v28, %v247_v6  ;;  %v364_v60 = vadd.f32 %v341_v41, %v249_v4  ;;  %v8595_v55 = vld [vmem:[#allocation33_spill] sm:$0xff]  ;;  %v8599_v20 = vld [vmem:[#allocation24_spill] sm:$0xff]  ;;  %v8602_v28 = vld [vmem:[#allocation26_spill] sm:$0xff] }
 0x412   :  { %v448_v50 = vsel %vm444_vm14, %v5518_v59, %v8587_v62  ;;  %v366_v49 = vadd.f32 %v5508_v52, %v251_v31  ;;  %v451_v48 = vsel %vm444_vm14, %v8590_v14, %v8589_v35  ;;  %v452_v51 = vsel %vm444_vm14, %v8589_v35, %v8591_v22  ;;  %v8592_v59 = vld [vmem:[#allocation23_spill] sm:$0xff]  ;;  %v8600_v4 = vld [vmem:[#allocation44_spill] sm:$0xff]  ;;  %v8601_v63 = vld [vmem:[#allocation41_spill] sm:$0xff] }
 0x413   :  { %v471_v0 = vadd.f32 %v449_v16, %v361_v9  ;;  %v532_v19 = vsel %vm89_vm12, %v8593_v39, %v8592_v59  ;;  %v469_v25 = vadd.f32 %v448_v50, %v359_v61  ;;  %v473_v52 = vadd.f32 %v8588_v38, %v363_v47  ;;  %v8605_v16 = vld [vmem:[#allocation32_spill] sm:$0xff]  ;;  %v8606_v50 = vld [vmem:[#allocation34_spill] sm:$0xff] }
 0x414   :  { %v474_v2 = vadd.f32 %v451_v48, %v364_v60  ;;  %v475_v58 = vadd.f32 %v452_v51, %v365_v40  ;;  %v641_v5 = vsel %vm638_vm15, %v8596_v11, %v8595_v55  ;;  %v752_v29 = vsel %vm749_vm0, %v8601_v63, %v8600_v4 }
 0x415   :  { %v555_v6 = vadd.f32 %v8599_v20, %v473_v52  ;;  %v856_v60 = vsel %vm853_vm1, %v5709_v3, %v5719_v24 }
 0x416   :  { %v5854_v54 = vpop.permute.xlu0 %948  ;;  %v5856_v56 = vpop.permute.xlu1 %950  ;;  %v556_v9 = vadd.f32 %v8602_v28, %v474_v2  ;;  %v8611_v2 = vld [vmem:[#allocation35_spill] sm:$0xff] }
 0x417   :  { %v1004_v27 = vpop.permute.xlu2 %1003  ;;  %v967_v51 = vsel %vm964_vm2, %v5792_v30, %v5854_v54 }
 0x418   :  { %v1021_v32 = vadd.f32 %v1004_v27, %v985_v8  ;;  %v1022_v23 = vadd.f32 %v1004_v27, %v986_v42  ;;  %v1023_v13 = vadd.f32 %v1004_v27, %v987_v10  ;;  %v468_v8 = vadd.f32 %v447_v37, %v358_v7  ;;  %v8604_v37 = vld [vmem:[#allocation36_spill] sm:$0xff] }
 0x419   :  { %v470_v42 = vadd.f32 %v8587_v62, %v360_v33  ;;  %v472_v10 = vadd.f32 %v450_v36, %v362_v43  ;;  %v476_v27 = vadd.f32 %v8591_v22, %v366_v49  ;;  %v8603_v33 = vld [vmem:[#allocation43_spill] sm:$0xff]  ;;  %v643_v43 = vsel %vm638_vm15, %v8605_v16, %v8604_v37  ;;  %v8607_v49 = vld [vmem:[#allocation53_spill] sm:$0xff] }
 0x41a   :  { %v1033_v15 = vmax.f32 %v1021_v32, 0.0  ;;  %v1034_v53 = vmax.f32 %v1022_v23, 0.0  ;;  %v1035_v17 = vmax.f32 %v1023_v13, 0.0  ;;  %v8594_v32 = vld [vmem:[#allocation22_spill] sm:$0xff]  ;;  %v8597_v13 = vld [vmem:[#allocation25_spill] sm:$0xff]  ;;  %v550_v26 = vadd.f32 %v8593_v39, %v468_v8 }
 0x41b   :  { %v553_v23 = vadd.f32 %v8594_v32, %v471_v0  ;;  %v5934_v1 = vadd.f32 %v8597_v13, %v476_v27  ;;  %v552_v21 = vadd.f32 %v8592_v59, %v470_v42  ;;  %v534_v41 = vsel %vm89_vm12, %v8602_v28, %v8597_v13  ;;  %v8610_v27 = vld [vmem:[#allocation39_spill] sm:$0xff] }
 0x41c   :  { %1059 = vrot.lane.b32.xlu2 %v1034_v53, %s5244_s22  ;;  %1057 = vrot.lane.b32.xlu1 %v1033_v15, %s5244_s22  ;;  %v551_v15 = vadd.f32 %v532_v19, %v469_v25  ;;  %v8598_v53 = vld [vmem:[#allocation31_spill] sm:$0xff]  ;;  %v662_v7 = vadd.f32 %v8596_v11, %v550_v26  ;;  %v753_v44 = vsel %vm749_vm0, %v8600_v4, %v8603_v33  ;;  %v8608_v25 = vld [vmem:[#allocation46_spill] sm:$0xff]  ;;  %v8613_v11 = vld [vmem:[#allocation37_spill] sm:$0xff] }
 0x41d   :  { %1061 = vrot.lane.b32.xlu0 %v1035_v17, %s5244_s22  ;;  %v642_v18 = vsel %vm638_vm15, %v8595_v55, %v8598_v53  ;;  %v533_v17 = vsel %vm89_vm12, %v8594_v32, %v8599_v20  ;;  %v644_v38 = vsel %vm638_vm15, %v8604_v37, %v8606_v50  ;;  %v857_v35 = vsel %vm853_vm1, %v5719_v24, %v8607_v49  ;;  %v8609_v24 = vld [vmem:[#allocation42_spill] sm:$0xff]  ;;  %v8612_v32 = vld [vmem:[#allocation47_spill] sm:$0xff]  ;;  %v8616_v33 = vld [vmem:[#allocation48_spill] sm:$0xff] }
 0x41e   :  { %v5899_v45 = vpop.permute.xlu0 %954  ;;  %v5901_v34 = vpop.permute.xlu1 %956  ;;  %v663_v61 = vadd.f32 %v641_v5, %v551_v15  ;;  %v664_v47 = vadd.f32 %v642_v18, %v552_v21  ;;  %v773_v36 = vadd.f32 %v8601_v63, %v662_v7  ;;  %v554_v14 = vadd.f32 %v533_v17, %v472_v10  ;;  %v8614_v5 = vld [vmem:[#allocation55_spill] sm:$0xff] }
 0x41f   :  { %v557_v48 = vadd.f32 %v534_v41, %v475_v58  ;;  %v665_v8 = vadd.f32 %v8605_v16, %v553_v23  ;;  %v968_v59 = vsel %vm964_vm2, %v5854_v54, %v5856_v56  ;;  %v667_v19 = vadd.f32 %v644_v38, %v555_v6  ;;  %v8615_v13 = vld [vmem:[#allocation51_spill] sm:$0xff] }
 0x420   :  { %v774_v40 = vadd.f32 %v752_v29, %v663_v61  ;;  %v775_v22 = vadd.f32 %v753_v44, %v664_v47  ;;  %v877_v42 = vadd.f32 %v5709_v3, %v773_v36  ;;  %v666_v39 = vadd.f32 %v643_v43, %v554_v14  ;;  %v8618_v43 = vld [vmem:[#allocation49_spill] sm:$0xff] }
 0x421   :  { %v754_v10 = vsel %vm749_vm0, %v8609_v24, %v8608_v25  ;;  %v645_v58 = vsel %vm638_vm15, %v8611_v2, %v8610_v27  ;;  %v755_v3 = vsel %vm749_vm0, %v8608_v25, %v8612_v32  ;;  %v646_v54 = vsel %vm638_vm15, %v8610_v27, %v8613_v11  ;;  %v8619_v36 = vld [vmem:[#allocation57_spill] sm:$0xff]  ;;  %v6049_v11 = vld [vmem:[%s8355_s1] sm:$0xff] }
 0x422   :  { %v878_v0 = vadd.f32 %v856_v60, %v774_v40  ;;  %v879_v52 = vadd.f32 %v857_v35, %v775_v22  ;;  %v988_v23 = vadd.f32 %v5792_v30, %v877_v42  ;;  %v776_v56 = vadd.f32 %v8609_v24, %v665_v8  ;;  %v8620_v40 = vld [vmem:[#allocation52_spill] sm:$0xff] }
 0x423   :  { %v858_v26 = vsel %vm853_vm1, %v8615_v13, %v8614_v5  ;;  %v777_v18 = vadd.f32 %v754_v10, %v666_v39  ;;  %v859_v21 = vsel %vm853_vm1, %v8614_v5, %v5728_v57  ;;  %v778_v17 = vadd.f32 %v755_v3, %v667_v19  ;;  %v8617_v57 = vld [vmem:[#allocation45_spill] sm:$0xff] }
 0x424   :  { %v989_v55 = vadd.f32 %v967_v51, %v878_v0  ;;  %v990_v15 = vadd.f32 %v968_v59, %v879_v52  ;;  %v880_v6 = vadd.f32 %v8615_v13, %v776_v56  ;;  %v969_v4 = vsel %vm964_vm2, %v5805_v46, %v5899_v45  ;;  %v1019_v52 = vpop.permute.xlu2 %1018  ;;  %v6066_v13 = vld [vmem:[%s8355_s1 + $0x10] sm:$0xff] }
 0x425   :  { %v881_v29 = vadd.f32 %v858_v26, %v777_v18  ;;  %v970_v28 = vsel %vm964_vm2, %v5899_v45, %v5901_v34  ;;  %v669_v61 = vadd.f32 %v645_v58, %v557_v48  ;;  %v756_v44 = vsel %vm749_vm0, %v8617_v57, %v8616_v33  ;;  %v8621_v48 = vld [vmem:[#allocation58_spill] sm:$0xff] }
 0x426   :  { %v5948_v31 = vpop.permute.xlu0 %960  ;;  %v5964_v62 = vpop.permute.xlu1 %962  ;;  %v882_v47 = vadd.f32 %v859_v21, %v778_v17  ;;  %v757_v60 = vsel %vm749_vm0, %v8616_v33, %v8618_v43  ;;  %v991_v50 = vadd.f32 %v5805_v46, %v880_v6  ;;  %v668_v45 = vadd.f32 %v8611_v2, %v556_v9 }
 0x427   :  { %v992_v38 = vadd.f32 %v969_v4, %v881_v29  ;;  %v670_v34 = vadd.f32 %v646_v54, %v5934_v1  ;;  %v860_v49 = vsel %vm853_vm1, %v8620_v40, %v8619_v36  ;;  %v780_v14 = vadd.f32 %v756_v44, %v669_v61  ;;  %v6057_v54 = vld [vmem:[%s8355_s1 + $0x18] sm:$0xff]  ;;  %v6091_v4 = vld [vmem:[#allocation2] sm:$0x7] }
 0x428   :  { %v993_v35 = vadd.f32 %v970_v28, %v882_v47  ;;  %v861_v46 = vsel %vm853_vm1, %v8619_v36, %v8621_v48  ;;  %v971_v9 = vsel %vm964_vm2, %v5822_v12, %v5948_v31  ;;  %v779_v42 = vadd.f32 %v8617_v57, %v668_v45 }
 0x429   :  { %v781_v8 = vadd.f32 %v757_v60, %v670_v34  ;;  %v884_v0 = vadd.f32 %v860_v49, %v780_v14  ;;  %v972_v59 = vsel %vm964_vm2, %v5948_v31, %v5964_v62  ;;  %v8622_v56 = vmov 1  }
 0x42a   :  { %v883_v19 = vadd.f32 %v8620_v40, %v779_v42  ;;  %v8623_v5 = vmov 2   ;;  %v1183_v29 = vperm.slane %v6091_v4, 1  ;;  %v1184_v28 = vperm.slane %v6091_v4, 2 }
 0x42b   :  { %v885_v39 = vadd.f32 %v861_v46, %v781_v8  ;;  %v995_v25 = vadd.f32 %v971_v9, %v884_v0 }
 0x42c   :  { %v994_v58 = vadd.f32 %v5822_v12, %v883_v19  ;;  %v6044_v12 = vld [vmem:[%s8355_s1 + $0x8] sm:$0xff] }
 0x42d   :  { %v996_v27 = vadd.f32 %v972_v59, %v885_v39  ;;  %v1031_v3 = vadd.f32 %v1019_v52, %v995_v25  ;;  %v8637_v59 = vld [vmem:[#allocation13_spill] sm:$0xff] }
 0x42e   :  { %v1009_v53 = vpop.permute.xlu0 %1008  ;;  %v1014_v37 = vpop.permute.xlu1 %1013  ;;  %v1030_v32 = vadd.f32 %v1019_v52, %v994_v58  ;;  %v1268_v39 = vmul.f32 %v6091_v4, %v8637_v59 }
 0x42f   :  { %v1024_v20 = vadd.f32 %v1009_v53, %v988_v23  ;;  %v1025_v30 = vadd.f32 %v1009_v53, %v989_v55  ;;  %v1026_v63 = vadd.f32 %v1009_v53, %v990_v15  ;;  %v1027_v22 = vadd.f32 %v1014_v37, %v991_v50 }
 0x430   :  { %v1028_v51 = vadd.f32 %v1014_v37, %v992_v38  ;;  %v1029_v1 = vadd.f32 %v1014_v37, %v993_v35  ;;  %v1032_v31 = vadd.f32 %v1019_v52, %v996_v27  ;;  %v1042_v62 = vmax.f32 %v1030_v32, 0.0 }
 0x431   :  { %v1036_v41 = vmax.f32 %v1024_v20, 0.0  ;;  %v1037_v7 = vmax.f32 %v1025_v30, 0.0  ;;  %v1038_v16 = vmax.f32 %v1026_v63, 0.0  ;;  %v1039_v24 = vmax.f32 %v1027_v22, 0.0 }
 0x432   :  { %v1040_v10 = vmax.f32 %v1028_v51, 0.0  ;;  %v1041_v2 = vmax.f32 %v1029_v1, 0.0  ;;  %v1043_v23 = vmax.f32 %v1031_v3, 0.0  ;;  %v1044_v55 = vmax.f32 %v1032_v31, 0.0 }
 0x433   :  { %1065 = vrot.lane.b32.xlu2 %v1037_v7, %s5244_s22  ;;  %1063 = vrot.lane.b32.xlu1 %v1036_v41, %s5244_s22  ;;  %v1182_v63 = vperm.slane %v6091_v4, 0  ;;  %v8636_v22 = vmov 3   ;;  %v1286_v19 = vperm.slane %v1268_v39, 0  ;;  %v1287_v3 = vperm.slane %v1268_v39, 1 }
 0x434   :  { %1067 = vrot.lane.b32.xlu0 %v1038_v16, %s5244_s22 }
 0x43b   :  { %1071 = vrot.lane.b32.xlu2 %v1040_v10, %s5244_s22  ;;  %1069 = vrot.lane.b32.xlu1 %v1039_v24, %s5244_s22 }
 0x43c   :  { %1073 = vrot.lane.b32.xlu0 %v1041_v2, %s5244_s22 }
 0x443   :  { %1077 = vrot.lane.b32.xlu2 %v1043_v23, %s5244_s22  ;;  %1075 = vrot.lane.b32.xlu1 %v1042_v62, %s5244_s22 }
 0x444   :  { %1079 = vrot.lane.b32.xlu0 %v1044_v55, %s5244_s22 }
 0x44b   :  { %1121 = vperm.xlu2 %4696, %v6044_v12   ;;  %1116 = vperm.xlu1 %4697, %v6049_v11  }
 0x44c   :  { %1170 = vperm.xlu0 %4699, %v6044_v12  }
 0x453   :  { %4698 = vset.pattern.permute.xlu2 %v8622_v56  ;;  %1131 = vperm.xlu1 %4697, %v6057_v54  }
 0x454   :  { %1166 = vperm.xlu2 %4698, %v6049_v11   ;;  %4703 = vset.pattern.permute.xlu0 %v8623_v5 }
 0x45b   :  { %4700 = vset.pattern.permute.xlu1 %v8622_v56 }
 0x45c   :  { %1174 = vperm.xlu1 %4700, %v6066_v13   ;;  %1178 = vperm.xlu2 %4698, %v6057_v54  }
 0x464   :  { %4702 = vset.pattern.permute.xlu2 %v8623_v5  ;;  %4701 = vset.pattern.permute.xlu1 %v8623_v5  ;;  %v1288_v5 = vperm.slane %v1268_v39, 2 }
 0x476   :  { %v6073_v26 = vpop.permute.xlu2 %1059 }
 0x477   :  { %8624 = vst [vmem:[#allocation17_spill] sm:$0xff] %v6073_v26 }
 0x48d   :  { %v6075_v15 = vpop.permute.xlu2 %1065 }
 0x48e   :  { %8625 = vst [vmem:[#allocation18_spill] sm:$0xff] %v6075_v15  ;;  %v6079_v18 = vpop.permute.xlu1 %1057 }
 0x48f   :  { %8627 = vst [vmem:[#allocation16_spill] sm:$0xff] %v6079_v18  ;;  %v6083_v20 = vpop.permute.xlu0 %1061 }
 0x490   :  { %8629 = vst [vmem:[#allocation23_spill] sm:$0xff] %v6083_v20 }
 0x495   :  { %v6077_v53 = vpop.permute.xlu2 %1071 }
 0x496   :  { %8626 = vst [vmem:[#allocation19_spill] sm:$0xff] %v6077_v53 }
 0x49d   :  { %v6081_v21 = vpop.permute.xlu2 %1077 }
 0x49e   :  { %8628 = vst [vmem:[#allocation20_spill] sm:$0xff] %v6081_v21 }
 0x4a5   :  { %v6085_v30 = vpop.permute.xlu2 %1121  ;;  %v6087_v17 = vpop.permute.xlu1 %1063 }
 0x4a6   :  { %8630 = vst [vmem:[#allocation21_spill] sm:$0xff] %v6087_v17  ;;  %v6089_v6 = vpop.permute.xlu0 %1067 }
 0x4a7   :  { %8631 = vst [vmem:[#allocation22_spill] sm:$0xff] %v6089_v6 }
 0x4ad   :  { %v6096_v41 = vpop.permute.xlu1 %1069 }
 0x4ae   :  { %8632 = vst [vmem:[#allocation33_spill] sm:$0xff] %v6096_v41  ;;  %v6098_v7 = vpop.permute.xlu0 %1073  ;;  %v1167_v61 = vpop.permute.xlu2 %1166 }
 0x4af   :  { %8633 = vst [vmem:[#allocation30_spill] sm:$0xff] %v6098_v7  ;;  %v1188_v33 = vmul.f32 %v1182_v63, %v1167_v61  ;;  %v1189_v57 = vmul.f32 %v1183_v29, %v1167_v61  ;;  %v1190_v44 = vmul.f32 %v1184_v28, %v1167_v61 }
 0x4b1   :  { %1216 = vrot.lane.b32.xlu0 %v1190_v44, %s5231_s13  ;;  %1212 = vrot.lane.b32.xlu1 %v1188_v33, %s5231_s13 }
 0x4b2   :  { %1214 = vrot.lane.b32.xlu2 %v1189_v57, %s5231_s13 }
 0x4b5   :  { %v6103_v47 = vpop.permute.xlu1 %1075 }
 0x4b6   :  { %8634 = vst [vmem:[#allocation25_spill] sm:$0xff] %v6103_v47  ;;  %v6105_v37 = vpop.permute.xlu0 %1079  ;;  %v1179_v35 = vpop.permute.xlu2 %1178 }
 0x4b7   :  { %8635 = vst [vmem:[#allocation31_spill] sm:$0xff] %v6105_v37  ;;  %v1198_v14 = vmul.f32 %v1183_v29, %v1179_v35  ;;  %v1199_v48 = vmul.f32 %v1184_v28, %v1179_v35  ;;  %v1197_v46 = vmul.f32 %v1182_v63, %v1179_v35 }
 0x4bd   :  { %v6107_v16 = vpop.permute.xlu1 %1116 }
 0x4be   :  { %v1171_v43 = vpop.permute.xlu0 %1170 }
 0x4bf   :  { %v1191_v60 = vmul.f32 %v1182_v63, %v1171_v43  ;;  %v1192_v50 = vmul.f32 %v1183_v29, %v1171_v43  ;;  %v1193_v38 = vmul.f32 %v1184_v28, %v1171_v43 }
 0x4c1   :  { %1222 = vrot.lane.b32.xlu0 %v1193_v38, %s5231_s13  ;;  %1218 = vrot.lane.b32.xlu1 %v1191_v60, %s5231_s13  ;;  %v8638_v60 = vmov 4  }
 0x4c2   :  { %1220 = vrot.lane.b32.xlu2 %v1192_v50, %s5231_s13 }
 0x4c5   :  { %v6112_v45 = vpop.permute.xlu1 %1131 }
 0x4ce   :  { %v1175_v34 = vpop.permute.xlu1 %1174 }
 0x4cf   :  { %v1194_v36 = vmul.f32 %v1182_v63, %v1175_v34  ;;  %v1195_v40 = vmul.f32 %v1183_v29, %v1175_v34  ;;  %v1196_v49 = vmul.f32 %v1184_v28, %v1175_v34 }
 0x4d1   :  { %1228 = vrot.lane.b32.xlu0 %v1196_v49, %s5231_s13  ;;  %1226 = vrot.lane.b32.xlu2 %v1195_v40, %s5231_s13 }
 0x4d2   :  { %1224 = vrot.lane.b32.xlu1 %v1194_v36, %s5231_s13 }
 0x4d9   :  { %1234 = vrot.lane.b32.xlu0 %v1199_v48, %s5231_s13  ;;  %1232 = vrot.lane.b32.xlu2 %v1198_v14, %s5231_s13 }
 0x4da   :  { %1230 = vrot.lane.b32.xlu1 %v1197_v46, %s5231_s13  ;;  %v8639_v46 = vld [vmem:[#allocation15_spill] sm:$0xff] }
 0x4e1   :  { %1278 = vperm.xlu0 %4703, %v6066_v13   ;;  %1274 = vperm.xlu2 %4702, %v6044_v12  }
 0x4e2   :  { %1270 = vperm.xlu1 %4701, %v6049_v11  }
 0x4e9   :  { %4704 = vset.pattern.permute.xlu0 %v8636_v22  ;;  %4706 = vset.pattern.permute.xlu2 %v8636_v22 }
 0x4ea   :  { %1282 = vperm.xlu1 %4701, %v6057_v54  }
 0x4f2   :  { %4705 = vset.pattern.permute.xlu1 %v8636_v22  ;;  %v1372_v22 = vmul.f32 %v6091_v4, %v8639_v46 }
 0x4f4   :  { %v1390_v59 = vperm.slane %v1372_v22, 0  ;;  %v1391_v39 = vperm.slane %v1372_v22, 1 }
 0x50c   :  { %v6127_v51 = vpop.permute.xlu2 %1214 }
 0x51c   :  { %v6129_v8 = vpop.permute.xlu2 %1220 }
 0x523   :  { %v6133_v1 = vpop.permute.xlu0 %1216  ;;  %v6135_v42 = vpop.permute.xlu1 %1212 }
 0x52b   :  { %v6131_v9 = vpop.permute.xlu2 %1226 }
 0x533   :  { %v6137_v0 = vpop.permute.xlu2 %1232  ;;  %v6141_v25 = vpop.permute.xlu0 %1222 }
 0x534   :  { %v6143_v24 = vpop.permute.xlu1 %1218 }
 0x53b   :  { %v1275_v10 = vpop.permute.xlu2 %1274 }
 0x53c   :  { %v1295_v52 = vmul.f32 %v1286_v19, %v1275_v10  ;;  %v1296_v29 = vmul.f32 %v1287_v3, %v1275_v10  ;;  %v1297_v33 = vmul.f32 %v1288_v5, %v1275_v10 }
 0x53e   :  { %1322 = vrot.lane.b32.xlu0 %v1295_v52, %s5232_s0 }
 0x543   :  { %v6146_v27 = vpop.permute.xlu0 %1228 }
 0x544   :  { %v6148_v2 = vpop.permute.xlu1 %1224 }
 0x54b   :  { %v6150_v58 = vpop.permute.xlu0 %1234 }
 0x54c   :  { %v6152_v32 = vpop.permute.xlu1 %1230 }
 0x553   :  { %v1279_v31 = vpop.permute.xlu0 %1278 }
 0x554   :  { %v1298_v62 = vmul.f32 %v1286_v19, %v1279_v31  ;;  %v1271_v23 = vpop.permute.xlu1 %1270  ;;  %v1299_v57 = vmul.f32 %v1287_v3, %v1279_v31  ;;  %v1300_v44 = vmul.f32 %v1288_v5, %v1279_v31 }
 0x555   :  { %v1292_v55 = vmul.f32 %v1286_v19, %v1271_v23  ;;  %v1293_v56 = vmul.f32 %v1287_v3, %v1271_v23  ;;  %v1294_v28 = vmul.f32 %v1288_v5, %v1271_v23 }
 0x556   :  { %1328 = vrot.lane.b32.xlu0 %v1298_v62, %s5232_s0 }
 0x557   :  { %1318 = vrot.lane.b32.xlu1 %v1293_v56, %s5232_s0  ;;  %1316 = vrot.lane.b32.xlu2 %v1292_v55, %s5232_s0 }
 0x55c   :  { %v1283_v63 = vpop.permute.xlu1 %1282 }
 0x55d   :  { %v1301_v61 = vmul.f32 %v1286_v19, %v1283_v63  ;;  %v1302_v43 = vmul.f32 %v1287_v3, %v1283_v63  ;;  %v1303_v50 = vmul.f32 %v1288_v5, %v1283_v63  ;;  %v1392_v19 = vperm.slane %v1372_v22, 2 }
 0x55e   :  { %v8640_v22 = vmov 5  }
 0x55f   :  { %1324 = vrot.lane.b32.xlu1 %v1296_v29, %s5232_s0  ;;  %1320 = vrot.lane.b32.xlu2 %v1294_v28, %s5232_s0 }
 0x560   :  { %1334 = vrot.lane.b32.xlu0 %v1301_v61, %s5232_s0 }
 0x567   :  { %1330 = vrot.lane.b32.xlu1 %v1299_v57, %s5232_s0  ;;  %1326 = vrot.lane.b32.xlu2 %v1297_v33, %s5232_s0 }
 0x568   :  { %1374 = vperm.xlu0 %4704, %v6049_v11  }
 0x56f   :  { %1332 = vrot.lane.b32.xlu2 %v1300_v44, %s5232_s0  ;;  %1336 = vrot.lane.b32.xlu1 %v1302_v43, %s5232_s0 }
 0x570   :  { %4708 = vset.pattern.permute.xlu0 %v8638_v60 }
 0x577   :  { %1338 = vrot.lane.b32.xlu2 %v1303_v50, %s5232_s0  ;;  %1378 = vperm.xlu1 %4705, %v6044_v12  }
 0x57f   :  { %1382 = vperm.xlu2 %4706, %v6066_v13   ;;  %1386 = vperm.xlu1 %4705, %v6057_v54  }
 0x587   :  { %4707 = vset.pattern.permute.xlu2 %v8638_v60  ;;  %4709 = vset.pattern.permute.xlu1 %v8638_v60 }
 0x5b0   :  { %v6174_v34 = vpop.permute.xlu0 %1322 }
 0x5b1   :  { %v6172_v38 = vpop.permute.xlu2 %1316 }
 0x5b9   :  { %v6176_v36 = vpop.permute.xlu2 %1320 }
 0x5c1   :  { %v6182_v35 = vpop.permute.xlu2 %1326 }
 0x5c8   :  { %v6178_v40 = vpop.permute.xlu0 %1328 }
 0x5c9   :  { %v6180_v49 = vpop.permute.xlu1 %1318  ;;  %v6192_v3 = vpop.permute.xlu2 %1332 }
 0x5d1   :  { %v6184_v14 = vpop.permute.xlu1 %1324  ;;  %v6199_v56 = vpop.permute.xlu2 %1338 }
 0x5d2   :  { %v6186_v48 = vpop.permute.xlu0 %1334 }
 0x5d9   :  { %v6190_v10 = vpop.permute.xlu1 %1330  ;;  %v1383_v61 = vpop.permute.xlu2 %1382 }
 0x5da   :  { %v1375_v52 = vpop.permute.xlu0 %1374  ;;  %v1403_v33 = vmul.f32 %v1391_v39, %v1383_v61  ;;  %v1404_v57 = vmul.f32 %v1392_v19, %v1383_v61  ;;  %v1402_v44 = vmul.f32 %v1390_v59, %v1383_v61 }
 0x5db   :  { %v1396_v31 = vmul.f32 %v1390_v59, %v1375_v52  ;;  %v1397_v62 = vmul.f32 %v1391_v39, %v1375_v52  ;;  %v1398_v23 = vmul.f32 %v1392_v19, %v1375_v52 }
 0x5dd   :  { %1424 = vrot.lane.b32.xlu1 %v1398_v23, %s5234_s16  ;;  %1422 = vrot.lane.b32.xlu0 %v1397_v62, %s5234_s16  ;;  %v1476_v23 = vld [vmem:[#allocation2 + $0x1] sm:$0x3] }
 0x5de   :  { %1420 = vrot.lane.b32.xlu2 %v1396_v31, %s5234_s16 }
 0x5e1   :  { %v6197_v55 = vpop.permute.xlu1 %1336 }
 0x5e9   :  { %v1379_v5 = vpop.permute.xlu1 %1378 }
 0x5ea   :  { %v1399_v63 = vmul.f32 %v1390_v59, %v1379_v5  ;;  %v1400_v29 = vmul.f32 %v1391_v39, %v1379_v5  ;;  %v1401_v28 = vmul.f32 %v1392_v19, %v1379_v5  ;;  %v1494_v5 = vperm.slane %v1476_v23, 0 }
 0x5ec   :  { %1430 = vrot.lane.b32.xlu1 %v1401_v28, %s5234_s16  ;;  %1428 = vrot.lane.b32.xlu0 %v1400_v29, %s5234_s16 }
 0x5ed   :  { %1426 = vrot.lane.b32.xlu2 %v1399_v63, %s5234_s16  ;;  %v1495_v63 = vperm.slane %v1476_v23, 1 }
 0x5f1   :  { %v1387_v43 = vpop.permute.xlu1 %1386 }
 0x5f2   :  { %v1406_v60 = vmul.f32 %v1391_v39, %v1387_v43  ;;  %v1407_v50 = vmul.f32 %v1392_v19, %v1387_v43  ;;  %v1405_v46 = vmul.f32 %v1390_v59, %v1387_v43 }
 0x5f4   :  { %1436 = vrot.lane.b32.xlu1 %v1404_v57, %s5234_s16  ;;  %1434 = vrot.lane.b32.xlu0 %v1403_v33, %s5234_s16 }
 0x5f5   :  { %1432 = vrot.lane.b32.xlu2 %v1402_v44, %s5234_s16 }
 0x5fc   :  { %1442 = vrot.lane.b32.xlu1 %v1407_v50, %s5234_s16  ;;  %1440 = vrot.lane.b32.xlu0 %v1406_v60, %s5234_s16 }
 0x5fd   :  { %1438 = vrot.lane.b32.xlu2 %v1405_v46, %s5234_s16 }
 0x604   :  { %1486 = vperm.xlu1 %4709, %v6066_v13   ;;  %1482 = vperm.xlu0 %4708, %v6044_v12  }
 0x605   :  { %1478 = vperm.xlu2 %4707, %v6049_v11  }
 0x60c   :  { %4711 = vset.pattern.permute.xlu1 %v8640_v22  ;;  %4710 = vset.pattern.permute.xlu0 %v8640_v22 }
 0x60d   :  { %1490 = vperm.xlu2 %4707, %v6057_v54  }
 0x615   :  { %4712 = vset.pattern.permute.xlu2 %v8640_v22 }
 0x638   :  { %v6217_v59 = vpop.permute.xlu2 %1420 }
 0x647   :  { %v6219_v39 = vpop.permute.xlu2 %1426 }
 0x64f   :  { %v6221_v19 = vpop.permute.xlu2 %1432  ;;  %v6223_v52 = vpop.permute.xlu0 %1422 }
 0x650   :  { %v6225_v31 = vpop.permute.xlu1 %1424 }
 0x657   :  { %v6227_v62 = vpop.permute.xlu2 %1438 }
 0x658   :  { %8641 = vst [vmem:[#allocation24_spill] sm:$0xff] %v6227_v62 }
 0x65e   :  { %v6229_v29 = vpop.permute.xlu0 %1428  ;;  %v6231_v28 = vpop.permute.xlu1 %1430 }
 0x65f   :  { %8642 = vst [vmem:[#allocation44_spill] sm:$0xff] %v6231_v28  ;;  %v1479_v61 = vpop.permute.xlu2 %1478 }
 0x660   :  { %v1498_v33 = vmul.f32 %v1494_v5, %v1479_v61  ;;  %v1499_v57 = vmul.f32 %v1495_v63, %v1479_v61 }
 0x662   :  { %1516 = vrot.lane.b32.xlu2 %v1499_v57, %s5227_s11  ;;  %1514 = vrot.lane.b32.xlu1 %v1498_v33, %s5227_s11 }
 0x666   :  { %v6235_v44 = vpop.permute.xlu0 %1434  ;;  %v6237_v43 = vpop.permute.xlu1 %1436 }
 0x667   :  { %v1491_v61 = vpop.permute.xlu2 %1490 }
 0x668   :  { %v1504_v57 = vmul.f32 %v1494_v5, %v1491_v61  ;;  %v1505_v37 = vmul.f32 %v1495_v63, %v1491_v61  ;;  %v8650_v61 = vld [vmem:[#allocation28_spill] sm:$0xff] }
 0x66e   :  { %v6239_v60 = vpop.permute.xlu0 %1440  ;;  %v6241_v50 = vpop.permute.xlu1 %1442 }
 0x66f   :  { %8643 = vst [vmem:[#allocation41_spill] sm:$0xff] %v6239_v60 }
 0x670   :  { %8644 = vst [vmem:[#allocation26_spill] sm:$0xff] %v6241_v50 }
 0x676   :  { %v1483_v46 = vpop.permute.xlu0 %1482  ;;  %v1487_v22 = vpop.permute.xlu1 %1486 }
 0x677   :  { %v1500_v23 = vmul.f32 %v1494_v5, %v1483_v46  ;;  %v1501_v47 = vmul.f32 %v1495_v63, %v1483_v46  ;;  %v1502_v21 = vmul.f32 %v1494_v5, %v1487_v22  ;;  %v1503_v33 = vmul.f32 %v1495_v63, %v1487_v22  ;;  %v6264_v46 = vld [vmem:[#allocation2 + $0x1] sm:$0x7] }
 0x679   :  { %1518 = vrot.lane.b32.xlu0 %v1500_v23, %s5227_s11  ;;  %1520 = vrot.lane.b32.xlu1 %v1501_v47, %s5227_s11  ;;  %v8645_v47 = vmov 6  }
 0x67a   :  { %1522 = vrot.lane.b32.xlu2 %v1502_v21, %s5227_s11 }
 0x681   :  { %1526 = vrot.lane.b32.xlu1 %v1504_v57, %s5227_s11  ;;  %1524 = vrot.lane.b32.xlu0 %v1503_v33, %s5227_s11  ;;  %v1559_v33 = vmul.f32 %v6264_v46, %v8650_v61 }
 0x682   :  { %1528 = vrot.lane.b32.xlu2 %v1505_v37, %s5227_s11 }
 0x683   :  { %v1578_v41 = vperm.slane %v1559_v33, 1  ;;  %v1579_v53 = vperm.slane %v1559_v33, 2 }
 0x689   :  { %1565 = vperm.xlu1 %4711, %v6044_v12   ;;  %1561 = vperm.xlu0 %4710, %v6049_v11  }
 0x68a   :  { %1569 = vperm.xlu2 %4712, %v6066_v13  }
 0x691   :  { %1573 = vperm.xlu1 %4711, %v6057_v54   ;;  %4714 = vset.pattern.permute.xlu0 %v8645_v47 }
 0x692   :  { %4713 = vset.pattern.permute.xlu2 %v8645_v47 }
 0x699   :  { %4715 = vset.pattern.permute.xlu1 %v8645_v47  ;;  %v1577_v47 = vperm.slane %v1559_v33, 0 }
 0x6bc   :  { %v6260_v63 = vpop.permute.xlu2 %1516 }
 0x6d4   :  { %v6256_v21 = vpop.permute.xlu1 %1514  ;;  %v6268_v23 = vpop.permute.xlu2 %1522 }
 0x6d5   :  { %8649 = vst [vmem:[#allocation34_spill] sm:$0xff] %v6268_v23 }
 0x6dc   :  { %v6276_v18 = vpop.permute.xlu2 %1528 }
 0x6dd   :  { %8652 = vst [vmem:[#allocation46_spill] sm:$0xff] %v6276_v18 }
 0x6e4   :  { %v1570_v33 = vpop.permute.xlu2 %1569 }
 0x6eb   :  { %v6258_v5 = vpop.permute.xlu0 %1518  ;;  %v6262_v37 = vpop.permute.xlu1 %1520 }
 0x6ec   :  { %8646 = vst [vmem:[#allocation43_spill] sm:$0xff] %v6258_v5 }
 0x6ed   :  { %8647 = vst [vmem:[#allocation36_spill] sm:$0xff] %v6262_v37 }
 0x6f3   :  { %v6266_v22 = vpop.permute.xlu0 %1524  ;;  %v6272_v57 = vpop.permute.xlu1 %1526 }
 0x6f4   :  { %8648 = vst [vmem:[#allocation32_spill] sm:$0xff] %v6266_v22 }
 0x6f5   :  { %8651 = vst [vmem:[#allocation53_spill] sm:$0xff] %v6272_v57  ;;  %v1591_v57 = vmul.f32 %v1579_v53, %v1570_v33 }
 0x6fb   :  { %v1562_v7 = vpop.permute.xlu0 %1561  ;;  %v1566_v26 = vpop.permute.xlu1 %1565 }
 0x6fc   :  { %v1583_v17 = vmul.f32 %v1577_v47, %v1562_v7  ;;  %v1584_v15 = vmul.f32 %v1578_v41, %v1562_v7  ;;  %v1585_v6 = vmul.f32 %v1579_v53, %v1562_v7  ;;  %v1587_v20 = vmul.f32 %v1578_v41, %v1566_v26 }
 0x6fd   :  { %v1588_v61 = vmul.f32 %v1579_v53, %v1566_v26  ;;  %v1586_v23 = vmul.f32 %v1577_v47, %v1566_v26  ;;  %v1590_v7 = vmul.f32 %v1578_v41, %v1570_v33 }
 0x6fe   :  { %1611 = vrot.lane.b32.xlu1 %v1585_v6, %s5238_s18  ;;  %1609 = vrot.lane.b32.xlu0 %v1584_v15, %s5238_s18  ;;  %v1589_v6 = vmul.f32 %v1577_v47, %v1570_v33 }
 0x6ff   :  { %1607 = vrot.lane.b32.xlu2 %v1583_v17, %s5238_s18 }
 0x703   :  { %v1574_v15 = vpop.permute.xlu1 %1573 }
 0x704   :  { %v1593_v17 = vmul.f32 %v1578_v41, %v1574_v15  ;;  %v1594_v18 = vmul.f32 %v1579_v53, %v1574_v15  ;;  %v1592_v26 = vmul.f32 %v1577_v47, %v1574_v15 }
 0x706   :  { %1617 = vrot.lane.b32.xlu1 %v1588_v61, %s5238_s18  ;;  %1615 = vrot.lane.b32.xlu0 %v1587_v20, %s5238_s18  ;;  %v8653_v20 = vmov 7   ;;  %v8657_v61 = vld [vmem:[#allocation40_spill] sm:$0xff] }
 0x707   :  { %1613 = vrot.lane.b32.xlu2 %v1586_v23, %s5238_s18  ;;  %v1663_v33 = vmul.f32 %v6264_v46, %v8657_v61 }
 0x709   :  { %v1683_v15 = vperm.slane %v1663_v33, 2 }
 0x70e   :  { %1623 = vrot.lane.b32.xlu1 %v1591_v57, %s5238_s18  ;;  %1621 = vrot.lane.b32.xlu0 %v1590_v7, %s5238_s18  ;;  %v1681_v7 = vperm.slane %v1663_v33, 0 }
 0x70f   :  { %1619 = vrot.lane.b32.xlu2 %v1589_v6, %s5238_s18  ;;  %v1682_v6 = vperm.slane %v1663_v33, 1 }
 0x716   :  { %1629 = vrot.lane.b32.xlu1 %v1594_v18, %s5238_s18  ;;  %1627 = vrot.lane.b32.xlu0 %v1593_v17, %s5238_s18 }
 0x717   :  { %1625 = vrot.lane.b32.xlu2 %v1592_v26, %s5238_s18 }
 0x71e   :  { %1673 = vperm.xlu1 %4715, %v6066_v13   ;;  %1669 = vperm.xlu0 %4714, %v6044_v12  }
 0x71f   :  { %1665 = vperm.xlu2 %4713, %v6049_v11  }
 0x726   :  { %4716 = vset.pattern.permute.xlu1 %v8653_v20  ;;  %4718 = vset.pattern.permute.xlu0 %v8653_v20 }
 0x727   :  { %1677 = vperm.xlu2 %4713, %v6057_v54  }
 0x72f   :  { %4717 = vset.pattern.permute.xlu2 %v8653_v20 }
 0x759   :  { %v6295_v53 = vpop.permute.xlu2 %1607 }
 0x761   :  { %v6297_v18 = vpop.permute.xlu2 %1613 }
 0x762   :  { %8654 = vst [vmem:[#allocation42_spill] sm:$0xff] %v6297_v18 }
 0x769   :  { %v6299_v41 = vpop.permute.xlu2 %1619 }
 0x76a   :  { %8655 = vst [vmem:[#allocation39_spill] sm:$0xff] %v6299_v41 }
 0x770   :  { %v6301_v23 = vpop.permute.xlu0 %1609  ;;  %v6303_v57 = vpop.permute.xlu1 %1611 }
 0x771   :  { %v6305_v47 = vpop.permute.xlu2 %1625 }
 0x772   :  { %8656 = vst [vmem:[#allocation35_spill] sm:$0xff] %v6305_v47 }
 0x778   :  { %v6309_v17 = vpop.permute.xlu0 %1615  ;;  %v6311_v26 = vpop.permute.xlu1 %1617 }
 0x779   :  { %8658 = vst [vmem:[#allocation47_spill] sm:$0xff] %v6309_v17  ;;  %v1666_v20 = vpop.permute.xlu2 %1665 }
 0x77a   :  { %8659 = vst [vmem:[#allocation37_spill] sm:$0xff] %v6311_v26  ;;  %v1687_v18 = vmul.f32 %v1681_v7, %v1666_v20  ;;  %v1688_v22 = vmul.f32 %v1682_v6, %v1666_v20  ;;  %v1689_v41 = vmul.f32 %v1683_v15, %v1666_v20 }
 0x77c   :  { %1715 = vrot.lane.b32.xlu0 %v1689_v41, %s5241_s20  ;;  %1713 = vrot.lane.b32.xlu2 %v1688_v22, %s5241_s20 }
 0x77d   :  { %1711 = vrot.lane.b32.xlu1 %v1687_v18, %s5241_s20 }
 0x780   :  { %v6316_v47 = vpop.permute.xlu0 %1621  ;;  %v6318_v61 = vpop.permute.xlu1 %1623 }
 0x781   :  { %8660 = vst [vmem:[#allocation55_spill] sm:$0xff] %v6316_v47 }
 0x782   :  { %8661 = vst [vmem:[#allocation51_spill] sm:$0xff] %v6318_v61 }
 0x788   :  { %v6320_v50 = vpop.permute.xlu0 %1627  ;;  %v6322_v33 = vpop.permute.xlu1 %1629 }
 0x789   :  { %8662 = vst [vmem:[#allocation48_spill] sm:$0xff] %v6320_v50 }
 0x78a   :  { %8663 = vst [vmem:[#allocation45_spill] sm:$0xff] %v6322_v33  ;;  %v1678_v33 = vpop.permute.xlu2 %1677 }
 0x78b   :  { %v1697_v50 = vmul.f32 %v1682_v6, %v1678_v33  ;;  %v1698_v61 = vmul.f32 %v1683_v15, %v1678_v33 }
 0x790   :  { %v1670_v17 = vpop.permute.xlu0 %1669  ;;  %v1674_v22 = vpop.permute.xlu1 %1673 }
 0x791   :  { %v1690_v26 = vmul.f32 %v1681_v7, %v1670_v17  ;;  %v1691_v62 = vmul.f32 %v1682_v6, %v1670_v17  ;;  %v1692_v60 = vmul.f32 %v1683_v15, %v1670_v17  ;;  %v1694_v18 = vmul.f32 %v1682_v6, %v1674_v22 }
 0x792   :  { %v1695_v41 = vmul.f32 %v1683_v15, %v1674_v22  ;;  %v1693_v20 = vmul.f32 %v1681_v7, %v1674_v22  ;;  %v1696_v17 = vmul.f32 %v1681_v7, %v1678_v33 }
 0x793   :  { %1721 = vrot.lane.b32.xlu0 %v1692_v60, %s5241_s20  ;;  %1719 = vrot.lane.b32.xlu2 %v1691_v62, %s5241_s20  ;;  %v8664_v62 = vmov 8  }
 0x794   :  { %1717 = vrot.lane.b32.xlu1 %v1690_v26, %s5241_s20 }
 0x79b   :  { %1727 = vrot.lane.b32.xlu0 %v1695_v41, %s5241_s20  ;;  %1725 = vrot.lane.b32.xlu2 %v1694_v18, %s5241_s20 }
 0x79c   :  { %1723 = vrot.lane.b32.xlu1 %v1693_v20, %s5241_s20 }
 0x7a3   :  { %1733 = vrot.lane.b32.xlu0 %v1698_v61, %s5241_s20  ;;  %1731 = vrot.lane.b32.xlu2 %v1697_v50, %s5241_s20  ;;  %v1784_v61 = vperm.slane %v6264_v46, 0 }
 0x7a4   :  { %1729 = vrot.lane.b32.xlu1 %v1696_v17, %s5241_s20 }
 0x7ab   :  { %1776 = vperm.xlu0 %4718, %v6066_v13   ;;  %1772 = vperm.xlu2 %4717, %v6044_v12  }
 0x7ac   :  { %1768 = vperm.xlu1 %4716, %v6049_v11  }
 0x7b3   :  { %4719 = vset.pattern.permute.xlu0 %v8664_v62  ;;  %4722 = vset.pattern.permute.xlu2 %v8664_v62 }
 0x7b4   :  { %1780 = vperm.xlu1 %4716, %v6057_v54  }
 0x7bc   :  { %4721 = vset.pattern.permute.xlu1 %v8664_v62 }
 0x7d6   :  { %v6340_v60 = vpop.permute.xlu2 %1713 }
 0x7ed   :  { %v6342_v7 = vpop.permute.xlu2 %1719 }
 0x7ee   :  { %8665 = vst [vmem:[#allocation49_spill] sm:$0xff] %v6342_v7  ;;  %v6346_v6 = vpop.permute.xlu0 %1715 }
 0x7ef   :  { %v6350_v26 = vpop.permute.xlu1 %1711 }
 0x7f5   :  { %v6344_v50 = vpop.permute.xlu2 %1725 }
 0x7f6   :  { %8666 = vst [vmem:[#allocation57_spill] sm:$0xff] %v6344_v50 }
 0x7fd   :  { %v6348_v15 = vpop.permute.xlu2 %1731 }
 0x7fe   :  { %8667 = vst [vmem:[#allocation52_spill] sm:$0xff] %v6348_v15  ;;  %v1785_v15 = vperm.slane %v6264_v46, 1 }
 0x805   :  { %v6353_v33 = vpop.permute.xlu0 %1721  ;;  %v1773_v22 = vpop.permute.xlu2 %1772 }
 0x806   :  { %8668 = vst [vmem:[#allocation58_spill] sm:$0xff] %v6353_v33  ;;  %v1793_v18 = vmul.f32 %v1784_v61, %v1773_v22  ;;  %v6355_v41 = vpop.permute.xlu1 %1717 }
 0x807   :  { %8669 = vst [vmem:[#allocation13_spill] sm:$0xff] %v6355_v41 }
 0x808   :  { %1820 = vrot.lane.b32.xlu0 %v1793_v18, %s5243_s21  ;;  %v1786_v18 = vperm.slane %v6264_v46, 2 }
 0x80d   :  { %v6358_v20 = vpop.permute.xlu0 %1727 }
 0x80e   :  { %8670 = vst [vmem:[#allocation15_spill] sm:$0xff] %v6358_v20  ;;  %v6360_v17 = vpop.permute.xlu1 %1723 }
 0x80f   :  { %8671 = vst [vmem:[#allocation28_spill] sm:$0xff] %v6360_v17  ;;  %v1794_v17 = vmul.f32 %v1785_v15, %v1773_v22 }
 0x815   :  { %v6362_v62 = vpop.permute.xlu0 %1733 }
 0x816   :  { %8672 = vst [vmem:[#allocation40_spill] sm:$0xff] %v6362_v62  ;;  %v6364_v50 = vpop.permute.xlu1 %1729 }
 0x817   :  { %8673 = vst [vmem:[#allocation60_spill] sm:$0xff] %v6364_v50  ;;  %v1795_v50 = vmul.f32 %v1786_v18, %v1773_v22 }
 0x81d   :  { %v1777_v47 = vpop.permute.xlu0 %1776 }
 0x81e   :  { %v1796_v7 = vmul.f32 %v1784_v61, %v1777_v47  ;;  %v1769_v5 = vpop.permute.xlu1 %1768  ;;  %v1797_v28 = vmul.f32 %v1785_v15, %v1777_v47 }
 0x81f   :  { %v1790_v33 = vmul.f32 %v1784_v61, %v1769_v5  ;;  %v1791_v37 = vmul.f32 %v1785_v15, %v1769_v5  ;;  %v1792_v62 = vmul.f32 %v1786_v18, %v1769_v5  ;;  %v8674_v5 = vmov 0  }
 0x820   :  { %1826 = vrot.lane.b32.xlu0 %v1796_v7, %s5243_s21 }
 0x821   :  { %1816 = vrot.lane.b32.xlu1 %v1791_v37, %s5243_s21  ;;  %1814 = vrot.lane.b32.xlu2 %v1790_v33, %s5243_s21  ;;  %v1798_v37 = vmul.f32 %v1786_v18, %v1777_v47 }
 0x826   :  { %v1781_v20 = vpop.permute.xlu1 %1780 }
 0x827   :  { %v1799_v41 = vmul.f32 %v1784_v61, %v1781_v20  ;;  %v1800_v7 = vmul.f32 %v1785_v15, %v1781_v20  ;;  %v1801_v61 = vmul.f32 %v1786_v18, %v1781_v20 }
 0x829   :  { %1822 = vrot.lane.b32.xlu1 %v1794_v17, %s5243_s21  ;;  %1818 = vrot.lane.b32.xlu2 %v1792_v62, %s5243_s21 }
 0x82a   :  { %1832 = vrot.lane.b32.xlu0 %v1799_v41, %s5243_s21 }
 0x831   :  { %1828 = vrot.lane.b32.xlu1 %v1797_v28, %s5243_s21  ;;  %1824 = vrot.lane.b32.xlu2 %v1795_v50, %s5243_s21 }
 0x832   :  { %1872 = vperm.xlu0 %4719, %v6049_v11  }
 0x839   :  { %1830 = vrot.lane.b32.xlu2 %v1798_v37, %s5243_s21  ;;  %1834 = vrot.lane.b32.xlu1 %v1800_v7, %s5243_s21 }
 0x83a   :  { %4720 = vset.pattern.permute.xlu0 %v8674_v5 }
 0x83b   :  { %1126 = vperm.xlu0 %4720, %v6066_v13  }
 0x841   :  { %1836 = vrot.lane.b32.xlu2 %v1801_v61, %s5243_s21  ;;  %1876 = vperm.xlu1 %4721, %v6044_v12  }
 0x849   :  { %1880 = vperm.xlu2 %4722, %v6066_v13   ;;  %1884 = vperm.xlu1 %4721, %v6057_v54   ;;  %v8679_v54 = vld [vmem:[#allocation56_spill] sm:$0xff] }
 0x84a   :  { %v1870_v22 = vmul.f32 %v6264_v46, %v8679_v54 }
 0x84c   :  { %v1888_v41 = vperm.slane %v1870_v22, 0  ;;  %v1889_v20 = vperm.slane %v1870_v22, 1  ;;  %v1890_v17 = vperm.slane %v1870_v22, 2 }
 0x851   :  { %4723 = vset.pattern.permute.xlu2 %v8674_v5  ;;  %4724 = vset.pattern.permute.xlu1 %v8674_v5 }
 0x87a   :  { %v6389_v28 = vpop.permute.xlu0 %1820 }
 0x87b   :  { %v6387_v11 = vpop.permute.xlu2 %1814  ;;  %8675 = vst [vmem:[#allocation61_spill] sm:$0xff] %v6389_v28 }
 0x883   :  { %v6391_v47 = vpop.permute.xlu2 %1818 }
 0x88b   :  { %v6397_v33 = vpop.permute.xlu2 %1824 }
 0x88c   :  { %8677 = vst [vmem:[#allocation63_spill] sm:$0xff] %v6397_v33 }
 0x892   :  { %v6393_v50 = vpop.permute.xlu0 %1826 }
 0x893   :  { %8676 = vst [vmem:[#allocation62_spill] sm:$0xff] %v6393_v50  ;;  %v6395_v15 = vpop.permute.xlu1 %1816  ;;  %v6407_v37 = vpop.permute.xlu2 %1830 }
 0x894   :  { %8681 = vst [vmem:[#allocation65_spill] sm:$0xff] %v6407_v37 }
 0x89b   :  { %v6399_v12 = vpop.permute.xlu1 %1822  ;;  %v6414_v46 = vpop.permute.xlu2 %1836 }
 0x89c   :  { %v6401_v13 = vpop.permute.xlu0 %1832  ;;  %8683 = vst [vmem:[#allocation67_spill] sm:$0xff] %v6414_v46 }
 0x89d   :  { %8678 = vst [vmem:[#allocation64_spill] sm:$0xff] %v6401_v13 }
 0x8a3   :  { %v6405_v62 = vpop.permute.xlu1 %1828 }
 0x8a4   :  { %8680 = vst [vmem:[#allocation56_spill] sm:$0xff] %v6405_v62  ;;  %v1873_v18 = vpop.permute.xlu0 %1872 }
 0x8a5   :  { %v1894_v7 = vmul.f32 %v1888_v41, %v1873_v18  ;;  %v1895_v5 = vmul.f32 %v1889_v20, %v1873_v18  ;;  %v1896_v61 = vmul.f32 %v1890_v17, %v1873_v18  ;;  %v1881_v18 = vpop.permute.xlu2 %1880 }
 0x8a6   :  { %v1901_v37 = vmul.f32 %v1889_v20, %v1881_v18 }
 0x8a7   :  { %1922 = vrot.lane.b32.xlu1 %v1896_v61, %s5245_s23  ;;  %1920 = vrot.lane.b32.xlu0 %v1895_v5, %s5245_s23  ;;  %v1900_v61 = vmul.f32 %v1888_v41, %v1881_v18  ;;  %v1902_v5 = vmul.f32 %v1890_v17, %v1881_v18 }
 0x8a8   :  { %1918 = vrot.lane.b32.xlu2 %v1894_v7, %s5245_s23 }
 0x8ab   :  { %v6412_v13 = vpop.permute.xlu1 %1834 }
 0x8ac   :  { %8682 = vst [vmem:[#allocation66_spill] sm:$0xff] %v6412_v13 }
 0x8b3   :  { %v1877_v54 = vpop.permute.xlu1 %1876 }
 0x8b4   :  { %v1897_v22 = vmul.f32 %v1888_v41, %v1877_v54  ;;  %v1898_v50 = vmul.f32 %v1889_v20, %v1877_v54  ;;  %v1899_v62 = vmul.f32 %v1890_v17, %v1877_v54 }
 0x8b6   :  { %1924 = vrot.lane.b32.xlu2 %v1897_v22, %s5245_s23  ;;  %1928 = vrot.lane.b32.xlu1 %v1899_v62, %s5245_s23  ;;  %v1976_v62 = vld [vmem:[%s8357_s2 + $0x10] sm:$0xff] }
 0x8b7   :  { %1926 = vrot.lane.b32.xlu0 %v1898_v50, %s5245_s23  ;;  %v1974_v50 = vld [vmem:[%s8357_s2] sm:$0xff] }
 0x8bb   :  { %v1885_v7 = vpop.permute.xlu1 %1884 }
 0x8bc   :  { %v1903_v46 = vmul.f32 %v1888_v41, %v1885_v7  ;;  %v1904_v13 = vmul.f32 %v1889_v20, %v1885_v7  ;;  %v1905_v54 = vmul.f32 %v1890_v17, %v1885_v7  ;;  %v1975_v41 = vld [vmem:[%s8357_s2 + $0x8] sm:$0xff]  ;;  %v1977_v20 = vld [vmem:[%s8357_s2 + $0x18] sm:$0xff]  ;;  %v1236_v7 = vsel %vm219_vm8, %v6135_v42, %v6127_v51  ;;  %s5246_s2 = smov 16  }
 0x8be   :  { %1930 = vrot.lane.b32.xlu2 %v1900_v61, %s5245_s23  ;;  %1934 = vrot.lane.b32.xlu1 %v1902_v5, %s5245_s23  ;;  %v1237_v5 = vsel %vm219_vm8, %v6127_v51, %v6133_v1 }
 0x8bf   :  { %1932 = vrot.lane.b32.xlu0 %v1901_v37, %s5245_s23  ;;  %v8685_v37 = vld [vmem:[#allocation59_spill] sm:$0xff] }
 0x8c6   :  { %1936 = vrot.lane.b32.xlu2 %v1903_v46, %s5245_s23  ;;  %1940 = vrot.lane.b32.xlu1 %v1905_v54, %s5245_s23  ;;  %v1109_v46 = vmul.f32 %v6091_v4, %v8685_v37 }
 0x8c7   :  { %1938 = vrot.lane.b32.xlu0 %v1904_v13, %s5245_s23 }
 0x8c8   :  { %v6441_v22 = vperm.slane %v1109_v46, 1  ;;  %v6443_v18 = vperm.slane %v1109_v46, 2  ;;  %v6445_v61 = vperm.slane %v1109_v46, 0  ;;  %v1127_v46 = vpop.permute.xlu0 %1126 }
 0x8ca   :  { %v1142_v54 = vmul.f32 %v6441_v22, %v6107_v16  ;;  %v1143_v4 = vmul.f32 %v6443_v18, %v6107_v16 }
 0x8cc   :  { %v1257_v51 = vadd.f32 %v1237_v5, %v1142_v54  ;;  %v1258_v42 = vadd.f32 %v6133_v1, %v1143_v4 }
 0x8ce   :  { %1980 = vperm.xlu2 %4723, %v1974_v50   ;;  %1990 = vperm.xlu1 %4724, %v1976_v62   ;;  %v1141_v50 = vmul.f32 %v6445_v61, %v6107_v16  ;;  %v1340_v62 = vsel %vm334_vm13, %v6172_v38, %v6180_v49  ;;  %v1445_v16 = vsel %vm444_vm14, %v6223_v52, %v6225_v31 }
 0x8cf   :  { %1985 = vperm.xlu0 %4720, %v1975_v41   ;;  %v1341_v41 = vsel %vm334_vm13, %v6180_v49, %v6176_v36  ;;  %v1362_v38 = vadd.f32 %v6176_v36, %v1258_v42  ;;  %v1530_v49 = vsel %vm89_vm12, %v6256_v21, %v6260_v63 }
 0x8d0   :  { %v1256_v37 = vadd.f32 %v1236_v7, %v1141_v50  ;;  %v1361_v28 = vadd.f32 %v1341_v41, %v1257_v51 }
 0x8d1   :  { %v1466_v7 = vadd.f32 %v6225_v31, %v1362_v38  ;;  %v1735_v31 = vsel %vm749_vm0, %v6350_v26, %v6340_v60  ;;  %v1147_v38 = vmul.f32 %v6445_v61, %v1127_v46 }
 0x8d2   :  { %v1360_v33 = vadd.f32 %v1340_v62, %v1256_v37  ;;  %v1465_v1 = vadd.f32 %v1445_v16, %v1361_v28 }
 0x8d3   :  { %v1548_v36 = vadd.f32 %v6260_v63, %v1466_v7  ;;  %v1839_v63 = vsel %vm853_vm1, %v6395_v15, %v6391_v47  ;;  %v1145_v47 = vmul.f32 %v6441_v22, %v6085_v30 }
 0x8d4   :  { %v1547_v4 = vadd.f32 %v1530_v49, %v1465_v1  ;;  %v1148_v49 = vmul.f32 %v6441_v22, %v1127_v46 }
 0x8d6   :  { %1995 = vperm.xlu2 %4723, %v1977_v20  }
 0x902   :  { %v1919_v13 = vpop.permute.xlu2 %1918 }
 0x910   :  { %v6437_v17 = vpop.permute.xlu2 %1924 }
 0x911   :  { %8684 = vst [vmem:[#allocation68_spill] sm:$0xff] %v6437_v17  ;;  %v1444_v17 = vsel %vm444_vm14, %v6217_v59, %v6223_v52  ;;  %v1631_v59 = vsel %vm638_vm15, %v6295_v53, %v6301_v23  ;;  %v1632_v52 = vsel %vm638_vm15, %v6301_v23, %v6303_v57 }
 0x912   :  { %v1464_v5 = vadd.f32 %v1444_v17, %v1360_v33  ;;  %v1736_v33 = vsel %vm749_vm0, %v6340_v60, %v6346_v6  ;;  %v1652_v50 = vadd.f32 %v1631_v59, %v1547_v4  ;;  %v1653_v62 = vadd.f32 %v1632_v52, %v1548_v36 }
 0x913   :  { %v1149_v59 = vmul.f32 %v6443_v18, %v1127_v46 }
 0x914   :  { %v1546_v54 = vadd.f32 %v6256_v21, %v1464_v5  ;;  %v1838_v21 = vsel %vm853_vm1, %v6387_v11, %v6395_v15  ;;  %v1757_v6 = vadd.f32 %v1736_v33, %v1653_v62  ;;  %v1756_v60 = vadd.f32 %v1735_v31, %v1652_v50 }
 0x915   :  { %v1144_v33 = vmul.f32 %v6445_v61, %v6085_v30 }
 0x916   :  { %v1651_v17 = vadd.f32 %v6295_v53, %v1546_v54  ;;  %v1859_v37 = vadd.f32 %v1838_v21, %v1756_v60  ;;  %v1860_v16 = vadd.f32 %v1839_v63, %v1757_v6  ;;  %v1152_v21 = vmul.f32 %v6443_v18, %v6112_v45 }
 0x917   :  { %v1242_v63 = vsel %vm219_vm8, %v6152_v32, %v6137_v0 }
 0x918   :  { %v6465_v20 = vpop.permute.xlu2 %1930  ;;  %v1755_v41 = vadd.f32 %v6350_v26, %v1651_v17  ;;  %v1240_v26 = vsel %vm219_vm8, %v6148_v2, %v6131_v9  ;;  %v1241_v2 = vsel %vm219_vm8, %v6131_v9, %v6146_v27  ;;  %v1243_v9 = vsel %vm219_vm8, %v6137_v0, %v6150_v58 }
 0x919   :  { %v1921_v23 = vpop.permute.xlu0 %1920  ;;  %v1923_v57 = vpop.permute.xlu1 %1922  ;;  %v1262_v31 = vadd.f32 %v1240_v26, %v1147_v38  ;;  %v1263_v17 = vadd.f32 %v1241_v2, %v1148_v49  ;;  %v8688_v26 = vld [vmem:[#allocation43_spill] sm:$0xff] }
 0x91a   :  { %v1942_v51 = vsel %vm964_vm2, %v1919_v13, %v1921_v23  ;;  %v1943_v53 = vsel %vm964_vm2, %v1921_v23, %v1923_v57  ;;  %v1858_v42 = vadd.f32 %v6387_v11, %v1755_v41  ;;  %v1151_v23 = vmul.f32 %v6441_v22, %v6112_v45 }
 0x91b   :  { %v1963_v1 = vadd.f32 %v1942_v51, %v1859_v37  ;;  %v1964_v7 = vadd.f32 %v1943_v53, %v1860_v16  ;;  %v1239_v57 = vsel %vm219_vm8, %v6129_v8, %v6141_v25  ;;  %v1264_v22 = vadd.f32 %v6146_v27, %v1149_v59 }
 0x91c   :  { %v1962_v5 = vadd.f32 %v1919_v13, %v1858_v42  ;;  %v1146_v13 = vmul.f32 %v6443_v18, %v6085_v30  ;;  %v1238_v30 = vsel %vm219_vm8, %v6143_v24, %v6129_v8  ;;  %v1150_v8 = vmul.f32 %v6445_v61, %v6112_v45 }
 0x91d   :  { %v1344_v24 = vsel %vm334_vm13, %v6178_v40, %v6190_v10  ;;  %v1345_v18 = vsel %vm334_vm13, %v6190_v10, %v6192_v3  ;;  %v1260_v0 = vadd.f32 %v1239_v57, %v1145_v47  ;;  %v1259_v27 = vadd.f32 %v1238_v30, %v1144_v33  ;;  %v8693_v33 = vld [vmem:[#allocation34_spill] sm:$0xff] }
 0x91e   :  { %v1261_v6 = vadd.f32 %v6141_v25, %v1146_v13  ;;  %v1366_v32 = vadd.f32 %v1344_v24, %v1262_v31  ;;  %v1367_v41 = vadd.f32 %v1345_v18, %v1263_v17  ;;  %v1266_v60 = vadd.f32 %v1243_v9, %v1151_v23  ;;  %v8692_v13 = vld [vmem:[#allocation32_spill] sm:$0xff]  ;;  %v8694_v31 = vld [vmem:[#allocation47_spill] sm:$0xff]  ;;  %v8695_v17 = vld [vmem:[#allocation42_spill] sm:$0xff] }
 0x91f   :  { %v1267_v25 = vadd.f32 %v6150_v58, %v1152_v21  ;;  %v1265_v51 = vadd.f32 %v1242_v63, %v1150_v8  ;;  %v1342_v45 = vsel %vm334_vm13, %v6174_v34, %v6184_v14  ;;  %v1343_v40 = vsel %vm334_vm13, %v6184_v14, %v6182_v35  ;;  %v8699_v24 = vld [vmem:[#allocation13_spill] sm:$0xff] }
 0x920   :  { %v6493_v28 = vpop.permute.xlu2 %1936  ;;  %v1346_v10 = vsel %vm334_vm13, %v6186_v48, %v6197_v55  ;;  %v1347_v61 = vsel %vm334_vm13, %v6197_v55, %v6199_v56  ;;  %v1368_v53 = vadd.f32 %v6192_v3, %v1264_v22  ;;  %v1365_v34 = vadd.f32 %v6182_v35, %v1261_v6  ;;  %v8686_v3 = vld [vmem:[#allocation44_spill] sm:$0xff]  ;;  %v8697_v22 = vld [vmem:[#allocation58_spill] sm:$0xff]  ;;  %v8698_v6 = vld [vmem:[#allocation49_spill] sm:$0xff] }
 0x921   :  { %v1446_v14 = vsel %vm444_vm14, %v6219_v39, %v6229_v29  ;;  %v1448_v48 = vsel %vm444_vm14, %v6221_v19, %v6235_v44  ;;  %v1449_v55 = vsel %vm444_vm14, %v6235_v44, %v6237_v43  ;;  %v1363_v37 = vadd.f32 %v1342_v45, %v1259_v27  ;;  %v8687_v19 = vld [vmem:[#allocation36_spill] sm:$0xff] }
 0x922   :  { %v1447_v16 = vsel %vm444_vm14, %v6229_v29, %v8686_v3  ;;  %v1470_v38 = vadd.f32 %v1448_v48, %v1366_v32  ;;  %v1471_v49 = vadd.f32 %v1449_v55, %v1367_v41  ;;  %v1371_v35 = vadd.f32 %v6199_v56, %v1267_v25  ;;  %v8700_v25 = vld [vmem:[#allocation55_spill] sm:$0xff] }
 0x923   :  { %v1370_v39 = vadd.f32 %v1347_v61, %v1266_v60  ;;  %v1469_v47 = vadd.f32 %v8686_v3, %v1365_v34  ;;  %v1472_v44 = vadd.f32 %v6237_v43, %v1368_v53  ;;  %v1532_v2 = vsel %vm89_vm12, %v8693_v33, %v8692_v13  ;;  %v8703_v61 = vld [vmem:[#allocation63_spill] sm:$0xff] }
 0x924   :  { %v1553_v23 = vadd.f32 %v1532_v2, %v1471_v49  ;;  %v1738_v8 = vsel %vm749_vm0, %v8698_v6, %v8697_v22  ;;  %v1737_v18 = vsel %vm749_vm0, %v8699_v24, %v8698_v6  ;;  %v1841_v53 = vsel %vm853_vm1, %v6399_v12, %v8703_v61  ;;  %v8704_v55 = vld [vmem:[#allocation51_spill] sm:$0xff]  ;;  %v8705_v49 = vld [vmem:[#allocation46_spill] sm:$0xff]  ;;  %v8718_v61 = vld [vmem:[#allocation60_spill] sm:$0xff] }
 0x925   :  { %v1551_v9 = vadd.f32 %v8687_v19, %v1469_v47 }
 0x928   :  { %v1981_v15 = vpop.permute.xlu2 %1980  ;;  %v6516_v4 = vpop.permute.xlu1 %1928 }
 0x929   :  { %v6514_v11 = vpop.permute.xlu0 %1926  ;;  %v1998_v52 = vadd.f32 %v1981_v15, %v1962_v5  ;;  %v1999_v36 = vadd.f32 %v1981_v15, %v1963_v1  ;;  %v2000_v54 = vadd.f32 %v1981_v15, %v1964_v7  ;;  %v1364_v5 = vadd.f32 %v1343_v40, %v1260_v0  ;;  %v8702_v40 = vld [vmem:[#allocation61_spill] sm:$0xff] }
 0x92a   :  { %v1369_v1 = vadd.f32 %v1346_v10, %v1265_v51  ;;  %v1467_v7 = vadd.f32 %v1446_v14, %v1363_v37  ;;  %v1531_v15 = vsel %vm89_vm12, %v8688_v26, %v8687_v19  ;;  %v1554_v0 = vadd.f32 %v8692_v13, %v1472_v44  ;;  %v8701_v51 = vld [vmem:[#allocation39_spill] sm:$0xff]  ;;  %v8708_v19 = vld [vmem:[#allocation57_spill] sm:$0xff] }
 0x92b   :  { %v2010_v46 = vmax.f32 %v1998_v52, 0.0  ;;  %v2011_v50 = vmax.f32 %v1999_v36, 0.0  ;;  %v2012_v62 = vmax.f32 %v2000_v54, 0.0  ;;  %v1468_v59 = vadd.f32 %v1447_v16, %v1364_v5  ;;  %v8689_v52 = vld [vmem:[#allocation41_spill] sm:$0xff]  ;;  %v8690_v36 = vld [vmem:[#allocation24_spill] sm:$0xff]  ;;  %v8691_v54 = vld [vmem:[#allocation26_spill] sm:$0xff] }
 0x92c   :  { %v1450_v29 = vsel %vm444_vm14, %v8690_v36, %v8689_v52  ;;  %v1451_v56 = vsel %vm444_vm14, %v8689_v52, %v8691_v54  ;;  %v1475_v57 = vadd.f32 %v8691_v54, %v1371_v35  ;;  %v1549_v30 = vadd.f32 %v8688_v26, %v1467_v7  ;;  %v8706_v35 = vld [vmem:[#allocation53_spill] sm:$0xff]  ;;  %v8709_v26 = vld [vmem:[#allocation28_spill] sm:$0xff] }
 0x92d   :  { %2036 = vrot.lane.b32.xlu2 %v2011_v50, %s5244_s22  ;;  %2034 = vrot.lane.b32.xlu1 %v2010_v46, %s5244_s22  ;;  %v1633_v46 = vsel %vm638_vm15, %v8695_v17, %v8694_v31  ;;  %v8696_v50 = vld [vmem:[#allocation37_spill] sm:$0xff]  ;;  %v1550_v21 = vadd.f32 %v1531_v15, %v1468_v59  ;;  %v1473_v63 = vadd.f32 %v1450_v29, %v1369_v1  ;;  %v8707_v1 = vld [vmem:[#allocation68_spill] sm:$0xff] }
 0x92e   :  { %2038 = vrot.lane.b32.xlu0 %v2012_v62, %s5244_s22  ;;  %v1634_v43 = vsel %vm638_vm15, %v8694_v31, %v8696_v50  ;;  %v1552_v62 = vadd.f32 %v8693_v33, %v1470_v38  ;;  %v1654_v32 = vadd.f32 %v8695_v17, %v1549_v30  ;;  %v1635_v45 = vsel %vm638_vm15, %v8701_v51, %v8700_v25  ;;  %v8710_v33 = vld [vmem:[#allocation15_spill] sm:$0xff]  ;;  %v8715_v30 = vld [vmem:[#allocation62_spill] sm:$0xff] }
 0x92f   :  { %v1655_v41 = vadd.f32 %v1633_v46, %v1550_v21  ;;  %v1656_v60 = vadd.f32 %v1634_v43, %v1551_v9  ;;  %v1840_v10 = vsel %vm853_vm1, %v8702_v40, %v6399_v12  ;;  %v1658_v14 = vadd.f32 %v1635_v45, %v1553_v23  ;;  %v8711_v46 = vld [vmem:[#allocation48_spill] sm:$0xff]  ;;  %v8712_v50 = vld [vmem:[#allocation35_spill] sm:$0xff] }
 0x930   :  { %v6570_v42 = vpop.permute.xlu1 %1934  ;;  %v1657_v34 = vadd.f32 %v8701_v51, %v1552_v62  ;;  %v1636_v37 = vsel %vm638_vm15, %v8700_v25, %v8704_v55  ;;  %v1758_v16 = vadd.f32 %v8699_v24, %v1654_v32  ;;  %v1533_v5 = vsel %vm89_vm12, %v8706_v35, %v8705_v49  ;;  %v8713_v62 = vld [vmem:[#allocation45_spill] sm:$0xff]  ;;  %v8719_v55 = vld [vmem:[#allocation40_spill] sm:$0xff] }
 0x931   :  { %v6568_v58 = vpop.permute.xlu0 %1932  ;;  %v1760_v3 = vadd.f32 %v1738_v8, %v1656_v60  ;;  %v1759_v38 = vadd.f32 %v1737_v18, %v1655_v41  ;;  %v1944_v12 = vsel %vm964_vm2, %v8707_v1, %v6514_v11  ;;  %v1945_v7 = vsel %vm964_vm2, %v6514_v11, %v6516_v4  ;;  %v8716_v8 = vld [vmem:[#allocation65_spill] sm:$0xff] }
 0x932   :  { %v1659_v47 = vadd.f32 %v1636_v37, %v1554_v0  ;;  %v1739_v15 = vsel %vm749_vm0, %v8709_v26, %v8708_v19  ;;  %v1861_v44 = vadd.f32 %v8702_v40, %v1758_v16  ;;  %v1474_v36 = vadd.f32 %v1451_v56, %v1370_v39 }
 0x933   :  { %v1862_v59 = vadd.f32 %v1840_v10, %v1759_v38  ;;  %v1863_v52 = vadd.f32 %v1841_v53, %v1760_v3  ;;  %v1557_v29 = vadd.f32 %v8705_v49, %v1475_v57  ;;  %v1761_v54 = vadd.f32 %v8709_v26, %v1657_v34  ;;  %v8714_v57 = vld [vmem:[#allocation56_spill] sm:$0xff] }
 0x934   :  { %v1762_v13 = vadd.f32 %v1739_v15, %v1658_v14  ;;  %v1740_v2 = vsel %vm749_vm0, %v8708_v19, %v8710_v33  ;;  %v1965_v11 = vadd.f32 %v8707_v1, %v1861_v44  ;;  %v1556_v17 = vadd.f32 %v1533_v5, %v1474_v36  ;;  %v8717_v10 = vld [vmem:[#allocation52_spill] sm:$0xff]  ;;  %v8722_v1 = vld [vmem:[#allocation67_spill] sm:$0xff]  ;;  %v1996_v33 = vpop.permute.xlu2 %1995 }
 0x935   :  { %v1966_v4 = vadd.f32 %v1944_v12, %v1862_v59  ;;  %v1967_v31 = vadd.f32 %v1945_v7, %v1863_v52  ;;  %v1637_v43 = vsel %vm638_vm15, %v8712_v50, %v8711_v46  ;;  %v1638_v39 = vsel %vm638_vm15, %v8711_v46, %v8713_v62  ;;  %v8721_v38 = vld [vmem:[#allocation64_spill] sm:$0xff] }
 0x936   :  { %v1763_v56 = vadd.f32 %v1740_v2, %v1659_v47  ;;  %v1842_v21 = vsel %vm853_vm1, %v8715_v30, %v8714_v57  ;;  %v1843_v24 = vsel %vm853_vm1, %v8714_v57, %v8716_v8  ;;  %v1864_v18 = vadd.f32 %v8715_v30, %v1761_v54 }
 0x937   :  { %v1865_v0 = vadd.f32 %v1842_v21, %v1762_v13  ;;  %v1946_v32 = vsel %vm964_vm2, %v6465_v20, %v6568_v58  ;;  %v1947_v41 = vsel %vm964_vm2, %v6568_v58, %v6570_v42  ;;  %v1555_v45 = vadd.f32 %v8706_v35, %v1473_v63  ;;  %v8720_v63 = vld [vmem:[#allocation66_spill] sm:$0xff] }
 0x938   :  { %v6630_v48 = vpop.permute.xlu1 %1940  ;;  %v1661_v40 = vadd.f32 %v1637_v43, %v1556_v17  ;;  %v1741_v53 = vsel %vm749_vm0, %v8718_v61, %v8717_v10  ;;  %v1866_v34 = vadd.f32 %v1843_v24, %v1763_v56  ;;  %v1742_v37 = vsel %vm749_vm0, %v8717_v10, %v8719_v55  ;;  %v8723_v43 = vld [vmem:[#allocation23_spill] sm:$0xff] }
 0x939   :  { %v6617_v27 = vpop.permute.xlu0 %1938  ;;  %v1968_v3 = vadd.f32 %v6465_v20, %v1864_v18  ;;  %v1969_v16 = vadd.f32 %v1946_v32, %v1865_v0  ;;  %v1660_v58 = vadd.f32 %v8712_v50, %v1555_v45  ;;  %v1662_v42 = vadd.f32 %v1638_v39, %v1557_v29  ;;  %v8725_v39 = vld [vmem:[#allocation16_spill] sm:$0xff]  ;;  %v8726_v18 = vld [vmem:[#allocation22_spill] sm:$0xff] }
 0x93a   :  { %v1844_v49 = vsel %vm853_vm1, %v8721_v38, %v8720_v63  ;;  %v1970_v35 = vadd.f32 %v1947_v41, %v1866_v34  ;;  %v1765_v5 = vadd.f32 %v1741_v53, %v1661_v40  ;;  %v1845_v20 = vsel %vm853_vm1, %v8720_v63, %v8722_v1  ;;  %v8727_v0 = vld [vmem:[#allocation18_spill] sm:$0xff]  ;;  %v8728_v41 = vld [vmem:[#allocation21_spill] sm:$0xff]  ;;  %v8732_v1 = vld [vmem:[#allocation31_spill] sm:$0xff] }
 0x93b   :  { %v1766_v47 = vadd.f32 %v1742_v37, %v1662_v42  ;;  %v1948_v19 = vsel %vm964_vm2, %v6493_v28, %v6617_v27  ;;  %v1764_v15 = vadd.f32 %v8718_v61, %v1660_v58  ;;  %v1949_v59 = vsel %vm964_vm2, %v6617_v27, %v6630_v48  ;;  %v8729_v34 = vld [vmem:[#allocation30_spill] sm:$0xff]  ;;  %v8731_v37 = vld [vmem:[#allocation33_spill] sm:$0xff] }
 0x93c   :  { %v1868_v44 = vadd.f32 %v1844_v49, %v1765_v5  ;;  %v1084_v32 = vsel %vm889_vm11, %v8727_v0, %v8726_v18 }
 0x93d   :  { %v1869_v52 = vadd.f32 %v1845_v20, %v1766_v47  ;;  %v1867_v36 = vadd.f32 %v8721_v38, %v1764_v15  ;;  %v8733_v20 = vld [vmem:[#allocation20_spill] sm:$0xff] }
 0x93e   :  { %v1972_v29 = vadd.f32 %v1948_v19, %v1868_v44 }
 0x93f   :  { %v1973_v2 = vadd.f32 %v1949_v59, %v1869_v52 }
 0x940   :  { %v1991_v14 = vpop.permute.xlu1 %1990  ;;  %v2008_v17 = vadd.f32 %v1996_v33, %v1972_v29 }
 0x941   :  { %v1986_v23 = vpop.permute.xlu0 %1985  ;;  %v2004_v12 = vadd.f32 %v1991_v14, %v1968_v3  ;;  %v2005_v7 = vadd.f32 %v1991_v14, %v1969_v16  ;;  %v2006_v26 = vadd.f32 %v1991_v14, %v1970_v35  ;;  %v2009_v27 = vadd.f32 %v1996_v33, %v1973_v2  ;;  %v8730_v14 = vld [vmem:[#allocation19_spill] sm:$0xff] }
 0x942   :  { %v2001_v9 = vadd.f32 %v1986_v23, %v1965_v11  ;;  %v2002_v22 = vadd.f32 %v1986_v23, %v1966_v4  ;;  %v2003_v6 = vadd.f32 %v1986_v23, %v1967_v31  ;;  %v1971_v4 = vadd.f32 %v6493_v28, %v1867_v36  ;;  %v8724_v28 = vld [vmem:[#allocation17_spill] sm:$0xff] }
 0x943   :  { %v2016_v54 = vmax.f32 %v2004_v12, 0.0  ;;  %v2017_v13 = vmax.f32 %v2005_v7, 0.0  ;;  %v2018_v11 = vmax.f32 %v2006_v26, 0.0  ;;  %v2020_v46 = vmax.f32 %v2008_v17, 0.0  ;;  %v8734_v7 = vld [vmem:[#allocation25_spill] sm:$0xff] }
 0x944   :  { %v2013_v60 = vmax.f32 %v2001_v9, 0.0  ;;  %v2014_v25 = vmax.f32 %v2002_v22, 0.0  ;;  %v2015_v51 = vmax.f32 %v2003_v6, 0.0  ;;  %v2007_v31 = vadd.f32 %v1996_v33, %v1971_v4 }
 0x945   :  { %v2021_v50 = vmax.f32 %v2009_v27, 0.0  ;;  %v1082_v62 = vsel %vm889_vm11, %v8724_v28, %v8723_v43  ;;  %v1081_v56 = vsel %vm889_vm11, %v8725_v39, %v8724_v28  ;;  %v1086_v55 = vsel %vm889_vm11, %v8730_v14, %v8729_v34 }
 0x946   :  { %2042 = vrot.lane.b32.xlu2 %v2014_v25, %s5244_s22  ;;  %2040 = vrot.lane.b32.xlu1 %v2013_v60, %s5244_s22  ;;  %v2019_v48 = vmax.f32 %v2007_v31, 0.0  ;;  %v2098_v23 = vadd.f32 %v1082_v62, %v1081_v56  ;;  %v1083_v60 = vsel %vm889_vm11, %v8728_v41, %v8727_v0  ;;  %v1085_v3 = vsel %vm889_vm11, %v8731_v37, %v8730_v14 }
 0x947   :  { %2044 = vrot.lane.b32.xlu0 %v2015_v51, %s5244_s22  ;;  %v2103_v25 = vadd.f32 %v1084_v32, %v1083_v60  ;;  %v2108_v58 = vadd.f32 %v1086_v55, %v1085_v3  ;;  %v1088_v12 = vsel %vm889_vm11, %v8733_v20, %v8732_v1  ;;  %v1087_v47 = vsel %vm889_vm11, %v8734_v7, %v8733_v20  ;;  %v8735_v20 = vld [vmem:[#allocation8_spill] sm:$0xff] }
 0x948   :  { %v2113_v19 = vadd.f32 %v1088_v12, %v1087_v47 }
 0x94e   :  { %2048 = vrot.lane.b32.xlu2 %v2017_v13, %s5244_s22  ;;  %2046 = vrot.lane.b32.xlu1 %v2016_v54, %s5244_s22 }
 0x94f   :  { %2050 = vrot.lane.b32.xlu0 %v2018_v11, %s5244_s22 }
 0x956   :  { %2054 = vrot.lane.b32.xlu2 %v2020_v46, %s5244_s22  ;;  %2052 = vrot.lane.b32.xlu1 %v2019_v48, %s5244_s22 }
 0x957   :  { %2056 = vrot.lane.b32.xlu0 %v2021_v50, %s5244_s22 }
 0x987   :  { %v2037_v57 = vpop.permute.xlu2 %2036 }
 0x99f   :  { %v2035_v30 = vpop.permute.xlu1 %2034 }
 0x9a0   :  { %v2039_v21 = vpop.permute.xlu0 %2038  ;;  %v2058_v9 = vsel %vm889_vm11, %v2035_v30, %v2037_v57  ;;  %v2043_v24 = vpop.permute.xlu2 %2042 }
 0x9a1   :  { %v2099_v22 = vadd.f32 %v2098_v23, %v2058_v9  ;;  %v2059_v6 = vsel %vm889_vm11, %v2037_v57, %v2039_v21 }
 0x9a3   :  { %v2100_v8 = vadd.f32 %v2099_v22, %v2059_v6 }
 0x9a5   :  { %2101 = vadd.xlane.f32.xlu1 %v2100_v8 }
 0x9a8   :  { %v2049_v16 = vpop.permute.xlu2 %2048 }
 0x9b0   :  { %v2055_v26 = vpop.permute.xlu2 %2054 }
 0x9b8   :  { %v2041_v51 = vpop.permute.xlu1 %2040 }
 0x9b9   :  { %v2045_v45 = vpop.permute.xlu0 %2044  ;;  %v2060_v40 = vsel %vm889_vm11, %v2041_v51, %v2043_v24 }
 0x9ba   :  { %v2104_v10 = vadd.f32 %v2103_v25, %v2060_v40  ;;  %v2061_v61 = vsel %vm889_vm11, %v2043_v24, %v2045_v45 }
 0x9bc   :  { %v2105_v53 = vadd.f32 %v2104_v10, %v2061_v61 }
 0x9be   :  { %2106 = vadd.xlane.f32.xlu2 %v2105_v53 }
 0x9c0   :  { %v2047_v42 = vpop.permute.xlu1 %2046 }
 0x9c1   :  { %v2051_v63 = vpop.permute.xlu0 %2050  ;;  %v2062_v38 = vsel %vm889_vm11, %v2047_v42, %v2049_v16 }
 0x9c2   :  { %v2109_v49 = vadd.f32 %v2108_v58, %v2062_v38  ;;  %v2063_v35 = vsel %vm889_vm11, %v2049_v16, %v2051_v63 }
 0x9c4   :  { %v2110_v5 = vadd.f32 %v2109_v49, %v2063_v35 }
 0x9c6   :  { %2111 = vadd.xlane.f32.xlu0 %v2110_v5 }
 0x9c8   :  { %v2053_v15 = vpop.permute.xlu1 %2052 }
 0x9c9   :  { %v2057_v44 = vpop.permute.xlu0 %2056  ;;  %v2064_v59 = vsel %vm889_vm11, %v2053_v15, %v2055_v26 }
 0x9ca   :  { %v2114_v52 = vadd.f32 %v2113_v19, %v2064_v59  ;;  %v2065_v36 = vsel %vm889_vm11, %v2055_v26, %v2057_v44 }
 0x9cc   :  { %v2115_v29 = vadd.f32 %v2114_v52, %v2065_v36 }
 0x9ce   :  { %2116 = vadd.xlane.f32.xlu2 %v2115_v29 }
 0xa18   :  { %v2102_v54 = vpop.xlane.xlu1 %2101 }
 0xa19   :  { %v2118_v13 = vmul.f32 0.001953125, %v2102_v54 }
 0xa1b   :  { %v6739_v33 = vsub.f32 %v1081_v56, %v2118_v13  ;;  %v6741_v2 = vsub.f32 %v1082_v62, %v2118_v13  ;;  %v6743_v11 = vsub.f32 %v2058_v9, %v2118_v13  ;;  %v6745_v4 = vsub.f32 %v2059_v6, %v2118_v13 }
 0xa1d   :  { %v2138_v31 = vmul.f32 %v6739_v33, %v6739_v33  ;;  %v2139_v17 = vmul.f32 %v6741_v2, %v6741_v2  ;;  %v2140_v27 = vmul.f32 %v6743_v11, %v6743_v11  ;;  %v2141_v46 = vmul.f32 %v6745_v4, %v6745_v4 }
 0xa1f   :  { %v2154_v48 = vadd.f32 %v2139_v17, %v2138_v31 }
 0xa21   :  { %v2155_v50 = vadd.f32 %v2154_v48, %v2140_v27 }
 0xa23   :  { %v2156_v43 = vadd.f32 %v2155_v50, %v2141_v46  ;;  %v8739_v50 = vld [vmem:[#allocation12_spill] sm:$0xff] }
 0xa25   :  { %2157 = vadd.xlane.f32.xlu1 %v2156_v43  ;;  %v8740_v43 = vunpack.i.h.bf16 %v8739_v50  ;;  %v8748_v50 = vld [vmem:[#allocation10_spill] sm:$0xff] }
 0xa31   :  { %v2107_v28 = vpop.xlane.xlu2 %2106 }
 0xa32   :  { %v2119_v62 = vmul.f32 0.001953125, %v2107_v28 }
 0xa34   :  { %v6755_v39 = vsub.f32 %v1083_v60, %v2119_v62  ;;  %v6757_v56 = vsub.f32 %v1084_v32, %v2119_v62  ;;  %v6759_v23 = vsub.f32 %v2060_v40, %v2119_v62  ;;  %v6761_v57 = vsub.f32 %v2061_v61, %v2119_v62 }
 0xa36   :  { %v2142_v30 = vmul.f32 %v6755_v39, %v6755_v39  ;;  %v2143_v21 = vmul.f32 %v6757_v56, %v6757_v56  ;;  %v2144_v9 = vmul.f32 %v6759_v23, %v6759_v23  ;;  %v2145_v24 = vmul.f32 %v6761_v57, %v6761_v57 }
 0xa38   :  { %v2159_v22 = vadd.f32 %v2143_v21, %v2142_v30 }
 0xa39   :  { %v2112_v6 = vpop.xlane.xlu0 %2111 }
 0xa3a   :  { %v2120_v8 = vmul.f32 0.001953125, %v2112_v6  ;;  %v2160_v18 = vadd.f32 %v2159_v22, %v2144_v9 }
 0xa3c   :  { %v6771_v0 = vsub.f32 %v1085_v3, %v2120_v8  ;;  %v6773_v32 = vsub.f32 %v1086_v55, %v2120_v8  ;;  %v6775_v41 = vsub.f32 %v2062_v38, %v2120_v8  ;;  %v2161_v60 = vadd.f32 %v2160_v18, %v2145_v24 }
 0xa3d   :  { %v6777_v25 = vsub.f32 %v2063_v35, %v2120_v8 }
 0xa3e   :  { %2162 = vadd.xlane.f32.xlu2 %v2161_v60  ;;  %v2146_v51 = vmul.f32 %v6771_v0, %v6771_v0  ;;  %v2147_v45 = vmul.f32 %v6773_v32, %v6773_v32  ;;  %v2148_v40 = vmul.f32 %v6775_v41, %v6775_v41 }
 0xa3f   :  { %v2149_v34 = vmul.f32 %v6777_v25, %v6777_v25 }
 0xa40   :  { %v2164_v10 = vadd.f32 %v2147_v45, %v2146_v51 }
 0xa41   :  { %v2117_v61 = vpop.xlane.xlu2 %2116 }
 0xa42   :  { %v2121_v53 = vmul.f32 0.001953125, %v2117_v61  ;;  %v2165_v14 = vadd.f32 %v2164_v10, %v2148_v40 }
 0xa44   :  { %v6787_v55 = vsub.f32 %v1087_v47, %v2121_v53  ;;  %v6789_v37 = vsub.f32 %v1088_v12, %v2121_v53  ;;  %v6791_v3 = vsub.f32 %v2064_v59, %v2121_v53  ;;  %v2166_v16 = vadd.f32 %v2165_v14, %v2149_v34 }
 0xa45   :  { %v6793_v58 = vsub.f32 %v2065_v36, %v2121_v53 }
 0xa46   :  { %2167 = vadd.xlane.f32.xlu0 %v2166_v16  ;;  %v2150_v42 = vmul.f32 %v6787_v55, %v6787_v55  ;;  %v2151_v63 = vmul.f32 %v6789_v37, %v6789_v37  ;;  %v2152_v38 = vmul.f32 %v6791_v3, %v6791_v3 }
 0xa47   :  { %v2153_v35 = vmul.f32 %v6793_v58, %v6793_v58 }
 0xa48   :  { %v2169_v49 = vadd.f32 %v2151_v63, %v2150_v42 }
 0xa4a   :  { %v2170_v5 = vadd.f32 %v2169_v49, %v2152_v38  ;;  %v8743_v49 = vld [vmem:[#allocation50_spill] sm:$0xff] }
 0xa4c   :  { %v2171_v1 = vadd.f32 %v2170_v5, %v2153_v35 }
 0xa4e   :  { %2172 = vadd.xlane.f32.xlu1 %v2171_v1 }
 0xa56   :  { %2268 = vrot.lane.b32.xlu2 %v8735_v20, %s5227_s11 }
 0xa98   :  { %v2158_v12 = vpop.xlane.xlu1 %2157 }
 0xa99   :  { %v2174_v7 = vmul.f32 0.001953125, %v2158_v12 }
 0xa9b   :  { %v2178_v47 = vadd.f32 1e-05, %v2174_v7 }
 0xa9d   :  { %5205 = vrsqrt.f32 %v2178_v47  ;;  %vm2188_vm4 = vweird.f32 %v2178_v47 }
 0xaa3   :  { %v5206_v19 = vpop.eup %5205 }
 0xaa4   :  { %v2183_v26 = vmul.f32 %v5206_v19, %v2178_v47  ;;  %vm2189_vm3 = vweird.f32 %v5206_v19 }
 0xaa5   :  { %vm2190_vm5 = vmor %vm2188_vm4, %vm2189_vm3 }
 0xaa6   :  { %v2184_v15 = vmul.f32 %v5206_v19, %v2183_v26 }
 0xaa8   :  { %v2185_v44 = vmul.f32 0.5, %v2184_v15 }
 0xaaa   :  { %v2186_v59 = vsub.f32 1.5, %v2185_v44 }
 0xaac   :  { %v2187_v52 = vmul.f32 %v5206_v19, %v2186_v59 }
 0xaae   :  { %v6805_v13 = vsel %vm2190_vm5, %v5206_v19, %v2187_v52 }
 0xaaf   :  { %v6809_v31 = vmul.f32 %v6805_v13, %v6741_v2  ;;  %v6813_v17 = vmul.f32 %v6805_v13, %v6739_v33 }
 0xab1   :  { %v2163_v36 = vpop.xlane.xlu2 %2162  ;;  %8736 = vst [vmem:[#allocation59_spill] sm:$0xff] %v6809_v31 }
 0xab2   :  { %v2175_v29 = vmul.f32 0.001953125, %v2163_v36  ;;  %8737 = vst [vmem:[#allocation44_spill] sm:$0xff] %v6813_v17 }
 0xab4   :  { %v2179_v54 = vadd.f32 1e-05, %v2175_v29 }
 0xab6   :  { %5207 = vrsqrt.f32 %v2179_v54  ;;  %vm2198_vm13 = vweird.f32 %v2179_v54 }
 0xab9   :  { %v2168_v27 = vpop.xlane.xlu0 %2167  ;;  %v6815_v48 = vpop.permute.xlu2 %2268 }
 0xaba   :  { %8738 = vst [vmem:[#allocation36_spill] sm:$0xff] %v6815_v48  ;;  %v2176_v46 = vmul.f32 0.001953125, %v2168_v27  ;;  %v6821_v28 = vsel %vm89_vm12, %v8740_v43, %v6815_v48  ;;  %v2276_v62 = vmul.f32 %v6815_v48, %v6809_v31  ;;  %v8747_v27 = vmov 0.0  }
 0xabb   :  { %8741 = vst [vmem:[#allocation43_spill] sm:$0xff] %v6821_v28  ;;  %v2275_v2 = vmul.f32 %v6821_v28, %v6813_v17 }
 0xabc   :  { %v5208_v30 = vpop.eup %5207  ;;  %v2180_v21 = vadd.f32 1e-05, %v2176_v46  ;;  %v4755_v46 = vpack.i.bf16 %v6813_v17, %v8747_v27 }
 0xabd   :  { %v2193_v33 = vmul.f32 %v5208_v30, %v2179_v54  ;;  %v4725_v9 = vpack.i.bf16 %v2276_v62, %v2275_v2  ;;  %vm2199_vm6 = vweird.f32 %v5208_v30  ;;  %v4760_v2 = vpack.i.bf16 0.0, %v6809_v31 }
 0xabe   :  { %5209 = vrsqrt.f32 %v2180_v21  ;;  %vm2200_vm15 = vmor %vm2198_vm13, %vm2199_vm6  ;;  %vm2208_vm1 = vweird.f32 %v2180_v21  ;;  %vm2394_vm6 = vcmask 130048   ;;  %vm3075_vm13 = vcmask 261120  }
 0xabf   :  { %v2194_v22 = vmul.f32 %v5208_v30, %v2193_v33  ;;  %4726 = vrot.lane.b32.xlu0 %v4725_v9, %s5244_s22  ;;  %v8749_v33 = vld [vmem:[#allocation9_spill] sm:$0xff] }
 0xac1   :  { %v2195_v6 = vmul.f32 0.5, %v2194_v22  ;;  %v2173_v8 = vpop.xlane.xlu1 %2172 }
 0xac2   :  { %v2177_v24 = vmul.f32 0.001953125, %v2173_v8 }
 0xac3   :  { %v2196_v18 = vsub.f32 1.5, %v2195_v6 }
 0xac4   :  { %v5210_v60 = vpop.eup %5209  ;;  %v2181_v51 = vadd.f32 1e-05, %v2177_v24 }
 0xac5   :  { %v2197_v45 = vmul.f32 %v5208_v30, %v2196_v18  ;;  %v2203_v40 = vmul.f32 %v5210_v60, %v2180_v21  ;;  %vm2209_vm0 = vweird.f32 %v5210_v60 }
 0xac6   :  { %5211 = vrsqrt.f32 %v2181_v51  ;;  %vm2210_vm2 = vmor %vm2208_vm1, %vm2209_vm0  ;;  %vm2218_vm4 = vweird.f32 %v2181_v51 }
 0xac7   :  { %v6828_v10 = vsel %vm2200_vm15, %v5208_v30, %v2197_v45  ;;  %v2204_v61 = vmul.f32 %v5210_v60, %v2203_v40 }
 0xac8   :  { %v6832_v53 = vmul.f32 %v6828_v10, %v6755_v39  ;;  %v6836_v34 = vmul.f32 %v6828_v10, %v6757_v56 }
 0xac9   :  { %v2205_v14 = vmul.f32 0.5, %v2204_v61 }
 0xaca   :  { %8742 = vst [vmem:[#allocation41_spill] sm:$0xff] %v6836_v34  ;;  %v2278_v16 = vmul.f32 %v6821_v28, %v6832_v53  ;;  %v2279_v42 = vmul.f32 %v6815_v48, %v6836_v34 }
 0xacb   :  { %v2206_v63 = vsub.f32 1.5, %v2205_v14 }
 0xacc   :  { %v5212_v38 = vpop.eup %5211  ;;  %v4730_v35 = vpack.i.bf16 %v2278_v16, %v8743_v49  ;;  %v4735_v5 = vpack.i.bf16 %v8743_v49, %v2279_v42  ;;  %v8751_v42 = vld [vmem:[#allocation11_spill] sm:$0xff] }
 0xacd   :  { %v2207_v39 = vmul.f32 %v5210_v60, %v2206_v63  ;;  %v2213_v1 = vmul.f32 %v5212_v38, %v2181_v51  ;;  %vm2219_vm3 = vweird.f32 %v5212_v38  ;;  %v8752_v63 = vunpack.i.h.bf16 %v8751_v42 }
 0xace   :  { %4731 = vrot.lane.b32.xlu1 %v4730_v35, %s5244_s22  ;;  %4736 = vrot.lane.b32.xlu0 %v4735_v5, %s5244_s22  ;;  %vm2220_vm5 = vmor %vm2218_vm4, %vm2219_vm3  ;;  %vm4501_vm4 = vcmask 1041408  }
 0xacf   :  { %v6846_v56 = vsel %vm2210_vm2, %v5210_v60, %v2207_v39  ;;  %v2214_v12 = vmul.f32 %v5212_v38, %v2213_v1 }
 0xad0   :  { %v6850_v7 = vmul.f32 %v6846_v56, %v6771_v0  ;;  %v6854_v47 = vmul.f32 %v6846_v56, %v6773_v32 }
 0xad1   :  { %v2215_v19 = vmul.f32 0.5, %v2214_v12  ;;  %v8754_v12 = vld [vmem:[#allocation29_spill] sm:$0xff] }
 0xad2   :  { %8744 = vst [vmem:[#allocation24_spill] sm:$0xff] %v6854_v47  ;;  %v2281_v26 = vmul.f32 %v6821_v28, %v6850_v7  ;;  %v2282_v15 = vmul.f32 %v6815_v48, %v6854_v47  ;;  %v4775_v21 = vpack.i.bf16 0.0, %v6854_v47 }
 0xad3   :  { %v2216_v44 = vsub.f32 1.5, %v2215_v19 }
 0xad4   :  { %v4740_v59 = vpack.i.bf16 %v2282_v15, %v2281_v26 }
 0xad5   :  { %v2217_v52 = vmul.f32 %v5212_v38, %v2216_v44  ;;  %v8755_v44 = vld [vmem:[#allocation27_spill] sm:$0xff] }
 0xad6   :  { %4741 = vrot.lane.b32.xlu2 %v4740_v59, %s5244_s22  ;;  %v6945_v59 = vunpack.i.h.bf16 %v8755_v44 }
 0xad7   :  { %v6861_v0 = vsel %vm2220_vm5, %v5212_v38, %v2217_v52 }
 0xad8   :  { %v6865_v32 = vmul.f32 %v6861_v0, %v6787_v55  ;;  %v6869_v36 = vmul.f32 %v6861_v0, %v6789_v37  ;;  %v4770_v55 = vpack.i.bf16 %v6850_v7, %v8747_v27  ;;  %v6886_v37 = vpack.i.bf16 %v6836_v34, %v6832_v53 }
 0xada   :  { %8745 = vst [vmem:[#allocation26_spill] sm:$0xff] %v6865_v32  ;;  %v2285_v29 = vmul.f32 %v6815_v48, %v6869_v36  ;;  %v2284_v54 = vmul.f32 %v6821_v28, %v6865_v32  ;;  %v6895_v30 = vpack.i.bf16 %v6869_v36, %v6865_v32 }
 0xadb   :  { %8746 = vst [vmem:[#allocation32_spill] sm:$0xff] %v6869_v36 }
 0xadc   :  { %v4750_v43 = vpack.i.bf16 %v8748_v50, %v2285_v29  ;;  %v4745_v62 = vpack.i.bf16 %v2284_v54, %v8743_v49 }
 0xade   :  { %4756 = vrot.lane.b32.xlu2 %v4755_v46, %s5246_s2  ;;  %4751 = vrot.lane.b32.xlu0 %v4750_v43, %s5244_s22  ;;  %v2648_v46 = vmul.f32 %v6945_v59, %v6865_v32 }
 0xadf   :  { %4746 = vrot.lane.b32.xlu1 %v4745_v62, %s5244_s22 }
 0xae6   :  { %4771 = vrot.lane.b32.xlu2 %v4770_v55, %s5246_s2  ;;  %4766 = vrot.lane.b32.xlu0 %v6886_v37, %s5246_s2 }
 0xae7   :  { %4761 = vrot.lane.b32.xlu1 %v4760_v2, %s5246_s2  ;;  %v8756_v2 = vld [vmem:[#allocation7_spill] sm:$0xff] }
 0xaee   :  { %2433 = vrot.lane.b32.xlu2 %v8749_v33, %s5229_s12  ;;  %4781 = vrot.lane.b32.xlu0 %v6895_v30, %s5246_s2 }
 0xaef   :  { %4776 = vrot.lane.b32.xlu1 %v4775_v21, %s5246_s2 }
 0xb30   :  { %v6903_v9 = vpop.permute.xlu2 %4741 }
 0xb31   :  { %v6905_v22 = vpop.permute.xlu0 %4726  ;;  %v8466_v18 = vunpack.i.l.bf16 %v6903_v9 }
 0xb38   :  { %v6907_v6 = vpop.permute.xlu2 %4756 }
 0xb40   :  { %v6909_v8 = vpop.permute.xlu2 %4771  ;;  %v4737_v24 = vpop.permute.xlu0 %4736 }
 0xb41   :  { %v4739_v60 = vunpack.i.h.bf16 %v4737_v24  ;;  %v4738_v51 = vunpack.i.l.bf16 %v4737_v24  ;;  %v6912_v45 = vpop.permute.xlu1 %4731  ;;  %v4800_v24 = vpack.i.bf16 %v2648_v46, %v8735_v20 }
 0xb42   :  { %v8465_v40 = vunpack.i.h.bf16 %v6912_v45 }
 0xb43   :  { %v6918_v61 = vsel %vm889_vm11, %v4739_v60, %v8466_v18 }
 0xb44   :  { %v6923_v14 = vsel %vm889_vm11, %v8465_v40, %v4738_v51 }
 0xb48   :  { %v6925_v16 = vpop.permute.xlu2 %2433 }
 0xb49   :  { %8750 = vst [vmem:[#allocation34_spill] sm:$0xff] %v6925_v16  ;;  %v6931_v38 = vsel %vm259_vm7, %v8752_v63, %v6925_v16  ;;  %v2444_v35 = vmul.f32 %v6925_v16, %v6836_v34  ;;  %v2441_v5 = vmul.f32 %v6925_v16, %v6809_v31  ;;  %v2447_v52 = vmul.f32 %v6925_v16, %v6854_v47 }
 0xb4a   :  { %8753 = vst [vmem:[#allocation47_spill] sm:$0xff] %v6931_v38  ;;  %v2443_v39 = vmul.f32 %v6931_v38, %v6832_v53  ;;  %v2440_v1 = vmul.f32 %v6931_v38, %v6813_v17  ;;  %v2446_v54 = vmul.f32 %v6931_v38, %v6850_v7  ;;  %v2449_v51 = vmul.f32 %v6931_v38, %v6865_v32 }
 0xb4b   :  { %v4795_v19 = vpack.i.bf16 %v8754_v12, %v2444_v35  ;;  %v4810_v55 = vpack.i.bf16 %v2447_v52, %v8735_v20  ;;  %v8468_v20 = vunpack.i.h.bf16 %v6907_v6  ;;  %v2450_v28 = vmul.f32 %v6925_v16, %v6869_v36 }
 0xb4c   :  { %v4790_v26 = vpack.i.bf16 %v2443_v39, %v8754_v12  ;;  %v4785_v15 = vpack.i.bf16 %v2441_v5, %v2440_v1  ;;  %v4805_v21 = vpack.i.bf16 %v8756_v2, %v2446_v54  ;;  %v4825_v1 = vpack.i.bf16 %v2449_v51, %v8754_v12 }
 0xb4d   :  { %4796 = vrot.lane.b32.xlu2 %v4795_v19, %s5239_s19  ;;  %v4820_v19 = vpack.i.bf16 %v8743_v49, %v8749_v33 }
 0xb4e   :  { %4791 = vrot.lane.b32.xlu0 %v4790_v26, %s5239_s19  ;;  %4786 = vrot.lane.b32.xlu1 %v4785_v15, %s5239_s19 }
 0xb50   :  { %v6951_v29 = vpop.permute.xlu0 %4751 }
 0xb51   :  { %v4753_v50 = vunpack.i.l.bf16 %v6951_v29  ;;  %v6958_v43 = vpop.permute.xlu1 %4746 }
 0xb52   :  { %v8467_v62 = vunpack.i.h.bf16 %v6958_v43 }
 0xb54   :  { %v6967_v60 = vsel %vm889_vm11, %v8467_v62, %v4753_v50 }
 0xb55   :  { %4811 = vrot.lane.b32.xlu2 %v4810_v55, %s5239_s19 }
 0xb56   :  { %4806 = vrot.lane.b32.xlu0 %v4805_v21, %s5239_s19  ;;  %4801 = vrot.lane.b32.xlu1 %v4800_v24, %s5231_s13  ;;  %v8757_v24 = vld [vmem:[#allocation14_spill] sm:$0xff] }
 0xb57   :  { %v4661_v51 = vunpack.i.h.bf16 %v8757_v24 }
 0xb58   :  { %v6974_v42 = vpop.permute.xlu0 %4766 }
 0xb59   :  { %v8469_v63 = vunpack.i.l.bf16 %v6974_v42  ;;  %v4762_v35 = vpop.permute.xlu1 %4761 }
 0xb5a   :  { %v4764_v5 = vunpack.i.h.bf16 %v4762_v35  ;;  %v4763_v39 = vunpack.i.l.bf16 %v4762_v35 }
 0xb5c   :  { %v6984_v26 = vsel %vm2394_vm6, %v4764_v5, %v8469_v63  ;;  %v6989_v15 = vsel %vm2394_vm6, %v8468_v20, %v4763_v39 }
 0xb5d   :  { %4826 = vrot.lane.b32.xlu2 %v4825_v1, %s5239_s19  ;;  %v7013_v1 = vmul.f32 0.0, %v4661_v51 }
 0xb5e   :  { %4821 = vrot.lane.b32.xlu0 %v4820_v19, %s5244_s22 }
 0xb60   :  { %v6993_v44 = vpop.permute.xlu0 %4781 }
 0xb61   :  { %v6995_v52 = vpop.permute.xlu1 %4776 }
 0xba7   :  { %v4797_v54 = vpop.permute.xlu2 %4796 }
 0xba8   :  { %v4798_v55 = vunpack.i.l.bf16 %v4797_v54 }
 0xbaf   :  { %v4812_v62 = vpop.permute.xlu2 %4811 }
 0xbb0   :  { %v4814_v48 = vunpack.i.h.bf16 %v4812_v62  ;;  %v4813_v38 = vunpack.i.l.bf16 %v4812_v62  ;;  %v7054_v62 = vmul.f32 %v6828_v10, %v6759_v23  ;;  %v7074_v23 = vmul.f32 %v6846_v56, %v6777_v25 }
 0xbb1   :  { %v7092_v25 = vunpack.i.h.bf16 %v6951_v29 }
 0xbc0   :  { %v6997_v46 = vpop.permute.xlu0 %4791  ;;  %v6999_v50 = vpop.permute.xlu1 %4786 }
 0xbc1   :  { %v8470_v2 = vunpack.i.h.bf16 %v6997_v46 }
 0xbc3   :  { %v7005_v21 = vsel %vm674_vm10, %v8470_v2, %v4798_v55 }
 0xbc8   :  { %v7008_v35 = vpop.permute.xlu1 %4801  ;;  %v4807_v5 = vpop.permute.xlu0 %4806 }
 0xbc9   :  { %8758 = vst [vmem:[#allocation42_spill] sm:$0xff] %v7008_v35  ;;  %v7011_v39 = vunpack.i.l.bf16 %v7008_v35  ;;  %v4808_v63 = vunpack.i.l.bf16 %v4807_v5  ;;  %v7030_v49 = vunpack.i.h.bf16 %v4807_v5 }
 0xbcb   :  { %8759 = vst [vmem:[#allocation37_spill] sm:$0xff] %v7011_v39  ;;  %v2539_v19 = vmul.f32 %v7011_v39, %v6854_v47  ;;  %v7019_v40 = vsel %vm219_vm8, %v4661_v51, %v7011_v39  ;;  %v2542_v55 = vmul.f32 %v7011_v39, %v6869_v36  ;;  %v4799_v51 = vunpack.i.h.bf16 %v4797_v54 }
 0xbcc   :  { %v2541_v24 = vmul.f32 %v7019_v40, %v6865_v32  ;;  %v2538_v18 = vmul.f32 %v7019_v40, %v6850_v7  ;;  %v7050_v54 = vmul.f32 %v6805_v13, %v6745_v4  ;;  %v2727_v4 = vsel %vm674_vm10, %v7030_v49, %v4813_v38 }
 0xbcd   :  { %v4840_v20 = vpack.i.bf16 %v7013_v1, %v2539_v19  ;;  %v2532_v19 = vmul.f32 %v7019_v40, %v6813_v17  ;;  %v2741_v16 = vmul.f32 %v2727_v4, %v6869_v36 }
 0xbce   :  { %v4815_v2 = vpack.i.bf16 %v2541_v24, %v8749_v33  ;;  %v4835_v35 = vpack.i.bf16 %v2538_v18, %v2542_v55  ;;  %v7039_v33 = vsel %vm674_vm10, %v4808_v63, %v4814_v48  ;;  %v7042_v18 = vsel %vm674_vm10, %v4799_v51, %v4808_v63 }
 0xbcf   :  { %4841 = vrot.lane.b32.xlu2 %v4840_v20, %s5236_s17  ;;  %v7046_v20 = vmul.f32 %v6805_v13, %v6743_v11  ;;  %v7060_v48 = vmul.f32 %v6828_v10, %v6761_v57  ;;  %v7064_v63 = vmul.f32 %v6846_v56, %v6775_v41  ;;  %v7068_v11 = vmul.f32 %v6861_v0, %v6793_v58 }
 0xbd0   :  { %4816 = vrot.lane.b32.xlu1 %v4815_v2, %s5236_s17  ;;  %4836 = vrot.lane.b32.xlu0 %v4835_v35, %s5236_s17  ;;  %v7056_v2 = vpop.permute.xlu0 %4821  ;;  %v7078_v13 = vmul.f32 %v6861_v0, %v6791_v3  ;;  %v4830_v58 = vpack.i.bf16 %v8754_v12, %v2450_v28  ;;  %v4850_v10 = vpack.i.bf16 %v2532_v19, %v7013_v1  ;;  %v7105_v0 = vmul.f32 0.0, %v4813_v38 }
 0xbd1   :  { %8760 = vst [vmem:[#allocation58_spill] sm:$0xff] %v7056_v2  ;;  %v7082_v57 = vmul.f32 %v7046_v20, %v7019_v40  ;;  %v4823_v41 = vunpack.i.l.bf16 %v7056_v2  ;;  %v7089_v35 = vmul.f32 %v7011_v39, %v7068_v11  ;;  %v2536_v3 = vmul.f32 %v7011_v39, %v6836_v34 }
 0xbd2   :  { %v7100_v56 = vmul.f32 %v7030_v49, %v7054_v62  ;;  %v7103_v28 = vmul.f32 %v7060_v48, %v2727_v4  ;;  %v7116_v5 = vmul.f32 %v7068_v11, %v2727_v4  ;;  %v2535_v55 = vmul.f32 %v7019_v40, %v6832_v53 }
 0xbd3   :  { %v7124_v24 = vmul.f32 %v7030_v49, %v7064_v63  ;;  %v7127_v51 = vmul.f32 %v7074_v23, %v2727_v4  ;;  %v7131_v19 = vsel %vm889_vm11, %v7092_v25, %v4823_v41  ;;  %v7140_v38 = vmul.f32 %v7050_v54, %v2727_v4 }
 0xbd4   :  { %8762 = vst [vmem:[#allocation13_spill] sm:$0xff] %v7116_v5  ;;  %v7142_v29 = vmul.f32 0.0, %v4823_v41  ;;  %v4845_v5 = vpack.i.bf16 %v2536_v3, %v2535_v55  ;;  %v4865_v41 = vpack.i.bf16 %v6854_v47, %v6850_v7  ;;  %v2740_v12 = vmul.f32 %v7030_v49, %v6865_v32 }
 0xbd5   :  { %8763 = vst [vmem:[#allocation55_spill] sm:$0xff] %v7124_v24  ;;  %v2533_v3 = vmul.f32 %v7011_v39, %v6809_v31  ;;  %v2734_v2 = vmul.f32 %v7030_v49, %v6832_v53 }
 0xbd6   :  { %8764 = vst [vmem:[#allocation39_spill] sm:$0xff] %v7127_v51  ;;  %v4885_v55 = vpack.i.bf16 %v2741_v16, %v2740_v12  ;;  %v2735_v16 = vmul.f32 %v2727_v4, %v6836_v34 }
 0xbd7   :  { %4856 = vrot.lane.b32.xlu2 %v6895_v30, %s5234_s16  ;;  %v7113_v30 = vmul.f32 %v7030_v49, %v7078_v13  ;;  %8766 = vst [vmem:[#allocation63_spill] sm:$0xff] %v7140_v38 }
 0xbd8   :  { %4831 = vrot.lane.b32.xlu1 %v4830_v58, %s5239_s19  ;;  %4851 = vrot.lane.b32.xlu0 %v4850_v10, %s5236_s17  ;;  %v7137_v10 = vmul.f32 %v7030_v49, %v7046_v20  ;;  %8767 = vst [vmem:[#allocation51_spill] sm:$0xff] %v7142_v29  ;;  %v4870_v58 = vpack.i.bf16 %v7013_v1, %v7013_v1 }
 0xbd9   :  { %8761 = vst [vmem:[#allocation49_spill] sm:$0xff] %v7113_v30  ;;  %v7154_v30 = vmul.f32 %v7060_v48, %v7131_v19 }
 0xbda   :  { %8765 = vst [vmem:[#allocation61_spill] sm:$0xff] %v7137_v10  ;;  %v4860_v10 = vpack.i.bf16 %v7013_v1, %v2533_v3  ;;  %v4895_v3 = vpack.i.bf16 %v2735_v16, %v2734_v2 }
 0xbdb   :  { %8768 = vst [vmem:[#allocation46_spill] sm:$0xff] %v7154_v30  ;;  %v2904_v30 = vmul.f32 %v7092_v25, %v6865_v32 }
 0xbdf   :  { %4871 = vrot.lane.b32.xlu2 %v4870_v58, %s5236_s17  ;;  %v4880_v58 = vpack.i.bf16 %v6809_v31, %v6813_v17 }
 0xbe0   :  { %4846 = vrot.lane.b32.xlu1 %v4845_v5, %s5236_s17  ;;  %4866 = vrot.lane.b32.xlu0 %v4865_v41, %s5234_s16  ;;  %v2731_v5 = vmul.f32 %v7030_v49, %v6813_v17  ;;  %v2732_v41 = vmul.f32 %v2727_v4, %v6809_v31 }
 0xbe2   :  { %v4900_v12 = vpack.i.bf16 %v2732_v41, %v2731_v5 }
 0xbe7   :  { %4886 = vrot.lane.b32.xlu2 %v4885_v55, %s5229_s12  ;;  %v2737_v55 = vmul.f32 %v7030_v49, %v6850_v7 }
 0xbe8   :  { %4861 = vrot.lane.b32.xlu1 %v4860_v10, %s5236_s17  ;;  %4881 = vrot.lane.b32.xlu0 %v4880_v58, %s5234_s16  ;;  %v2905_v10 = vmul.f32 %v7131_v19, %v6869_v36  ;;  %v2738_v58 = vmul.f32 %v2727_v4, %v6854_v47 }
 0xbea   :  { %v4915_v5 = vpack.i.bf16 %v2905_v10, %v2904_v30  ;;  %v4890_v2 = vpack.i.bf16 %v2738_v58, %v2737_v55 }
 0xbef   :  { %4901 = vrot.lane.b32.xlu2 %v4900_v12, %s5229_s12 }
 0xbf0   :  { %4876 = vrot.lane.b32.xlu1 %v6886_v37, %s5234_s16  ;;  %4896 = vrot.lane.b32.xlu0 %v4895_v3, %s5229_s12  ;;  %v7193_v37 = vpop.permute.xlu2 %4826 }
 0xbf7   :  { %4916 = vrot.lane.b32.xlu2 %v4915_v5, %s5227_s11 }
 0xbf8   :  { %4891 = vrot.lane.b32.xlu1 %v4890_v2, %s5229_s12 }
 0xc29   :  { %v4842_v41 = vpop.permute.xlu2 %4841 }
 0xc2a   :  { %v4844_v10 = vunpack.i.h.bf16 %v4842_v41  ;;  %v4843_v29 = vunpack.i.l.bf16 %v4842_v41 }
 0xc31   :  { %v7195_v16 = vpop.permute.xlu2 %4856 }
 0xc32   :  { %8769 = vst [vmem:[#allocation53_spill] sm:$0xff] %v7195_v16  ;;  %v8494_v12 = vunpack.i.h.bf16 %v7195_v16  ;;  %v4858_v49 = vunpack.i.l.bf16 %v7195_v16 }
 0xc34   :  { %v2857_v4 = vsel %vm444_vm14, %v4858_v49, %v8494_v12 }
 0xc35   :  { %3117 = vmatpush.msra.mxu1 %v2857_v4 }
 0xc39   :  { %v7202_v30 = vpop.permute.xlu2 %4871 }
 0xc3a   :  { %8770 = vst [vmem:[#allocation68_spill] sm:$0xff] %v7202_v30 }
 0xc41   :  { %v7204_v3 = vpop.permute.xlu2 %4886 }
 0xc42   :  { %v4817_v55 = vpop.permute.xlu1 %4816  ;;  %v4837_v58 = vpop.permute.xlu0 %4836 }
 0xc43   :  { %v4819_v5 = vunpack.i.h.bf16 %v4817_v55  ;;  %v4818_v2 = vunpack.i.l.bf16 %v4817_v55  ;;  %v4839_v32 = vunpack.i.h.bf16 %v4837_v58  ;;  %v4838_v39 = vunpack.i.l.bf16 %v4837_v58 }
 0xc44   :  { %v2645_v55 = vmul.f32 %v6945_v59, %v6850_v7 }
 0xc45   :  { %v7208_v38 = vsel %vm563_vm9, %v6945_v59, %v4818_v2  ;;  %v7210_v16 = vmul.f32 0.0, %v4818_v2  ;;  %v2585_v49 = vsel %vm563_vm9, %v4844_v10, %v4819_v5  ;;  %v2586_v4 = vsel %vm563_vm9, %v4819_v5, %v4838_v39 }
 0xc46   :  { %3088 = vmatpush.msra.mxu0 %v2585_v49  ;;  %3175 = vmatpush.msra.mxu3 %v2586_v4  ;;  %v2640_v12 = vmul.f32 %v7208_v38, %v6809_v31  ;;  %v2649_v41 = vmul.f32 %v7208_v38, %v6869_v36  ;;  %v2584_v58 = vsel %vm563_vm9, %v4839_v32, %v4843_v29 }
 0xc47   :  { %v2642_v2 = vmul.f32 %v6945_v59, %v6832_v53  ;;  %v2646_v10 = vmul.f32 %v7208_v38, %v6854_v47  ;;  %v2643_v24 = vmul.f32 %v7208_v38, %v6836_v34 }
 0xc48   :  { %3176 = vmatpush.msra.mxu3 %v2584_v58  ;;  %v4930_v39 = vpack.i.bf16 %v7210_v16, %v2640_v12  ;;  %v4905_v5 = vpack.i.bf16 %v2645_v55, %v2649_v41  ;;  %v2902_v12 = vmul.f32 %v7131_v19, %v6854_v47  ;;  %v2639_v55 = vmul.f32 %v6945_v59, %v6813_v17 }
 0xc49   :  { %v7226_v49 = vpop.permute.xlu2 %4901  ;;  %v4910_v4 = vpack.i.bf16 %v2642_v2, %v2646_v10  ;;  %v2901_v41 = vmul.f32 %v7092_v25, %v6850_v7 }
 0xc4a   :  { %v7228_v51 = vpop.permute.xlu1 %4831  ;;  %4931 = vrot.lane.b32.xlu2 %v4930_v39, %s5231_s13  ;;  %4906 = vrot.lane.b32.xlu1 %v4905_v5, %s5231_s13  ;;  %v4852_v29 = vpop.permute.xlu0 %4851  ;;  %v4920_v2 = vpack.i.bf16 %v2639_v55, %v2643_v24 }
 0xc4b   :  { %8771 = vst [vmem:[#allocation57_spill] sm:$0xff] %v7228_v51  ;;  %4911 = vrot.lane.b32.xlu0 %v4910_v4, %s5231_s13  ;;  %v4853_v36 = vunpack.i.l.bf16 %v4852_v29  ;;  %v4925_v39 = vpack.i.bf16 %v2902_v12, %v2901_v41  ;;  %v2899_v41 = vmul.f32 %v7131_v19, %v6836_v34 }
 0xc4d   :  { %v2583_v58 = vsel %vm563_vm9, %v4853_v36, %v4839_v32 }
 0xc4e   :  { %3089 = vmatpush.msra.mxu0 %v2583_v58 }
 0xc51   :  { %v7242_v10 = vpop.permute.xlu2 %4916 }
 0xc52   :  { %8772 = vst [vmem:[#allocation28_spill] sm:$0xff] %v7242_v10  ;;  %v8500_v5 = vunpack.i.h.bf16 %v7242_v10  ;;  %v4918_v4 = vunpack.i.l.bf16 %v7242_v10  ;;  %4946 = vrot.lane.b32.xlu2 %v8747_v27, %s5234_s16  ;;  %4921 = vrot.lane.b32.xlu1 %v4920_v2, %s5231_s13  ;;  %v4847_v32 = vpop.permute.xlu1 %4846  ;;  %v7249_v36 = vpop.permute.xlu0 %4866  ;;  %v2898_v10 = vmul.f32 %v7092_v25, %v6832_v53 }
 0xc53   :  { %8773 = vst [vmem:[#allocation15_spill] sm:$0xff] %v7249_v36  ;;  %v4849_v58 = vunpack.i.h.bf16 %v4847_v32  ;;  %v4848_v47 = vunpack.i.l.bf16 %v4847_v32  ;;  %4926 = vrot.lane.b32.xlu0 %v4925_v39, %s5227_s11  ;;  %v8502_v24 = vunpack.i.h.bf16 %v7249_v36  ;;  %v4868_v12 = vunpack.i.l.bf16 %v7249_v36 }
 0xc54   :  { %v2949_v55 = vsel %vm89_vm12, %v4918_v4, %v8500_v5  ;;  %v2896_v39 = vmul.f32 %v7131_v19, %v6809_v31  ;;  %v2895_v4 = vmul.f32 %v7092_v25, %v6813_v17  ;;  %v4960_v5 = vpack.i.bf16 0.0, %v7074_v23 }
 0xc55   :  { %3158 = vmatpush.msra.mxu2 %v2949_v55  ;;  %v2855_v2 = vsel %vm444_vm14, %v4868_v12, %v8502_v24  ;;  %v2582_v32 = vsel %vm563_vm9, %v4848_v47, %v4849_v58  ;;  %v4935_v55 = vpack.i.bf16 %v2899_v41, %v2898_v10  ;;  %v4833_v12 = vunpack.i.l.bf16 %v7228_v51 }
 0xc56   :  { %3118 = vmatpush.msra.mxu1 %v2855_v2  ;;  %3177 = vmatpush.msra.mxu3 %v2582_v32  ;;  %v4940_v34 = vpack.i.bf16 %v2896_v39, %v2895_v4  ;;  %v4854_v24 = vunpack.i.h.bf16 %v4852_v29  ;;  %v4829_v31 = vunpack.i.h.bf16 %v7193_v37  ;;  %v4873_v36 = vunpack.i.l.bf16 %v7202_v30 }
 0xc57   :  { %v4789_v4 = vunpack.i.h.bf16 %v6999_v50  ;;  %v4778_v51 = vunpack.i.l.bf16 %v6995_v52 }
 0xc58   :  { %v2579_v29 = vsel %vm563_vm9, %v4873_v36, %v4854_v24  ;;  %v2494_v39 = vsel %vm674_vm10, %v4829_v31, %v4833_v12  ;;  %v4788_v36 = vunpack.i.l.bf16 %v6999_v50  ;;  %v8774_v50 = vld [vmem:[#allocation38_spill] sm:$0xff] }
 0xc5a   :  { %4961 = vrot.lane.b32.xlu2 %v4960_v5, %s5234_s16  ;;  %4936 = vrot.lane.b32.xlu1 %v4935_v55, %s5227_s11  ;;  %v4862_v58 = vpop.permute.xlu1 %4861  ;;  %v4828_v5 = vunpack.i.l.bf16 %v7193_v37  ;;  %v7279_v41 = vpop.permute.xlu0 %4881  ;;  %v7291_v37 = vpack.i.bf16 %v7064_v63, %v8747_v27 }
 0xc5b   :  { %v4864_v2 = vunpack.i.h.bf16 %v4862_v58  ;;  %v4863_v32 = vunpack.i.l.bf16 %v4862_v58  ;;  %4941 = vrot.lane.b32.xlu0 %v4940_v34, %s5227_s11  ;;  %v7285_v34 = vpack.i.bf16 %v7105_v0, %v7105_v0  ;;  %v4883_v12 = vunpack.i.l.bf16 %v7279_v41 }
 0xc5c   :  { %v2493_v55 = vsel %vm674_vm10, %v4828_v5, %v4829_v31  ;;  %v4784_v31 = vunpack.i.h.bf16 %v6993_v44  ;;  %v4783_v5 = vunpack.i.l.bf16 %v6993_v44  ;;  %v8775_v58 = vunpack.i.h.bf16 %v6997_v46 }
 0xc5d   :  { %v2581_v17 = vsel %vm563_vm9, %v4864_v2, %v4848_v47  ;;  %v2580_v10 = vsel %vm563_vm9, %v4854_v24, %v4863_v32  ;;  %v4950_v47 = vpack.i.bf16 %v7068_v11, %v7078_v13 }
 0xc5e   :  { %3090 = vmatpush.msra.mxu0 %v2581_v17  ;;  %3178 = vmatpush.msra.mxu3 %v2580_v10  ;;  %v4793_v17 = vunpack.i.l.bf16 %v6997_v46  ;;  %v4680_v10 = vunpack.i.h.bf16 %v8774_v50  ;;  %v4888_v50 = vunpack.i.l.bf16 %v7204_v3 }
 0xc60   :  { %3091 = vmatpush.msra.mxu0 %v2579_v29  ;;  %3179 = vmatpush.msra.mxu3 %v2494_v39  ;;  %v3566_v29 = vmul.f32 %v7054_v62, %v7019_v40  ;;  %v2489_v44 = vsel %vm674_vm10, %v4793_v17, %v8775_v58  ;;  %v4774_v17 = vunpack.i.h.bf16 %v6909_v8  ;;  %v2402_v58 = vsel %vm2394_vm6, %v4783_v5, %v4784_v31 }
 0xc62   :  { %4976 = vrot.lane.b32.xlu2 %v7285_v34, %s5229_s12  ;;  %4951 = vrot.lane.b32.xlu1 %v4950_v47, %s5234_s16  ;;  %v7299_v24 = vpop.permute.xlu1 %4876  ;;  %v3572_v47 = vmul.f32 %v7078_v13, %v7019_v40  ;;  %v7332_v30 = vpop.permute.xlu0 %4896  ;;  %v4990_v46 = vpack.i.bf16 %v7013_v1, %v3566_v29 }
 0xc63   :  { %v8506_v2 = vunpack.i.h.bf16 %v7299_v24  ;;  %v4878_v32 = vunpack.i.l.bf16 %v7299_v24  ;;  %4956 = vrot.lane.b32.xlu0 %v7291_v37, %s5234_s16  ;;  %3092 = vmatpush.msra.mxu0 %v2493_v55  ;;  %v4779_v55 = vunpack.i.h.bf16 %v6995_v52 }
 0xc64   :  { %3180 = vmatpush.msra.mxu3 %v7039_v33  ;;  %v2487_v33 = vsel %vm674_vm10, %v4680_v10, %v4788_v36  ;;  %v4965_v52 = vpack.i.bf16 %v7013_v1, %v3572_v47  ;;  %v8777_v10 = vunpack.i.h.bf16 %v7204_v3 }
 0xc65   :  { %3093 = vmatpush.msra.mxu0 %v7042_v18  ;;  %v2853_v39 = vsel %vm444_vm14, %v4878_v32, %v8506_v2  ;;  %v2488_v18 = vsel %vm674_vm10, %v4788_v36, %v4789_v4  ;;  %v8776_v32 = vunpack.i.h.bf16 %v7279_v41  ;;  %v4773_v4 = vunpack.i.l.bf16 %v6909_v8 }
 0xc66   :  { %3181 = vmatpush.msra.mxu3 %v7005_v21  ;;  %3119 = vmatpush.msra.mxu1 %v2853_v39  ;;  %v4970_v21 = vpack.i.bf16 %v7060_v48, %v7054_v62  ;;  %v2785_v29 = vsel %vm259_vm7, %v4888_v50, %v8777_v10  ;;  %v4899_v8 = vunpack.i.h.bf16 %v7332_v30  ;;  %v4898_v39 = vunpack.i.l.bf16 %v7332_v30 }
 0xc67   :  { %3094 = vmatpush.msra.mxu0 %v2489_v44  ;;  %v2851_v2 = vsel %vm444_vm14, %v4883_v12, %v8776_v32  ;;  %v4769_v12 = vunpack.i.h.bf16 %v6974_v42  ;;  %v3569_v44 = vmul.f32 %v7064_v63, %v7019_v40  ;;  %v8779_v40 = vunpack.i.h.bf16 %v6907_v6 }
 0xc68   :  { %3182 = vmatpush.msra.mxu3 %v2488_v18  ;;  %3120 = vmatpush.msra.mxu1 %v2851_v2  ;;  %v2401_v2 = vsel %vm2394_vm6, %v4779_v55, %v4783_v5  ;;  %v2400_v5 = vsel %vm2394_vm6, %v4774_v17, %v4778_v51  ;;  %v4758_v55 = vunpack.i.l.bf16 %v6907_v6  ;;  %v8778_v18 = vunpack.i.l.bf16 %v6974_v42 }
 0xc69   :  { %3095 = vmatpush.msra.mxu0 %v2487_v33  ;;  %v2399_v33 = vsel %vm2394_vm6, %v4773_v4, %v4774_v17  ;;  %v4748_v51 = vunpack.i.l.bf16 %v6958_v43  ;;  %v4904_v17 = vunpack.i.h.bf16 %v7226_v49  ;;  %v4903_v4 = vunpack.i.l.bf16 %v7226_v49 }
 0xc6a   :  { %3183 = vmatpush.msra.mxu3 %v2402_v58  ;;  %4991 = vrot.lane.b32.xlu2 %v4990_v46, %s5236_s17  ;;  %v7344_v36 = vpop.permute.xlu1 %4891  ;;  %v2398_v32 = vsel %vm2394_vm6, %v8778_v18, %v4769_v12  ;;  %v2781_v46 = vsel %vm259_vm7, %v4898_v39, %v4899_v8  ;;  %v2395_v42 = vsel %vm2394_vm6, %v4758_v55, %v8779_v40  ;;  %v8781_v6 = vunpack.i.h.bf16 %v6958_v43  ;;  %v8783_v43 = vld [vmem:[#allocation54_spill] sm:$0xff] }
 0xc6b   :  { %4966 = vrot.lane.b32.xlu1 %v4965_v52, %s5236_s17  ;;  %v4894_v31 = vunpack.i.h.bf16 %v7344_v36  ;;  %v4893_v47 = vunpack.i.l.bf16 %v7344_v36  ;;  %4971 = vrot.lane.b32.xlu0 %v4970_v21, %s5234_s16  ;;  %v4744_v21 = vunpack.i.h.bf16 %v6903_v9  ;;  %v4980_v58 = vpack.i.bf16 %v7013_v1, %v3569_v44  ;;  %v7731_v36 = vld [vmem:[%s8358_s3 + $0x38] sm:$0xff] }
 0xc6c   :  { %3096 = vmatpush.msra.mxu0 %v2401_v2  ;;  %3121 = vmatpush.msra.mxu1 %v2785_v29  ;;  %v8780_v52 = vpack.i.bf16 %v7089_v35, %v7082_v57  ;;  %v4985_v12 = vpack.i.bf16 %v7050_v54, %v7046_v20  ;;  %v4729_v1 = vunpack.i.h.bf16 %v6905_v22  ;;  %v4728_v2 = vunpack.i.l.bf16 %v6905_v22 }
 0xc6d   :  { %3184 = vmatpush.msra.mxu3 %v2400_v5  ;;  %v2783_v50 = vsel %vm259_vm7, %v4893_v47, %v4894_v31  ;;  %v2779_v57 = vsel %vm259_vm7, %v4903_v4, %v4904_v17  ;;  %v8782_v35 = vunpack.i.l.bf16 %v6903_v9  ;;  %v4691_v10 = vunpack.i.h.bf16 %v8783_v43  ;;  %v8787_v5 = vld [vmem:[#allocation49_spill] sm:$0xff] }
 0xc6e   :  { %3097 = vmatpush.msra.mxu0 %v2399_v33  ;;  %3122 = vmatpush.msra.mxu1 %v2783_v50  ;;  %v8784_v22 = vunpack.i.h.bf16 %v6912_v45  ;;  %v2323_v39 = vsel %vm889_vm11, %v4728_v2, %v4729_v1  ;;  %v8785_v47 = vpack.i.bf16 %v7103_v28, %v7100_v56  ;;  %v3671_v33 = vmul.f32 %v6945_v59, %v7078_v13  ;;  %v8791_v50 = vld [vmem:[#allocation47_spill] sm:$0xff]  ;;  %v8792_v56 = vld [vmem:[#allocation29_spill] sm:$0xff] }
 0xc6f   :  { %3185 = vmatpush.msra.mxu3 %v2398_v32  ;;  %v2322_v9 = vsel %vm889_vm11, %v4691_v10, %v4728_v2  ;;  %v3488_v44 = vmul.f32 %v7078_v13, %v8791_v50  ;;  %v8793_v32 = vld [vmem:[#allocation39_spill] sm:$0xff]  ;;  %v3485_v40 = vmul.f32 %v7064_v63, %v8791_v50  ;;  %v5065_v1 = vpack.i.bf16 %v7078_v13, %v8747_v27  ;;  %v7471_v43 = vld [vmem:[%s8358_s3 + $0x18] sm:$0xff] }
 0xc70   :  { %3098 = vmatpush.msra.mxu0 %v6984_v26  ;;  %3123 = vmatpush.msra.mxu1 %v2781_v46  ;;  %v4733_v26 = vunpack.i.l.bf16 %v6912_v45  ;;  %v8789_v45 = vld [vmem:[#allocation55_spill] sm:$0xff]  ;;  %v5035_v18 = vpack.i.bf16 %v3671_v33, %v7210_v16  ;;  %v3479_v46 = vmul.f32 %v7046_v20, %v8791_v50  ;;  %v3668_v10 = vmul.f32 %v6945_v59, %v7064_v63  ;;  %v8800_v33 = vld [vmem:[#allocation50_spill] sm:$0xff] }
 0xc71   :  { %3186 = vmatpush.msra.mxu3 %v6989_v15  ;;  %v2328_v15 = vsel %vm889_vm11, %v4748_v51, %v8781_v6  ;;  %v8790_v55 = vpack.i.bf16 %v8789_v45, %v7105_v0  ;;  %v5015_v28 = vpack.i.bf16 %v8792_v56, %v3488_v44  ;;  %v8794_v51 = vpack.i.bf16 %v7105_v0, %v8793_v32  ;;  %v8796_v0 = vld [vmem:[#allocation63_spill] sm:$0xff] }
 0xc72   :  { %3099 = vmatpush.msra.mxu0 %v2395_v42  ;;  %5006 = vrot.lane.b32.xlu2 %v8780_v52, %s5236_s17  ;;  %v2324_v29 = vsel %vm889_vm11, %v4733_v26, %v8784_v22  ;;  %v8797_v52 = vld [vmem:[#allocation61_spill] sm:$0xff]  ;;  %v3482_v26 = vmul.f32 %v7054_v62, %v8791_v50  ;;  %v7451_v6 = vld [vmem:[%s8358_s3] sm:$0xff]  ;;  %v5085_v44 = vpack.i.bf16 %v7054_v62, %v8747_v27 }
 0xc73   :  { %3187 = vmatpush.msra.mxu3 %v6967_v60  ;;  %4981 = vrot.lane.b32.xlu1 %v4980_v58, %s5236_s17  ;;  %v2327_v60 = vsel %vm889_vm11, %v8782_v35, %v4744_v21  ;;  %v8795_v21 = vld [vmem:[#allocation34_spill] sm:$0xff]  ;;  %v5025_v58 = vpack.i.bf16 %v8792_v56, %v3485_v40  ;;  %v3663_v35 = vmul.f32 %v7050_v54, %v7208_v38 }
 0xc74   :  { %4986 = vrot.lane.b32.xlu0 %v4985_v12, %s5234_s16  ;;  %3100 = vmatpush.msra.mxu0 %v2328_v15  ;;  %v3489_v4 = vmul.f32 %v7068_v11, %v8795_v21  ;;  %v8798_v12 = vpack.i.bf16 %v8796_v0, %v8797_v52  ;;  %v3672_v15 = vmul.f32 %v7068_v11, %v7208_v38  ;;  %v8803_v0 = vld [vmem:[#allocation36_spill] sm:$0xff] }
 0xc75   :  { %3124 = vmatpush.msra.mxu1 %v2779_v57  ;;  %3188 = vmatpush.msra.mxu3 %v2327_v60  ;;  %v5040_v2 = vpack.i.bf16 %v8792_v56, %v3482_v26  ;;  %v3669_v60 = vmul.f32 %v7074_v23, %v7208_v38  ;;  %v5080_v22 = vpack.i.bf16 %v7210_v16, %v3663_v35 }
 0xc76   :  { %3101 = vmatpush.msra.mxu0 %v6918_v61  ;;  %v8786_v61 = vld [vmem:[#allocation13_spill] sm:$0xff]  ;;  %v5050_v42 = vpack.i.bf16 %v3489_v4, %v3479_v46  ;;  %v5045_v57 = vpack.i.bf16 %v7210_v16, %v3672_v15  ;;  %v3333_v52 = vmul.f32 %v7068_v11, %v8803_v0 }
 0xc77   :  { %3189 = vmatpush.msra.mxu3 %v6923_v14  ;;  %v8788_v14 = vpack.i.bf16 %v8786_v61, %v8787_v5  ;;  %v3662_v61 = vmul.f32 %v6945_v59, %v7046_v20  ;;  %v5095_v5 = vpack.i.bf16 %v7046_v20, %v8747_v27 }
 0xc78   :  { %3102 = vmatpush.msra.mxu0 %v2324_v29  ;;  %v3665_v29 = vmul.f32 %v6945_v59, %v7054_v62 }
 0xc79   :  { %3190 = vmatpush.msra.mxu3 %v2323_v39  ;;  %v5055_v39 = vpack.i.bf16 %v3669_v60, %v3668_v10 }
 0xc7a   :  { %3103 = vmatpush.msra.mxu0 %v2322_v9  ;;  %5021 = vrot.lane.b32.xlu2 %v8785_v47, %s5229_s12  ;;  %v5060_v9 = vpack.i.bf16 %v3665_v29, %v7210_v16  ;;  %v3666_v47 = vmul.f32 %v7060_v48, %v7208_v38  ;;  %v8799_v38 = vld [vmem:[#allocation43_spill] sm:$0xff] }
 0xc7b   :  { %4996 = vrot.lane.b32.xlu1 %v8788_v14, %s5229_s12  ;;  %3191 = vmatmul.f32.vlgmr.msra.gmra.mxu3 %v7451_v6  ;;  %v7493_v14 = vld [vmem:[%s8358_s3 + $0x30] sm:$0xff]  ;;  %v3332_v46 = vmul.f32 %v7078_v13, %v8799_v38 }
 0xc7c   :  { %5001 = vrot.lane.b32.xlu0 %v8790_v55, %s5229_s12  ;;  %3104 = vmatmul.f32.vlgmr.msra.gmra.mxu0 %v7451_v6  ;;  %v5070_v45 = vpack.i.bf16 %v3662_v61, %v3666_v47  ;;  %v3329_v55 = vmul.f32 %v7064_v63, %v8799_v38  ;;  %v7563_v61 = vld [vmem:[%s8358_s3 + $0x48] sm:$0xff] }
 0xc7d   :  { %v5100_v40 = vpack.i.bf16 %v8800_v33, %v3332_v46 }
 0xc7e   :  { %v5110_v50 = vpack.i.bf16 %v8800_v33, %v3329_v55  ;;  %v3483_v55 = vmul.f32 %v7060_v48, %v8795_v21 }
 0xc82   :  { %5036 = vrot.lane.b32.xlu2 %v5035_v18, %s5231_s13  ;;  %v8801_v18 = vld [vmem:[#allocation51_spill] sm:$0xff] }
 0xc83   :  { %5011 = vrot.lane.b32.xlu1 %v8794_v51, %s5229_s12  ;;  %3194 = vmatmul.f32.gmra.mxu3 %v7471_v43  ;;  %v7511_v56 = vpack.i.bf16 %v8801_v18, %v8801_v18 }
 0xc84   :  { %5016 = vrot.lane.b32.xlu0 %v5015_v28, %s5239_s19  ;;  %3107 = vmatmul.f32.gmra.mxu0 %v7471_v43  ;;  %v8802_v28 = vld [vmem:[#allocation37_spill] sm:$0xff] }
 0xc85   :  { %v3567_v32 = vmul.f32 %v8802_v28, %v7060_v48  ;;  %v3570_v51 = vmul.f32 %v8802_v28, %v7074_v23 }
 0xc87   :  { %v5125_v4 = vpack.i.bf16 %v3567_v32, %v3570_v51 }
 0xc8a   :  { %5051 = vrot.lane.b32.xlu2 %v5050_v42, %s5239_s19 }
 0xc8b   :  { %5026 = vrot.lane.b32.xlu1 %v5025_v58, %s5239_s19  ;;  %3197 = vmatmul.f32.gmra.mxu3 %v7493_v14  ;;  %v3326_v58 = vmul.f32 %v7054_v62, %v8799_v38 }
 0xc8c   :  { %5031 = vrot.lane.b32.xlu0 %v8798_v12, %s5229_s12  ;;  %3110 = vmatmul.f32.gmra.mxu0 %v7493_v14  ;;  %v3323_v12 = vmul.f32 %v7046_v20, %v8799_v38 }
 0xc8d   :  { %v5115_v26 = vpack.i.bf16 %v8800_v33, %v3326_v58  ;;  %v5160_v58 = vpack.i.bf16 %v7050_v54, %v7060_v48 }
 0xc8e   :  { %v5120_v15 = vpack.i.bf16 %v3333_v52, %v3323_v12 }
 0xc92   :  { %5066 = vrot.lane.b32.xlu2 %v5065_v1, %s5246_s2 }
 0xc93   :  { %5041 = vrot.lane.b32.xlu1 %v5040_v2, %s5239_s19  ;;  %3200 = vmatmul.f32.gmra.mxu3 %v7563_v61 }
 0xc94   :  { %5046 = vrot.lane.b32.xlu0 %v5045_v57, %s5231_s13  ;;  %v8804_v57 = vld [vmem:[#allocation42_spill] sm:$0xff]  ;;  %3113 = vmatmul.f32.gmra.mxu0 %v7563_v61 }
 0xc95   :  { %v4804_v35 = vunpack.i.h.bf16 %v8804_v57  ;;  %v3909_v57 = vmul.f32 %v7074_v23, %v7131_v19 }
 0xc9a   :  { %5081 = vrot.lane.b32.xlu2 %v5080_v22, %s5231_s13 }
 0xc9b   :  { %5056 = vrot.lane.b32.xlu1 %v5055_v39, %s5231_s13 }
 0xc9c   :  { %5061 = vrot.lane.b32.xlu0 %v5060_v9, %s5231_s13  ;;  %v3480_v9 = vmul.f32 %v7050_v54, %v8795_v21 }
 0xca2   :  { %5096 = vrot.lane.b32.xlu2 %v5095_v5, %s5246_s2  ;;  %v3564_v5 = vmul.f32 %v8802_v28, %v7050_v54  ;;  %v3486_v28 = vmul.f32 %v7074_v23, %v8795_v21 }
 0xca3   :  { %5071 = vrot.lane.b32.xlu1 %v5070_v45, %s5231_s13 }
 0xca4   :  { %5076 = vrot.lane.b32.xlu0 %v7291_v37, %s5246_s2  ;;  %v7501_v59 = vpop.permute.xlu2 %4931  ;;  %v5140_v21 = vpack.i.bf16 %v3483_v55, %v3486_v28  ;;  %v7628_v28 = vld [vmem:[%s8358_s3 + $0x8] sm:$0xff] }
 0xca5   :  { %v4933_v46 = vunpack.i.l.bf16 %v7501_v59 }
 0xcaa   :  { %5111 = vrot.lane.b32.xlu2 %v5110_v50, %s5244_s22 }
 0xcab   :  { %5086 = vrot.lane.b32.xlu1 %v5085_v44, %s5246_s2 }
 0xcac   :  { %5091 = vrot.lane.b32.xlu0 %v7511_v56, %s5227_s11  ;;  %v7516_v37 = vpop.permute.xlu2 %4946 }
 0xcb2   :  { %5126 = vrot.lane.b32.xlu2 %v5125_v4, %s5236_s17 }
 0xcb3   :  { %5101 = vrot.lane.b32.xlu1 %v5100_v40, %s5244_s22 }
 0xcb4   :  { %5106 = vrot.lane.b32.xlu0 %v7511_v56, %s5227_s11  ;;  %v7529_v42 = vpop.permute.xlu2 %4961 }
 0xcba   :  { %5136 = vrot.lane.b32.xlu2 %v8747_v27, %s5234_s16 }
 0xcbb   :  { %5116 = vrot.lane.b32.xlu1 %v5115_v26, %s5244_s22 }
 0xcbc   :  { %5121 = vrot.lane.b32.xlu0 %v5120_v15, %s5244_s22  ;;  %v7542_v1 = vpop.permute.xlu2 %4976  ;;  %v7544_v2 = vpop.permute.xlu1 %4906  ;;  %v8805_v15 = vld [vmem:[#allocation26_spill] sm:$0xff] }
 0xcbd   :  { %v4909_v60 = vunpack.i.h.bf16 %v7544_v2  ;;  %v4908_v10 = vunpack.i.l.bf16 %v7544_v2  ;;  %v7549_v22 = vpop.permute.xlu0 %4911 }
 0xcbe   :  { %v4913_v29 = vunpack.i.l.bf16 %v7549_v22  ;;  %v4914_v33 = vunpack.i.h.bf16 %v7549_v22 }
 0xcbf   :  { %v2693_v39 = vsel %vm219_vm8, %v4804_v35, %v4908_v10 }
 0xcc0   :  { %3125 = vmatpush.msra.mxu1 %v2693_v39  ;;  %v2691_v47 = vsel %vm219_vm8, %v4909_v60, %v4913_v29 }
 0xcc2   :  { %3506 = vrot.lane.b32.xlu2 %v3480_v9, %s5239_s19  ;;  %3126 = vmatpush.msra.mxu1 %v2691_v47 }
 0xcc3   :  { %5131 = vrot.lane.b32.xlu1 %v8747_v27, %s5234_s16 }
 0xcc4   :  { %3590 = vrot.lane.b32.xlu0 %v3564_v5, %s5236_s17  ;;  %v7572_v45 = vpop.permute.xlu2 %4991  ;;  %v7574_v38 = vpop.permute.xlu1 %4921  ;;  %v3908_v5 = vmul.f32 %v7092_v25, %v7064_v63 }
 0xcc5   :  { %v4924_v50 = vunpack.i.h.bf16 %v7574_v38  ;;  %v4923_v44 = vunpack.i.l.bf16 %v7574_v38  ;;  %v7582_v27 = vpop.permute.xlu0 %4926 }
 0xcc6   :  { %v4929_v32 = vunpack.i.h.bf16 %v7582_v27  ;;  %v4928_v51 = vunpack.i.l.bf16 %v7582_v27 }
 0xcc7   :  { %v2689_v4 = vsel %vm219_vm8, %v4914_v33, %v4923_v44  ;;  %v2687_v52 = vsel %vm219_vm8, %v4924_v50, %v4933_v46  ;;  %v5175_v33 = vpack.i.bf16 %v3909_v57, %v3908_v5  ;;  %v4948_v50 = vunpack.i.l.bf16 %v7516_v37 }
 0xcc8   :  { %3127 = vmatpush.msra.mxu1 %v2689_v4  ;;  %v2947_v40 = vsel %vm89_vm12, %v4928_v51, %v4929_v32  ;;  %v8806_v51 = vld [vmem:[#allocation44_spill] sm:$0xff] }
 0xcc9   :  { %3159 = vmatpush.msra.mxu2 %v2947_v40  ;;  %v7640_v4 = vld [vmem:[%s8358_s3 + $0x10] sm:$0xff]  ;;  %v4949_v40 = vunpack.i.h.bf16 %v7516_v37 }
 0xcca   :  { %5161 = vrot.lane.b32.xlu2 %v5160_v58, %s5246_s2  ;;  %3128 = vmatpush.msra.mxu1 %v2687_v52  ;;  %v8807_v52 = vld [vmem:[#allocation53_spill] sm:$0xff] }
 0xccb   :  { %5141 = vrot.lane.b32.xlu1 %v5140_v21, %s5239_s19 }
 0xccc   :  { %5146 = vrot.lane.b32.xlu0 %v7285_v34, %s5229_s12  ;;  %v7604_v12 = vpop.permute.xlu2 %5006  ;;  %v7606_v26 = vpop.permute.xlu1 %4936  ;;  %3129 = vmatpush.msra.mxu1 %v8805_v15  ;;  %v8808_v15 = vunpack.i.h.bf16 %v8807_v52  ;;  %v8511_v52 = vunpack.i.l.bf16 %v7529_v42 }
 0xccd   :  { %v8513_v35 = vunpack.i.h.bf16 %v7606_v26  ;;  %v4938_v60 = vunpack.i.l.bf16 %v7606_v26  ;;  %v7613_v39 = vpop.permute.xlu0 %4941 }
 0xcce   :  { %v8509_v9 = vunpack.i.h.bf16 %v7613_v39  ;;  %v4943_v47 = vunpack.i.l.bf16 %v7613_v39  ;;  %3130 = vmatpush.msra.mxu1 %v6850_v7  ;;  %v5155_v7 = vpack.i.bf16 %v7074_v23, %v7068_v11  ;;  %v2858_v57 = vsel %vm444_vm14, %v8808_v15, %v4948_v50 }
 0xccf   :  { %v2945_v55 = vsel %vm89_vm12, %v4938_v60, %v8513_v35  ;;  %v8811_v15 = vunpack.i.h.bf16 %v7299_v24 }
 0xcd0   :  { %3131 = vmatpush.msra.mxu1 %v6832_v53  ;;  %3160 = vmatpush.msra.mxu2 %v2945_v55  ;;  %v2943_v53 = vsel %vm89_vm12, %v4943_v47, %v8509_v9  ;;  %v3912_v55 = vmul.f32 %v7068_v11, %v7131_v19  ;;  %v4978_v9 = vunpack.i.l.bf16 %v7542_v1 }
 0xcd2   :  { %5176 = vrot.lane.b32.xlu2 %v5175_v33, %s5227_s11  ;;  %3132 = vmatpush.msra.mxu1 %v8806_v51  ;;  %v4964_v33 = vunpack.i.h.bf16 %v7529_v42 }
 0xcd3   :  { %5151 = vrot.lane.b32.xlu1 %v7285_v34, %s5229_s12  ;;  %3161 = vmatpush.msra.mxu2 %v2943_v53 }
 0xcd4   :  { %5156 = vrot.lane.b32.xlu0 %v5155_v7, %s5246_s2  ;;  %3133 = vmatmul.f32.vlgmr.msra.gmra.mxu1 %v7628_v28  ;;  %v7647_v58 = vpop.permute.xlu2 %5021  ;;  %v7649_v21 = vpop.permute.xlu1 %4951  ;;  %v8809_v7 = vld [vmem:[#allocation15_spill] sm:$0xff] }
 0xcd5   :  { %4595 = vmatmul.msk.f32.vlgmr.msra.gmra.mxu2 %vm3075_vm13, %v7640_v4  ;;  %v8512_v37 = vunpack.i.h.bf16 %v7649_v21  ;;  %v4953_v34 = vunpack.i.l.bf16 %v7649_v21  ;;  %v4957_v60 = vpop.permute.xlu0 %4956  ;;  %v8810_v51 = vunpack.i.h.bf16 %v8809_v7 }
 0xcd6   :  { %3204 = vmatpush.msrb.mxu2 %v2858_v57  ;;  %v4959_v47 = vunpack.i.h.bf16 %v4957_v60  ;;  %v4958_v5 = vunpack.i.l.bf16 %v4957_v60  ;;  %v3911_v60 = vmul.f32 %v7092_v25, %v7078_v13 }
 0xcd7   :  { %v2856_v53 = vsel %vm444_vm14, %v8810_v51, %v4949_v40  ;;  %v3872_v50 = vsel %vm444_vm14, %v4953_v34, %v8512_v37  ;;  %v5165_v40 = vpack.i.bf16 %v7210_v16, %v7210_v16  ;;  %v8812_v34 = vld [vmem:[#allocation46_spill] sm:$0xff] }
 0xcd8   :  { %3205 = vmatpush.msrb.mxu2 %v2856_v53  ;;  %v2854_v57 = vsel %vm444_vm14, %v8811_v15, %v4958_v5  ;;  %4123 = vmatpush.msrb.mxu3 %v3872_v50  ;;  %v8813_v7 = vpack.i.bf16 %v8801_v18, %v8812_v34  ;;  %v5170_v51 = vpack.i.bf16 %v3912_v55, %v3911_v60  ;;  %v7686_v5 = vld [vmem:[%s8358_s3 + $0x20] sm:$0xff]  ;;  %v7691_v53 = vld [vmem:[%s8358_s3 + $0x28] sm:$0xff]  ;;  %v4979_v50 = vunpack.i.h.bf16 %v7542_v1 }
 0xcd9   :  { %v3870_v24 = vsel %vm444_vm14, %v4959_v47, %v8511_v52  ;;  %v8814_v55 = vunpack.i.h.bf16 %v7279_v41  ;;  %v8816_v41 = vunpack.i.h.bf16 %v7204_v3 }
 0xcda   :  { %3206 = vmatpush.msrb.mxu2 %v2854_v57  ;;  %5186 = vrot.lane.b32.xlu2 %v8813_v7, %s5227_s11  ;;  %v8815_v57 = vld [vmem:[#allocation68_spill] sm:$0xff] }
 0xcdb   :  { %5166 = vrot.lane.b32.xlu1 %v5165_v40, %s5231_s13  ;;  %v2852_v15 = vsel %vm444_vm14, %v8814_v55, %v4964_v33  ;;  %4124 = vmatpush.msrb.mxu3 %v3870_v24  ;;  %v4874_v60 = vunpack.i.h.bf16 %v8815_v57  ;;  %v2786_v33 = vsel %vm259_vm7, %v8816_v41, %v4978_v9  ;;  %v5009_v40 = vunpack.i.h.bf16 %v7604_v12 }
 0xcdc   :  { %5171 = vrot.lane.b32.xlu0 %v5170_v51, %s5227_s11  ;;  %3207 = vmatpush.msrb.mxu2 %v2852_v15  ;;  %v7699_v47 = vpop.permute.xlu2 %5036  ;;  %v2784_v55 = vsel %vm259_vm7, %v4894_v31, %v4979_v50  ;;  %v3905_v15 = vmul.f32 %v7092_v25, %v7054_v62  ;;  %v7736_v31 = vld [vmem:[%s8358_s3 + $0x40] sm:$0xff] }
 0xcdd   :  { %3136 = vmatmul.f32.gmra.mxu1 %v7686_v5  ;;  %4596 = vmatmul.msk.f32.gmra.mxu2 %vm3075_vm13, %v7691_v53  ;;  %v4967_v1 = vpop.permute.xlu1 %4966  ;;  %v7705_v34 = vpop.permute.xlu0 %4971 }
 0xcde   :  { %v4968_v7 = vunpack.i.l.bf16 %v4967_v1  ;;  %v8510_v51 = vunpack.i.h.bf16 %v7705_v34  ;;  %v4973_v24 = vunpack.i.l.bf16 %v7705_v34  ;;  %3208 = vmatpush.msrb.mxu2 %v2786_v33  ;;  %v5180_v41 = vpack.i.bf16 %v3905_v15, %v8801_v18  ;;  %v3053_v15 = vld [vmem:[%s8359_s4 + $0x10] sm:$0xff] }
 0xcdf   :  { %v4969_v50 = vunpack.i.h.bf16 %v4967_v1  ;;  %v3327_v1 = vmul.f32 %v7060_v48, %v8803_v0 }
 0xce0   :  { %3209 = vmatpush.msrb.mxu2 %v2784_v55  ;;  %v3616_v3 = vsel %vm563_vm9, %v4874_v60, %v4968_v7  ;;  %v3868_v9 = vsel %vm444_vm14, %v4973_v24, %v8510_v51  ;;  %v7723_v57 = vsel %vm563_vm9, %v4968_v7, %v5009_v40 }
 0xce1   :  { %4094 = vmatpush.msrb.mxu1 %v3616_v3  ;;  %4125 = vmatpush.msrb.mxu3 %v3868_v9  ;;  %v8517_v3 = vunpack.i.l.bf16 %v7572_v45 }
 0xce2   :  { %5201 = vrot.lane.b32.xlu2 %v7511_v56, %s5227_s11  ;;  %v3330_v56 = vmul.f32 %v7074_v23, %v8803_v0 }
 0xce3   :  { %5181 = vrot.lane.b32.xlu1 %v5180_v41, %s5227_s11  ;;  %v8516_v41 = vunpack.i.l.bf16 %v7604_v12 }
 0xce4   :  { %3690 = vrot.lane.b32.xlu0 %v7210_v16, %s5231_s13  ;;  %v3903_v16 = vmul.f32 %v7050_v54, %v7131_v19  ;;  %v7754_v7 = vpop.permute.xlu2 %5051  ;;  %v3902_v19 = vmul.f32 %v7092_v25, %v7046_v20  ;;  %v5190_v52 = vpack.i.bf16 %v3327_v1, %v3330_v56  ;;  %v7784_v25 = vld [vmem:[%s8358_s3 + $0x58] sm:$0xff] }
 0xce5   :  { %3139 = vmatmul.f32.gmra.mxu1 %v7731_v36  ;;  %4597 = vmatmul.msk.f32.gmra.mxu2 %vm3075_vm13, %v7736_v31  ;;  %v7744_v18 = vpop.permute.xlu1 %4981 }
 0xce6   :  { %v4984_v60 = vunpack.i.h.bf16 %v7744_v18  ;;  %v8518_v33 = vunpack.i.l.bf16 %v7744_v18  ;;  %v7750_v40 = vpop.permute.xlu0 %4986  ;;  %v5195_v37 = vpack.i.bf16 %v3903_v16, %v3902_v19  ;;  %v3324_v19 = vmul.f32 %v7050_v54, %v8803_v0 }
 0xce7   :  { %v8515_v24 = vunpack.i.h.bf16 %v7750_v40  ;;  %v4988_v55 = vunpack.i.l.bf16 %v7750_v40 }
 0xce8   :  { %v3614_v9 = vsel %vm563_vm9, %v4969_v50, %v8518_v33  ;;  %v3612_v35 = vsel %vm563_vm9, %v4984_v60, %v8517_v3  ;;  %v7779_v50 = vld [vmem:[%s8358_s3 + $0x50] sm:$0xff]  ;;  %v3052_v33 = vld [vmem:[%s8359_s4 + $0x8] sm:$0xff] }
 0xce9   :  { %4095 = vmatpush.msrb.mxu1 %v3614_v9  ;;  %v3866_v51 = vsel %vm444_vm14, %v4988_v55, %v8515_v24  ;;  %v4994_v55 = vunpack.i.h.bf16 %v7572_v45  ;;  %v5023_v24 = vunpack.i.l.bf16 %v7647_v58 }
 0xcea   :  { %4126 = vmatpush.msrb.mxu3 %v3866_v51  ;;  %3067 = vperm.xlu2 %4723, %v3053_v15  }
 0xceb   :  { %5191 = vrot.lane.b32.xlu1 %v5190_v52, %s5244_s22  ;;  %4096 = vmatpush.msrb.mxu1 %v3612_v35  ;;  %v3610_v56 = vsel %vm563_vm9, %v4994_v55, %v8516_v41  ;;  %v3054_v55 = vld [vmem:[%s8359_s4 + $0x18] sm:$0xff] }
 0xcec   :  { %5196 = vrot.lane.b32.xlu0 %v5195_v37, %s5227_s11  ;;  %v7802_v52 = vpop.permute.xlu2 %5066 }
 0xced   :  { %3142 = vmatmul.f32.gmra.mxu1 %v7779_v50  ;;  %4598 = vmatmul.msk.f32.gmra.mxu2 %vm3075_vm13, %v7784_v25  ;;  %v7792_v51 = vpop.permute.xlu1 %4996 }
 0xcee   :  { %v8514_v60 = vunpack.i.h.bf16 %v7792_v51  ;;  %v4998_v16 = vunpack.i.l.bf16 %v7792_v51  ;;  %v5002_v1 = vpop.permute.xlu0 %5001  ;;  %4097 = vmatpush.msrb.mxu1 %v3610_v56 }
 0xcef   :  { %v5003_v35 = vunpack.i.l.bf16 %v5002_v1 }
 0xcf0   :  { %v3800_v37 = vsel %vm259_vm7, %v4998_v16, %v8514_v60  ;;  %v5004_v16 = vunpack.i.h.bf16 %v5002_v1  ;;  %v8520_v60 = vunpack.i.h.bf16 %v7647_v58  ;;  %v4934_v1 = vunpack.i.h.bf16 %v7501_v59 }
 0xcf1   :  { %v2782_v9 = vsel %vm259_vm7, %v4899_v8, %v5003_v35  ;;  %4127 = vmatpush.msrb.mxu3 %v3800_v37  ;;  %v8817_v37 = vld [vmem:[#allocation57_spill] sm:$0xff] }
 0xcf2   :  { %3210 = vmatpush.msrb.mxu2 %v2782_v9  ;;  %4074 = vperm.xlu2 %4723, %v3053_v15   ;;  %v4834_v0 = vunpack.i.h.bf16 %v8817_v37  ;;  %v4058_v9 = vld [vmem:[%s8359_s4] sm:$0xff]  ;;  %v2694_v49 = vsel %vm219_vm8, %v4908_v10, %v4934_v1 }
 0xcf3   :  { %3350 = vrot.lane.b32.xlu1 %v3324_v19, %s5244_s22  ;;  %v5038_v19 = vunpack.i.l.bf16 %v7699_v47 }
 0xcf4   :  { %3072 = vperm.xlu0 %4720, %v3054_v55  }
 0xcf5   :  { %v7813_v56 = vpop.permute.xlu1 %5011 }
 0xcf6   :  { %v5014_v30 = vunpack.i.h.bf16 %v7813_v56  ;;  %v8521_v8 = vunpack.i.l.bf16 %v7813_v56  ;;  %v7817_v35 = vpop.permute.xlu0 %5016 }
 0xcf7   :  { %v5018_v15 = vunpack.i.l.bf16 %v7817_v35  ;;  %v5019_v2 = vunpack.i.h.bf16 %v7817_v35 }
 0xcf8   :  { %v2780_v41 = vsel %vm259_vm7, %v4904_v17, %v5014_v30  ;;  %v3798_v37 = vsel %vm259_vm7, %v5004_v16, %v8521_v8  ;;  %v7843_v17 = vpop.permute.xlu2 %5081  ;;  %v2692_v16 = vsel %vm219_vm8, %v4913_v29, %v5038_v19 }
 0xcf9   :  { %3211 = vmatpush.msrb.mxu2 %v2780_v41  ;;  %v3532_v3 = vsel %vm674_vm10, %v4834_v0, %v5018_v15  ;;  %4128 = vmatpush.msrb.mxu3 %v3798_v37  ;;  %v3796_v41 = vsel %vm259_vm7, %v5023_v24, %v8520_v60 }
 0xcfa   :  { %4098 = vmatpush.msrb.mxu1 %v3532_v3  ;;  %4064 = vperm.xlu2 %4723, %v4058_v9  }
 0xcfb   :  { %4079 = vperm.xlu1 %4724, %v3054_v55   ;;  %3212 = vmatpush.msrb.mxu2 %v2694_v49 }
 0xcfc   :  { %3062 = vperm.xlu0 %4720, %v3052_v33   ;;  %4129 = vmatpush.msrb.mxu3 %v3796_v41 }
 0xcfd   :  { %v7851_v3 = vpop.permute.xlu1 %5026  ;;  %3213 = vmatpush.msrb.mxu2 %v2692_v16  ;;  %v5039_v16 = vunpack.i.h.bf16 %v7699_v47 }
 0xcfe   :  { %v5028_v10 = vunpack.i.l.bf16 %v7851_v3  ;;  %v7855_v30 = vpop.permute.xlu0 %5031  ;;  %v5029_v19 = vunpack.i.h.bf16 %v7851_v3 }
 0xcff   :  { %v8519_v55 = vunpack.i.h.bf16 %v7855_v30  ;;  %v5033_v0 = vunpack.i.l.bf16 %v7855_v30 }
 0xd00   :  { %v3530_v24 = vsel %vm674_vm10, %v5019_v2, %v5028_v10  ;;  %v7865_v29 = vpop.permute.xlu2 %5096 }
 0xd01   :  { %4099 = vmatpush.msrb.mxu1 %v3530_v24  ;;  %v3794_v22 = vsel %vm259_vm7, %v5033_v0, %v8519_v55  ;;  %v5068_v24 = vunpack.i.l.bf16 %v7802_v52 }
 0xd02   :  { %4130 = vmatpush.msrb.mxu3 %v3794_v22 }
 0xd03   :  { %3057 = vperm.xlu1 %4724, %v4058_v9   ;;  %v8523_v9 = vunpack.i.h.bf16 %v7802_v52 }
 0xd04   :  { %4069 = vperm.xlu0 %4720, %v3052_v33   ;;  %v8524_v33 = vunpack.i.l.bf16 %v7754_v7 }
 0xd05   :  { %v7867_v1 = vpop.permute.xlu1 %5041 }
 0xd06   :  { %v5044_v37 = vunpack.i.h.bf16 %v7867_v1  ;;  %v8529_v49 = vunpack.i.l.bf16 %v7867_v1  ;;  %v7872_v41 = vpop.permute.xlu0 %5046 }
 0xd07   :  { %v5049_v2 = vunpack.i.h.bf16 %v7872_v41  ;;  %v8522_v0 = vunpack.i.l.bf16 %v7872_v41 }
 0xd08   :  { %v3528_v22 = vsel %vm674_vm10, %v5029_v19, %v8529_v49  ;;  %v3526_v60 = vsel %vm674_vm10, %v5044_v37, %v8524_v33  ;;  %v3448_v19 = vsel %vm2394_vm6, %v5068_v24, %v8523_v9  ;;  %v8818_v24 = vld [vmem:[#allocation32_spill] sm:$0xff] }
 0xd09   :  { %v2690_v55 = vsel %vm219_vm8, %v4923_v44, %v5049_v2  ;;  %4100 = vmatpush.msrb.mxu1 %v3528_v22  ;;  %v3716_v47 = vsel %vm219_vm8, %v5039_v16, %v8522_v0  ;;  %v7899_v16 = vpop.permute.xlu2 %5111  ;;  %v8819_v33 = vld [vmem:[#allocation24_spill] sm:$0xff] }
 0xd0a   :  { %3214 = vmatpush.msrb.mxu2 %v2690_v55  ;;  %4131 = vmatpush.msrb.mxu3 %v3716_v47  ;;  %v5113_v27 = vunpack.i.l.bf16 %v7899_v16 }
 0xd0b   :  { %4101 = vmatpush.msrb.mxu1 %v3526_v60 }
 0xd0d   :  { %v7895_v8 = vpop.permute.xlu1 %5056  ;;  %4102 = vmatpush.msrb.mxu1 %v3448_v19 }
 0xd0e   :  { %v8526_v38 = vunpack.i.h.bf16 %v7895_v8  ;;  %v5058_v44 = vunpack.i.l.bf16 %v7895_v8  ;;  %v5062_v2 = vpop.permute.xlu0 %5061 }
 0xd0f   :  { %v5063_v55 = vunpack.i.l.bf16 %v5062_v2  ;;  %v5064_v47 = vunpack.i.h.bf16 %v5062_v2 }
 0xd10   :  { %v3714_v37 = vsel %vm219_vm8, %v5058_v44, %v8526_v38 }
 0xd11   :  { %v2688_v60 = vsel %vm219_vm8, %v4933_v46, %v5063_v55  ;;  %4132 = vmatpush.msrb.mxu3 %v3714_v37  ;;  %v8527_v46 = vunpack.i.l.bf16 %v7843_v17  ;;  %v8820_v55 = vld [vmem:[#allocation41_spill] sm:$0xff]  ;;  %v7922_v37 = vpop.permute.xlu2 %5126 }
 0xd12   :  { %3215 = vmatpush.msrb.mxu2 %v2688_v60 }
 0xd14   :  { %3216 = vmatpush.msrb.mxu2 %v8818_v24 }
 0xd15   :  { %v7908_v22 = vpop.permute.xlu1 %5071 }
 0xd16   :  { %v5074_v19 = vunpack.i.h.bf16 %v7908_v22  ;;  %v8525_v0 = vunpack.i.l.bf16 %v7908_v22  ;;  %v7912_v9 = vpop.permute.xlu0 %5076  ;;  %3217 = vmatpush.msrb.mxu2 %v8819_v33  ;;  %v8821_v33 = vld [vmem:[#allocation59_spill] sm:$0xff] }
 0xd17   :  { %v8528_v44 = vunpack.i.h.bf16 %v7912_v9  ;;  %v5078_v59 = vunpack.i.l.bf16 %v7912_v9 }
 0xd18   :  { %3218 = vmatpush.msrb.mxu2 %v8820_v55  ;;  %v3712_v2 = vsel %vm219_vm8, %v5064_v47, %v8525_v0  ;;  %v3710_v24 = vsel %vm219_vm8, %v5074_v19, %v8527_v46  ;;  %v5099_v47 = vunpack.i.h.bf16 %v7865_v29  ;;  %v5098_v0 = vunpack.i.l.bf16 %v7865_v29 }
 0xd19   :  { %v3446_v60 = vsel %vm2394_vm6, %v5078_v59, %v8528_v44  ;;  %4133 = vmatpush.msrb.mxu3 %v3712_v2  ;;  %v7950_v49 = vpop.permute.xlu2 %5136  ;;  %v8844_v29 = vunpack.i.l.bf16 %v7908_v22 }
 0xd1a   :  { %3219 = vmatpush.msrb.mxu2 %v8821_v33  ;;  %4103 = vmatpush.msrb.mxu1 %v3446_v60  ;;  %v3442_v44 = vsel %vm2394_vm6, %v5098_v0, %v5099_v47 }
 0xd1b   :  { %3220 = vmatmul.f32.vlgmr.msrb.gmra.mxu2 %v7628_v28  ;;  %4134 = vmatpush.msrb.mxu3 %v3710_v24  ;;  %v8822_v24 = vld [vmem:[#allocation28_spill] sm:$0xff] }
 0xd1c   :  { %v8823_v46 = vunpack.i.h.bf16 %v8822_v24 }
 0xd1d   :  { %v7932_v55 = vpop.permute.xlu1 %5086  ;;  %4135 = vmatpush.msrb.mxu3 %v7078_v13 }
 0xd1e   :  { %v5089_v59 = vunpack.i.h.bf16 %v7932_v55  ;;  %v5088_v2 = vunpack.i.l.bf16 %v7932_v55  ;;  %v5092_v60 = vpop.permute.xlu0 %5091 }
 0xd1f   :  { %v5094_v33 = vunpack.i.h.bf16 %v5092_v60  ;;  %v5093_v38 = vunpack.i.l.bf16 %v5092_v60  ;;  %4136 = vmatpush.msrb.mxu3 %v7064_v63 }
 0xd20   :  { %v3444_v19 = vsel %vm2394_vm6, %v5088_v2, %v5089_v59 }
 0xd21   :  { %v2950_v13 = vsel %vm89_vm12, %v8823_v46, %v5093_v38  ;;  %4104 = vmatpush.msrb.mxu1 %v3444_v19  ;;  %4137 = vmatpush.msrb.mxu3 %v7054_v62  ;;  %v2948_v63 = vsel %vm89_vm12, %v4929_v32, %v5094_v33  ;;  %v8824_v62 = vld [vmem:[#allocation58_spill] sm:$0xff] }
 0xd22   :  { %3245 = vmatpush.msrb.mxu0 %v2950_v13  ;;  %v4824_v46 = vunpack.i.h.bf16 %v8824_v62  ;;  %v5128_v13 = vunpack.i.l.bf16 %v7922_v37 }
 0xd23   :  { %3223 = vmatmul.f32.gmra.mxu2 %v7686_v5  ;;  %4105 = vmatpush.msrb.mxu1 %v3442_v44 }
 0xd24   :  { %3246 = vmatpush.msrb.mxu0 %v2948_v63  ;;  %4138 = vmatpush.msrb.mxu3 %v7046_v20  ;;  %v8825_v20 = vunpack.i.h.bf16 %v7606_v26  ;;  %v8826_v63 = vunpack.i.h.bf16 %v7613_v39  ;;  %v5129_v26 = vunpack.i.h.bf16 %v7922_v37 }
 0xd25   :  { %v7957_v38 = vpop.permute.xlu1 %5101  ;;  %4139 = vmatmul.f32.vlgmr.msrb.gmra.mxu3 %v7628_v28 }
 0xd26   :  { %v5104_v0 = vunpack.i.h.bf16 %v7957_v38  ;;  %v5103_v2 = vunpack.i.l.bf16 %v7957_v38  ;;  %v5107_v60 = vpop.permute.xlu0 %5106 }
 0xd27   :  { %v5109_v19 = vunpack.i.h.bf16 %v5107_v60  ;;  %v5108_v24 = vunpack.i.l.bf16 %v5107_v60 }
 0xd28   :  { %v3376_v32 = vsel %vm889_vm11, %v4824_v46, %v5103_v2  ;;  %v3374_v33 = vsel %vm889_vm11, %v5104_v0, %v5113_v27  ;;  %v7979_v46 = vpop.permute.xlu2 %3506  ;;  %v5114_v0 = vunpack.i.h.bf16 %v7899_v16 }
 0xd29   :  { %v2946_v44 = vsel %vm89_vm12, %v8825_v20, %v5108_v24  ;;  %4106 = vmatpush.msrb.mxu1 %v3376_v32  ;;  %v2944_v62 = vsel %vm89_vm12, %v8826_v63, %v5109_v19  ;;  %v8827_v32 = vunpack.i.l.bf16 %v7744_v18 }
 0xd2a   :  { %3247 = vmatpush.msrb.mxu0 %v2946_v44 }
 0xd2b   :  { %3226 = vmatmul.f32.gmra.mxu2 %v7731_v36  ;;  %4107 = vmatpush.msrb.mxu1 %v3374_v33  ;;  %v3615_v20 = vsel %vm563_vm9, %v8827_v32, %v5128_v13  ;;  %v8828_v33 = vunpack.i.l.bf16 %v7572_v45 }
 0xd2c   :  { %3248 = vmatpush.msrb.mxu0 %v2944_v62 }
 0xd2d   :  { %4599 = vmatmul.msk.f32.vlgmr.msrb.gmra.mxu0 %vm3075_vm13, %v7640_v4  ;;  %v7983_v60 = vpop.permute.xlu1 %5116  ;;  %4142 = vmatmul.f32.gmra.mxu3 %v7686_v5 }
 0xd2e   :  { %4181 = vmatpush.msra.mxu0 %v7723_v57  ;;  %v5119_v39 = vunpack.i.h.bf16 %v7983_v60  ;;  %v5118_v19 = vunpack.i.l.bf16 %v7983_v60  ;;  %v7990_v24 = vpop.permute.xlu0 %5121  ;;  %v3613_v57 = vsel %vm563_vm9, %v8828_v33, %v5129_v26  ;;  %v5054_v26 = vunpack.i.h.bf16 %v7754_v7 }
 0xd2f   :  { %v5123_v37 = vunpack.i.l.bf16 %v7990_v24 }
 0xd30   :  { %4182 = vmatpush.msra.mxu0 %v3615_v20  ;;  %v3372_v44 = vsel %vm889_vm11, %v5114_v0, %v5118_v19  ;;  %v8011_v0 = vpop.permute.xlu2 %5161  ;;  %v5138_v20 = vunpack.i.l.bf16 %v7950_v49  ;;  %v3533_v33 = vsel %vm674_vm10, %v5018_v15, %v5054_v26 }
 0xd31   :  { %4108 = vmatpush.msrb.mxu1 %v3372_v44  ;;  %v3370_v63 = vsel %vm889_vm11, %v5119_v39, %v5123_v37  ;;  %v8829_v39 = vunpack.i.l.bf16 %v7604_v12 }
 0xd32   :  { %4183 = vmatpush.msra.mxu0 %v3613_v57  ;;  %v5139_v57 = vunpack.i.h.bf16 %v7950_v49 }
 0xd33   :  { %3229 = vmatmul.f32.gmra.mxu2 %v7779_v50  ;;  %4109 = vmatpush.msrb.mxu1 %v3370_v63  ;;  %v8831_v63 = vunpack.i.l.bf16 %v7529_v42 }
 0xd34   :  { %4110 = vmatmul.f32.vlgmr.msrb.gmra.mxu1 %v7451_v6  ;;  %v8830_v6 = vunpack.i.h.bf16 %v7649_v21 }
 0xd35   :  { %4600 = vmatmul.msk.f32.gmra.mxu0 %vm3075_vm13, %v7691_v53  ;;  %v5132_v18 = vpop.permute.xlu1 %5131  ;;  %4145 = vmatmul.f32.gmra.mxu3 %v7731_v36 }
 0xd36   :  { %v5134_v45 = vunpack.i.h.bf16 %v5132_v18  ;;  %v5133_v13 = vunpack.i.l.bf16 %v5132_v18  ;;  %v3591_v62 = vpop.permute.xlu0 %3590  ;;  %v8832_v18 = vunpack.i.h.bf16 %v7705_v34 }
 0xd37   :  { %v3611_v32 = vsel %vm563_vm9, %v8829_v39, %v3591_v62  ;;  %v8833_v62 = vunpack.i.h.bf16 %v7750_v40  ;;  %v8834_v39 = vunpack.i.h.bf16 %v7792_v51  ;;  %v8835_v40 = vunpack.i.l.bf16 %v7867_v1 }
 0xd38   :  { %4184 = vmatpush.msra.mxu0 %v3611_v32  ;;  %v3873_v44 = vsel %vm444_vm14, %v8830_v6, %v5133_v13  ;;  %v3871_v12 = vsel %vm444_vm14, %v8831_v63, %v5134_v45  ;;  %v3869_v21 = vsel %vm444_vm14, %v8832_v18, %v5138_v20  ;;  %v8040_v26 = vpop.permute.xlu2 %5176  ;;  %v8836_v6 = vunpack.i.l.bf16 %v7813_v56 }
 0xd39   :  { %4210 = vmatpush.msra.mxu1 %v3873_v44  ;;  %v3867_v42 = vsel %vm444_vm14, %v8833_v62, %v5139_v57  ;;  %v8837_v51 = vunpack.i.l.bf16 %v7754_v7  ;;  %v5164_v7 = vunpack.i.h.bf16 %v8011_v0 }
 0xd3a   :  { %4185 = vmatpush.msra.mxu0 %v3533_v33 }
 0xd3b   :  { %4211 = vmatpush.msra.mxu1 %v3871_v12  ;;  %v8838_v12 = vunpack.i.h.bf16 %v7647_v58  ;;  %v8841_v58 = vunpack.i.h.bf16 %v7912_v9 }
 0xd3c   :  { %4113 = vmatmul.f32.gmra.mxu1 %v7471_v43 }
 0xd3d   :  { %4601 = vmatmul.msk.f32.gmra.mxu0 %vm3075_vm13, %v7736_v31  ;;  %v5142_v35 = vpop.permute.xlu1 %5141  ;;  %4212 = vmatpush.msra.mxu1 %v3869_v21  ;;  %v5163_v21 = vunpack.i.l.bf16 %v8011_v0  ;;  %v8842_v0 = vunpack.i.l.bf16 %v7872_v41  ;;  %v8843_v41 = vunpack.i.h.bf16 %v7895_v8 }
 0xd3e   :  { %v5144_v15 = vunpack.i.h.bf16 %v5142_v35  ;;  %v5143_v13 = vunpack.i.l.bf16 %v5142_v35  ;;  %v5147_v49 = vpop.permute.xlu0 %5146  ;;  %4148 = vmatmul.f32.gmra.mxu3 %v7779_v50 }
 0xd3f   :  { %v5149_v45 = vunpack.i.h.bf16 %v5147_v49  ;;  %v5148_v43 = vunpack.i.l.bf16 %v5147_v49  ;;  %4213 = vmatpush.msra.mxu1 %v3867_v42 }
 0xd40   :  { %v3531_v34 = vsel %vm674_vm10, %v5028_v10, %v5143_v13  ;;  %v3529_v20 = vsel %vm674_vm10, %v8835_v40, %v5144_v15  ;;  %v3527_v10 = vsel %vm674_vm10, %v8837_v51, %v7979_v46  ;;  %v8840_v46 = vunpack.i.h.bf16 %v7855_v30  ;;  %v5187_v49 = vpop.permute.xlu2 %5186 }
 0xd41   :  { %4186 = vmatpush.msra.mxu0 %v3531_v34  ;;  %v3801_v32 = vsel %vm259_vm7, %v8834_v39, %v5148_v43  ;;  %v3799_v44 = vsel %vm259_vm7, %v8836_v6, %v5149_v45  ;;  %v5084_v13 = vunpack.i.h.bf16 %v7843_v17  ;;  %v3445_v30 = vsel %vm2394_vm6, %v5089_v59, %v5163_v21 }
 0xd42   :  { %4214 = vmatpush.msra.mxu1 %v3801_v32  ;;  %v3443_v39 = vsel %vm2394_vm6, %v5099_v47, %v5164_v7  ;;  %v5179_v32 = vunpack.i.h.bf16 %v8040_v26  ;;  %v5178_v40 = vunpack.i.l.bf16 %v8040_v26  ;;  %v5189_v51 = vunpack.i.h.bf16 %v5187_v49 }
 0xd43   :  { %4187 = vmatpush.msra.mxu0 %v3529_v20  ;;  %v3717_v45 = vsel %vm219_vm8, %v8842_v0, %v5084_v13 }
 0xd44   :  { %4215 = vmatpush.msra.mxu1 %v3799_v44  ;;  %v3954_v26 = vsel %vm89_vm12, %v5178_v40, %v5179_v32 }
 0xd45   :  { %4602 = vmatmul.msk.f32.gmra.mxu0 %vm3075_vm13, %v7784_v25  ;;  %4116 = vmatmul.f32.gmra.mxu1 %v7493_v14  ;;  %v5152_v3 = vpop.permute.xlu1 %5151  ;;  %v8839_v14 = vunpack.i.h.bf16 %v7802_v52  ;;  %v5124_v52 = vunpack.i.h.bf16 %v7990_v24 }
 0xd46   :  { %v5154_v1 = vunpack.i.h.bf16 %v5152_v3  ;;  %v5153_v33 = vunpack.i.l.bf16 %v5152_v3  ;;  %v5157_v57 = vpop.permute.xlu0 %5156  ;;  %4188 = vmatpush.msra.mxu0 %v3527_v10  ;;  %v5188_v10 = vunpack.i.l.bf16 %v5187_v49 }
 0xd47   :  { %v5159_v63 = vunpack.i.h.bf16 %v5157_v57  ;;  %v5158_v56 = vunpack.i.l.bf16 %v5157_v57  ;;  %v3377_v44 = vsel %vm889_vm11, %v5103_v2, %v5124_v52  ;;  %v8845_v2 = vunpack.i.l.bf16 %v7843_v17 }
 0xd48   :  { %v3797_v18 = vsel %vm259_vm7, %v8838_v12, %v5153_v33  ;;  %v3795_v15 = vsel %vm259_vm7, %v8840_v46, %v5154_v1  ;;  %v5202_v8 = vpop.permute.xlu2 %5201  ;;  %v3955_v12 = vsel %vm89_vm12, %v5179_v32, %v5189_v51 }
 0xd49   :  { %v3449_v35 = vsel %vm2394_vm6, %v8839_v14, %v5158_v56  ;;  %4216 = vmatpush.msra.mxu1 %v3797_v18  ;;  %v3447_v62 = vsel %vm2394_vm6, %v8841_v58, %v5159_v63  ;;  %v5203_v63 = vunpack.i.l.bf16 %v5202_v8  ;;  %v5204_v7 = vunpack.i.h.bf16 %v5202_v8 }
 0xd4a   :  { %4189 = vmatpush.msra.mxu0 %v3449_v35 }
 0xd4b   :  { %4217 = vmatpush.msra.mxu1 %v3795_v15  ;;  %v3953_v18 = vsel %vm89_vm12, %v5188_v10, %v5203_v63 }
 0xd4c   :  { %4190 = vmatpush.msra.mxu0 %v3447_v62 }
 0xd4d   :  { %4119 = vmatmul.f32.gmra.mxu1 %v7563_v61  ;;  %v5167_v42 = vpop.permute.xlu1 %5166 }
 0xd4e   :  { %v5169_v43 = vunpack.i.h.bf16 %v5167_v42  ;;  %v5168_v34 = vunpack.i.l.bf16 %v5167_v42  ;;  %v5172_v9 = vpop.permute.xlu0 %5171  ;;  %4191 = vmatpush.msra.mxu0 %v3445_v30  ;;  %4218 = vmatpush.msra.mxu1 %v3717_v45 }
 0xd4f   :  { %v5174_v55 = vunpack.i.h.bf16 %v5172_v9  ;;  %v5173_v20 = vunpack.i.l.bf16 %v5172_v9 }
 0xd50   :  { %4192 = vmatpush.msra.mxu0 %v3443_v39  ;;  %v3715_v59 = vsel %vm219_vm8, %v8843_v41, %v5168_v34  ;;  %v3713_v47 = vsel %vm219_vm8, %v8844_v29, %v5169_v43 }
 0xd51   :  { %v3956_v6 = vsel %vm89_vm12, %v5173_v20, %v5174_v55  ;;  %4219 = vmatpush.msra.mxu1 %v3715_v59 }
 0xd52   :  { %4164 = vmatpush.msra.mxu2 %v3956_v6  ;;  %4193 = vmatpush.msra.mxu0 %v3377_v44 }
 0xd53   :  { %4220 = vmatpush.msra.mxu1 %v3713_v47 }
 0xd54   :  { %4165 = vmatpush.msra.mxu2 %v3954_v26 }
 0xd55   :  { %v5182_v3 = vpop.permute.xlu1 %5181 }
 0xd56   :  { %v5184_v1 = vunpack.i.h.bf16 %v5182_v3  ;;  %v5183_v33 = vunpack.i.l.bf16 %v5182_v3  ;;  %v3691_v38 = vpop.permute.xlu0 %3690 }
 0xd57   :  { %v3711_v57 = vsel %vm219_vm8, %v8845_v2, %v3691_v38 }
 0xd58   :  { %4221 = vmatpush.msra.mxu1 %v3711_v57  ;;  %v3952_v22 = vsel %vm89_vm12, %v5184_v1, %v5188_v10  ;;  %v3957_v56 = vsel %vm89_vm12, %v5174_v55, %v5183_v33  ;;  %v3163_v49 = vpop.f32.mrf.mxu2  ;;  %v3068_v57 = vpop.permute.xlu2 %3067 }
 0xd59   :  { %4166 = vmatpush.msra.mxu2 %v3952_v22  ;;  %4251 = vmatpush.msra.mxu3 %v3957_v56 }
 0xd5a   :  { %4222 = vmatpush.msra.mxu1 %v7068_v11 }
 0xd5b   :  { %4252 = vmatpush.msra.mxu3 %v3955_v12 }
 0xd5c   :  { %4223 = vmatpush.msra.mxu1 %v7074_v23 }
 0xd5d   :  { %v5192_v17 = vpop.permute.xlu1 %5191  ;;  %4253 = vmatpush.msra.mxu3 %v3953_v18 }
 0xd5e   :  { %v5194_v21 = vunpack.i.h.bf16 %v5192_v17  ;;  %v5193_v14 = vunpack.i.l.bf16 %v5192_v17  ;;  %v5197_v35 = vpop.permute.xlu0 %5196  ;;  %4224 = vmatpush.msra.mxu1 %v7060_v48 }
 0xd5f   :  { %v5199_v46 = vunpack.i.h.bf16 %v5197_v35  ;;  %v5198_v15 = vunpack.i.l.bf16 %v5197_v35 }
 0xd60   :  { %4225 = vmatpush.msra.mxu1 %v7050_v54  ;;  %v3375_v11 = vsel %vm889_vm11, %v5113_v27, %v5193_v14  ;;  %v3373_v48 = vsel %vm889_vm11, %v5118_v19, %v5194_v21  ;;  %v5222_v27 = vld [vmem:[%s8358_s3 + $0x18] sm:$0xff]  ;;  %v3134_v19 = vpop.f32.mrf.mxu1  ;;  %v3166_v62 = vpop.f32.mrf.mxu2 }
 0xd61   :  { %v3950_v23 = vsel %vm89_vm12, %v5198_v15, %v5199_v46  ;;  %4194 = vmatpush.msra.mxu0 %v3375_v11  ;;  %v3951_v13 = vsel %vm89_vm12, %v5199_v46, %v5204_v7  ;;  %4226 = vmatmul.f32.vlgmr.msra.gmra.mxu1 %v7628_v28  ;;  %v5221_v28 = vld [vmem:[%s8358_s3] sm:$0xff] }
 0xd62   :  { %4167 = vmatpush.msra.mxu2 %v3950_v23  ;;  %4254 = vmatpush.msra.mxu3 %v3951_v13 }
 0xd63   :  { %4603 = vmatmul.msk.f32.vlgmr.msra.gmra.mxu2 %vm3075_vm13, %v7640_v4  ;;  %4195 = vmatpush.msra.mxu0 %v3373_v48 }
 0xd64   :  { %4607 = vmatmul.msk.f32.vlgmr.msra.gmra.mxu3 %vm3075_vm13, %v7640_v4 }
 0xd65   :  { %v3351_v54 = vpop.permute.xlu1 %3350 }
 0xd66   :  { %v3371_v16 = vsel %vm889_vm11, %v5123_v37, %v3351_v54  ;;  %v5223_v37 = vld [vmem:[%s8358_s3 + $0x30] sm:$0xff]  ;;  %v3073_v29 = vpop.permute.xlu0 %3072 }
 0xd67   :  { %4196 = vmatpush.msra.mxu0 %v3371_v16 }
 0xd68   :  { %4197 = vmatmul.f32.vlgmr.msra.gmra.mxu0 %v5221_v28  ;;  %v3137_v58 = vpop.f32.mrf.mxu1  ;;  %v3169_v0 = vpop.f32.mrf.mxu2 }
 0xd69   :  { %4229 = vmatmul.f32.gmra.mxu1 %v7686_v5  ;;  %v3105_v5 = vpop.f32.mrf.mxu0 }
 0xd6b   :  { %4604 = vmatmul.msk.f32.gmra.mxu2 %vm3075_vm13, %v7691_v53 }
 0xd6c   :  { %4608 = vmatmul.msk.f32.gmra.mxu3 %vm3075_vm13, %v7691_v53 }
 0xd6d   :  { %v8132_v4 = vpop.permute.xlu1 %4079 }
 0xd6e   :  { %v3063_v51 = vpop.permute.xlu0 %3062 }
 0xd70   :  { %4200 = vmatmul.f32.gmra.mxu0 %v5222_v27  ;;  %v3140_v30 = vpop.f32.mrf.mxu1  ;;  %v8162_v9 = vpop.f32.mrf.mxu2 }
 0xd71   :  { %4232 = vmatmul.f32.gmra.mxu1 %v7731_v36  ;;  %v3108_v52 = vpop.f32.mrf.mxu0  ;;  %v4075_v27 = vpop.permute.xlu2 %4074 }
 0xd72   :  { %v3109_v38 = vadd.f32 %v3108_v52, %v3063_v51 }
 0xd73   :  { %4605 = vmatmul.msk.f32.gmra.mxu2 %vm3075_vm13, %v7736_v31 }
 0xd74   :  { %4609 = vmatmul.msk.f32.gmra.mxu3 %vm3075_vm13, %v7736_v31  ;;  %v8156_v31 = vpop.f32.mrf.mxu3  ;;  %v3138_v12 = vadd.f32 %v3137_v58, %v3109_v38 }
 0xd75   :  { %v8142_v60 = vpop.permute.xlu1 %3057 }
 0xd76   :  { %v3106_v53 = vadd.f32 %v3105_v5, %v8142_v60  ;;  %v4070_v18 = vpop.permute.xlu0 %4069  ;;  %v8184_v7 = vadd.f32 %v3166_v62, %v3138_v12 }
 0xd78   :  { %v3135_v24 = vadd.f32 %v3134_v19, %v3106_v53  ;;  %4203 = vmatmul.f32.gmra.mxu0 %v5223_v37  ;;  %v8158_v43 = vpop.f32.mrf.mxu1  ;;  %v3264_v53 = vmax.f32 %v8184_v7, 0.0 }
 0xd79   :  { %4235 = vmatmul.f32.gmra.mxu1 %v7779_v50  ;;  %v3111_v45 = vpop.f32.mrf.mxu0 }
 0xd7a   :  { %v8149_v36 = vadd.f32 %v3163_v49, %v3135_v24  ;;  %v3112_v28 = vadd.f32 %v3111_v45, %v3068_v57 }
 0xd7b   :  { %4606 = vmatmul.msk.f32.gmra.mxu2 %vm3075_vm13, %v7784_v25 }
 0xd7c   :  { %4610 = vmatmul.msk.f32.gmra.mxu3 %vm3075_vm13, %v7784_v25  ;;  %v3195_v42 = vpop.f32.mrf.mxu3  ;;  %v3141_v49 = vadd.f32 %v3140_v30, %v3112_v28 }
 0xd7d   :  { %v3196_v63 = vadd.f32 %v3195_v42, %v3063_v51 }
 0xd7e   :  { %v8199_v45 = vadd.f32 %v3169_v0, %v3141_v49 }
 0xd80   :  { %4206 = vmatmul.f32.gmra.mxu0 %v7563_v61 }
 0xd81   :  { %v8160_v34 = vpop.f32.mrf.mxu0 }
 0xd82   :  { %v3115_v0 = vadd.f32 %v8160_v34, %v3073_v29  ;;  %v4065_v34 = vpop.permute.xlu2 %4064 }
 0xd84   :  { %v3198_v50 = vpop.f32.mrf.mxu3 }
 0xd85   :  { %v3199_v11 = vadd.f32 %v3198_v50, %v3068_v57  ;;  %v3266_v57 = vmax.f32 %v8199_v45, 0.0 }
 0xd8c   :  { %v3201_v39 = vpop.f32.mrf.mxu3 }
 0xd8d   :  { %v3202_v30 = vadd.f32 %v3201_v39, %v3073_v29 }
 0xd9e   :  { %v8168_v32 = vpop.f32.mrf.mxu2 }
 0xda6   :  { %v3224_v41 = vpop.f32.mrf.mxu2 }
 0xda7   :  { %v3225_v17 = vadd.f32 %v3224_v41, %v3196_v63 }
 0xda8   :  { %v8170_v40 = vpop.f32.mrf.mxu3 }
 0xdaa   :  { %v8166_v61 = vpop.f32.mrf.mxu0 }
 0xdae   :  { %v3227_v47 = vpop.f32.mrf.mxu2 }
 0xdaf   :  { %v3228_v5 = vadd.f32 %v3227_v47, %v3199_v11 }
 0xdb0   :  { %v4143_v59 = vpop.f32.mrf.mxu3 }
 0xdb1   :  { %v8164_v25 = vpop.f32.mrf.mxu1 }
 0xdb2   :  { %v3253_v20 = vpop.f32.mrf.mxu0 }
 0xdb3   :  { %v8182_v35 = vadd.f32 %v3253_v20, %v3225_v17 }
 0xdb5   :  { %v3265_v23 = vmax.f32 %v8182_v35, 0.0 }
 0xdb6   :  { %v3230_v10 = vpop.f32.mrf.mxu2 }
 0xdb7   :  { %v4305_v58 = vadd.f32 %v3265_v23, %v3264_v53  ;;  %v3231_v63 = vadd.f32 %v3230_v10, %v3202_v30  ;;  %v3262_v30 = vmax.f32 %v8149_v36, 0.0 }
 0xdb8   :  { %v4146_v26 = vpop.f32.mrf.mxu3 }
 0xdb9   :  { %v4114_v55 = vpop.f32.mrf.mxu1 }
 0xdba   :  { %v3256_v44 = vpop.f32.mrf.mxu0  ;;  %v4115_v21 = vadd.f32 %v4114_v55, %v4070_v18 }
 0xdbb   :  { %v8195_v62 = vadd.f32 %v3256_v44, %v3228_v5 }
 0xdbc   :  { %v4144_v46 = vadd.f32 %v4143_v59, %v4115_v21 }
 0xdbd   :  { %v3267_v59 = vmax.f32 %v8195_v62, 0.0 }
 0xdbf   :  { %v4310_v17 = vadd.f32 %v3267_v59, %v3266_v57 }
 0xdc1   :  { %v8172_v1 = vpop.f32.mrf.mxu3 }
 0xdc2   :  { %v4117_v6 = vpop.f32.mrf.mxu1  ;;  %v3259_v3 = vpop.f32.mrf.mxu0 }
 0xdc3   :  { %v4118_v24 = vadd.f32 %v4117_v6, %v4075_v27  ;;  %v8218_v21 = vadd.f32 %v3259_v3, %v3231_v63 }
 0xdc5   :  { %v4147_v20 = vadd.f32 %v4146_v26, %v4118_v24 }
 0xdca   :  { %v4120_v8 = vpop.f32.mrf.mxu1 }
 0xdcb   :  { %v4121_v26 = vadd.f32 %v4120_v8, %v8132_v4  ;;  %v3193_v8 = vadd.f32 %v8156_v31, %v8142_v60 }
 0xdde   :  { %v8174_v33 = vpop.f32.mrf.mxu1 }
 0xde5   :  { %v8176_v2 = vpop.f32.mrf.mxu0 }
 0xde6   :  { %v8178_v22 = vpop.f32.mrf.mxu2  ;;  %v4230_v14 = vpop.f32.mrf.mxu1  ;;  %v4199_v3 = vadd.f32 %v8176_v2, %v4065_v34 }
 0xde7   :  { %v8180_v56 = vpop.f32.mrf.mxu3 }
 0xde8   :  { %v4228_v2 = vadd.f32 %v8174_v33, %v4199_v3 }
 0xded   :  { %v4201_v15 = vpop.f32.mrf.mxu0 }
 0xdee   :  { %v4172_v13 = vpop.f32.mrf.mxu2  ;;  %v4202_v48 = vadd.f32 %v4201_v15, %v4070_v18  ;;  %v4233_v42 = vpop.f32.mrf.mxu1  ;;  %v3144_v18 = vadd.f32 %v8158_v43, %v3115_v0  ;;  %v4112_v15 = vadd.f32 %v8164_v25, %v4065_v34  ;;  %v4150_v43 = vadd.f32 %v8172_v1, %v4121_v26 }
 0xdef   :  { %v8187_v54 = vadd.f32 %v4172_v13, %v4144_v46  ;;  %v4259_v16 = vpop.f32.mrf.mxu3 }
 0xdf0   :  { %v4231_v19 = vadd.f32 %v4230_v14, %v4202_v48  ;;  %v8221_v29 = vadd.f32 %v8162_v9, %v3144_v18  ;;  %v3269_v48 = vmax.f32 %v8218_v21, 0.0  ;;  %v4141_v24 = vadd.f32 %v8170_v40, %v4112_v15 }
 0xdf1   :  { %v4270_v37 = vmax.f32 %v8187_v54, 0.0 }
 0xdf2   :  { %v8197_v52 = vadd.f32 %v4259_v16, %v4231_v19  ;;  %v3268_v60 = vmax.f32 %v8221_v29, 0.0 }
 0xdf3   :  { %v4306_v50 = vadd.f32 %v4305_v58, %v4270_v37 }
 0xdf4   :  { %v4271_v55 = vmax.f32 %v8197_v52, 0.0  ;;  %v4315_v49 = vadd.f32 %v3269_v48, %v3268_v60 }
 0xdf5   :  { %v4204_v41 = vpop.f32.mrf.mxu0 }
 0xdf6   :  { %v4307_v6 = vadd.f32 %v4306_v50, %v4271_v55  ;;  %v4175_v44 = vpop.f32.mrf.mxu2  ;;  %v4205_v47 = vadd.f32 %v4204_v41, %v4075_v27  ;;  %v4236_v13 = vpop.f32.mrf.mxu1  ;;  %v3222_v27 = vadd.f32 %v8168_v32, %v3193_v8 }
 0xdf7   :  { %v8207_v51 = vadd.f32 %v4175_v44, %v4147_v20  ;;  %v4262_v38 = vpop.f32.mrf.mxu3  ;;  %v4257_v20 = vadd.f32 %v8180_v56, %v4228_v2 }
 0xdf8   :  { %v4234_v12 = vadd.f32 %v4233_v42, %v4205_v47  ;;  %4308 = vadd.xlane.f32.xlu2 %v4307_v6  ;;  %v8233_v25 = vadd.f32 %v8166_v61, %v3222_v27 }
 0xdf9   :  { %v4272_v39 = vmax.f32 %v8207_v51, 0.0  ;;  %v4269_v44 = vmax.f32 %v4257_v20, 0.0 }
 0xdfa   :  { %v4263_v14 = vadd.f32 %v4262_v38, %v4234_v12  ;;  %v3263_v50 = vmax.f32 %v8233_v25, 0.0 }
 0xdfb   :  { %v4311_v10 = vadd.f32 %v4310_v17, %v4272_v39 }
 0xdfc   :  { %v4273_v46 = vmax.f32 %v4263_v14, 0.0  ;;  %v4300_v6 = vadd.f32 %v3263_v50, %v3262_v30 }
 0xdfd   :  { %v4207_v11 = vpop.f32.mrf.mxu0 }
 0xdfe   :  { %v4312_v16 = vadd.f32 %v4311_v10, %v4273_v46  ;;  %v4178_v28 = vpop.f32.mrf.mxu2  ;;  %v4208_v9 = vadd.f32 %v4207_v11, %v8132_v4  ;;  %v4170_v4 = vadd.f32 %v8178_v22, %v4141_v24 }
 0xdff   :  { %v4179_v5 = vadd.f32 %v4178_v28, %v4150_v43  ;;  %v4265_v19 = vpop.f32.mrf.mxu3 }
 0xe00   :  { %v4237_v31 = vadd.f32 %v4236_v13, %v4208_v9  ;;  %4313 = vadd.xlane.f32.xlu0 %v4312_v16  ;;  %v4268_v61 = vmax.f32 %v4170_v4, 0.0  ;;  %v4530_v4 = vld [vmem:[%s8360_s6] sm:$0x3] }
 0xe01   :  { %v4274_v1 = vmax.f32 %v4179_v5, 0.0 }
 0xe02   :  { %v4266_v58 = vadd.f32 %v4265_v19, %v4237_v31  ;;  %v4301_v40 = vadd.f32 %v4300_v6, %v4268_v61 }
 0xe03   :  { %v4316_v42 = vadd.f32 %v4315_v49, %v4274_v1 }
 0xe04   :  { %v4275_v32 = vmax.f32 %v4266_v58, 0.0  ;;  %v4302_v47 = vadd.f32 %v4301_v40, %v4269_v44 }
 0xe06   :  { %v4317_v41 = vadd.f32 %v4316_v42, %v4275_v32  ;;  %v4449_v42 = vld [vmem:[%s8360_s6] sm:$0x3] }
 0xe08   :  { %4318 = vadd.xlane.f32.xlu1 %v4317_v41 }
 0xe10   :  { %4303 = vadd.xlane.f32.xlu1 %v4302_v47 }
 0xe6b   :  { %v4309_v33 = vpop.xlane.xlu2 %4308 }
 0xe6c   :  { %v4321_v51 = vmul.f32 0.001953125, %v4309_v33 }
 0xe6e   :  { %v8243_v22 = vsub.f32 %v3264_v53, %v4321_v51  ;;  %v8247_v38 = vsub.f32 %v3265_v23, %v4321_v51  ;;  %v8251_v36 = vsub.f32 %v4270_v37, %v4321_v51  ;;  %v8255_v56 = vsub.f32 %v4271_v55, %v4321_v51 }
 0xe70   :  { %v4344_v0 = vmul.f32 %v8243_v22, %v8243_v22  ;;  %v4345_v7 = vmul.f32 %v8247_v38, %v8247_v38  ;;  %v4346_v53 = vmul.f32 %v8251_v36, %v8251_v36  ;;  %v4347_v54 = vmul.f32 %v8255_v56, %v8255_v56 }
 0xe72   :  { %v4361_v35 = vadd.f32 %v4345_v7, %v4344_v0 }
 0xe73   :  { %v4314_v23 = vpop.xlane.xlu0 %4313 }
 0xe74   :  { %v4322_v63 = vmul.f32 0.001953125, %v4314_v23  ;;  %v4362_v37 = vadd.f32 %v4361_v35, %v4346_v53 }
 0xe76   :  { %v8267_v52 = vsub.f32 %v3266_v57, %v4322_v63  ;;  %v8271_v55 = vsub.f32 %v3267_v59, %v4322_v63  ;;  %v8273_v12 = vsub.f32 %v4272_v39, %v4322_v63  ;;  %v4363_v26 = vadd.f32 %v4362_v37, %v4347_v54 }
 0xe77   :  { %v8275_v18 = vsub.f32 %v4273_v46, %v4322_v63 }
 0xe78   :  { %4364 = vadd.xlane.f32.xlu1 %v4363_v26  ;;  %v4348_v17 = vmul.f32 %v8267_v52, %v8267_v52  ;;  %v4349_v21 = vmul.f32 %v8271_v55, %v8271_v55  ;;  %v4350_v45 = vmul.f32 %v8273_v12, %v8273_v12 }
 0xe79   :  { %v4351_v59 = vmul.f32 %v8275_v18, %v8275_v18 }
 0xe7a   :  { %v4366_v57 = vadd.f32 %v4349_v21, %v4348_v17 }
 0xe7b   :  { %v4319_v14 = vpop.xlane.xlu1 %4318 }
 0xe7c   :  { %v4323_v62 = vmul.f32 0.001953125, %v4319_v14  ;;  %v4367_v39 = vadd.f32 %v4366_v57, %v4350_v45 }
 0xe7e   :  { %v8285_v34 = vsub.f32 %v3268_v60, %v4323_v62  ;;  %v8287_v29 = vsub.f32 %v3269_v48, %v4323_v62  ;;  %v8289_v10 = vsub.f32 %v4274_v1, %v4323_v62  ;;  %v4368_v46 = vadd.f32 %v4367_v39, %v4351_v59 }
 0xe7f   :  { %v8291_v8 = vsub.f32 %v4275_v32, %v4323_v62 }
 0xe80   :  { %4369 = vadd.xlane.f32.xlu2 %v4368_v46  ;;  %v4352_v15 = vmul.f32 %v8285_v34, %v8285_v34  ;;  %v4353_v43 = vmul.f32 %v8287_v29, %v8287_v29  ;;  %v4354_v11 = vmul.f32 %v8289_v10, %v8289_v10 }
 0xe81   :  { %v4355_v48 = vmul.f32 %v8291_v8, %v8291_v8 }
 0xe82   :  { %v4371_v13 = vadd.f32 %v4353_v43, %v4352_v15 }
 0xe83   :  { %v4304_v3 = vpop.xlane.xlu1 %4303 }
 0xe84   :  { %v4320_v16 = vmul.f32 0.001953125, %v4304_v3  ;;  %v4372_v28 = vadd.f32 %v4371_v13, %v4354_v11 }
 0xe86   :  { %v8301_v9 = vsub.f32 %v3262_v30, %v4320_v16  ;;  %v8303_v27 = vsub.f32 %v3263_v50, %v4320_v16  ;;  %v8305_v5 = vsub.f32 %v4268_v61, %v4320_v16  ;;  %v4373_v19 = vadd.f32 %v4372_v28, %v4355_v48 }
 0xe87   :  { %v8307_v60 = vsub.f32 %v4269_v44, %v4320_v16 }
 0xe88   :  { %4374 = vadd.xlane.f32.xlu0 %v4373_v19  ;;  %v4340_v31 = vmul.f32 %v8301_v9, %v8301_v9  ;;  %v4341_v25 = vmul.f32 %v8303_v27, %v8303_v27  ;;  %v4342_v1 = vmul.f32 %v8305_v5, %v8305_v5 }
 0xe89   :  { %v4343_v49 = vmul.f32 %v8307_v60, %v8307_v60 }
 0xe8a   :  { %v4356_v24 = vadd.f32 %v4341_v25, %v4340_v31 }
 0xe8c   :  { %v4357_v2 = vadd.f32 %v4356_v24, %v4342_v1 }
 0xe8e   :  { %v4358_v58 = vadd.f32 %v4357_v2, %v4343_v49 }
 0xe90   :  { %4359 = vadd.xlane.f32.xlu0 %v4358_v58 }
 0xe91   :  { %4533 = vperm.xlu1 %4724, %v4530_v4  }
 0xe98   :  { %4452 = vperm.xlu2 %4723, %v4449_v42  }
 0xeeb   :  { %v4365_v32 = vpop.xlane.xlu1 %4364 }
 0xeec   :  { %v4377_v50 = vmul.f32 0.001953125, %v4365_v32 }
 0xeee   :  { %v4381_v20 = vadd.f32 1e-05, %v4377_v50 }
 0xef0   :  { %5213 = vrsqrt.f32 %v4381_v20  ;;  %vm4400_vm15 = vweird.f32 %v4381_v20 }
 0xef3   :  { %v4370_v41 = vpop.xlane.xlu2 %4369 }
 0xef4   :  { %v4378_v30 = vmul.f32 0.001953125, %v4370_v41 }
 0xef6   :  { %v4382_v61 = vadd.f32 1e-05, %v4378_v30  ;;  %v5214_v44 = vpop.eup %5213 }
 0xef7   :  { %v4395_v51 = vmul.f32 %v5214_v44, %v4381_v20  ;;  %vm4401_vm9 = vweird.f32 %v5214_v44 }
 0xef8   :  { %5215 = vrsqrt.f32 %v4382_v61  ;;  %vm4410_vm10 = vweird.f32 %v4382_v61  ;;  %vm4402_vm0 = vmor %vm4400_vm15, %vm4401_vm9 }
 0xef9   :  { %v4396_v53 = vmul.f32 %v5214_v44, %v4395_v51 }
 0xefb   :  { %v4375_v6 = vpop.xlane.xlu0 %4374  ;;  %v4397_v26 = vmul.f32 0.5, %v4396_v53  ;;  %v4453_v32 = vpop.permute.xlu2 %4452 }
 0xefc   :  { %v4379_v40 = vmul.f32 0.001953125, %v4375_v6 }
 0xefd   :  { %v4398_v57 = vsub.f32 1.5, %v4397_v26 }
 0xefe   :  { %v5216_v47 = vpop.eup %5215  ;;  %v4383_v33 = vadd.f32 1e-05, %v4379_v40 }
 0xeff   :  { %v4405_v0 = vmul.f32 %v5216_v47, %v4382_v61  ;;  %vm4411_vm7 = vweird.f32 %v5216_v47  ;;  %v4399_v46 = vmul.f32 %v5214_v44, %v4398_v57 }
 0xf00   :  { %5217 = vrsqrt.f32 %v4383_v33  ;;  %vm4412_vm11 = vmor %vm4410_vm10, %vm4411_vm7  ;;  %vm4420_vm12 = vweird.f32 %v4383_v33 }
 0xf01   :  { %v4406_v7 = vmul.f32 %v5216_v47, %v4405_v0  ;;  %v4403_v19 = vsel %vm4402_vm0, %v5214_v44, %v4399_v46 }
 0xf02   :  { %v4442_v24 = vmul.f32 %v4403_v19, %v8243_v22  ;;  %v4524_v49 = vmul.f32 %v4403_v19, %v8255_v56  ;;  %v4529_v22 = vld [vmem:[%s8361_s5] sm:$0x3] }
 0xf03   :  { %v4360_v35 = vpop.xlane.xlu0 %4359  ;;  %v4407_v63 = vmul.f32 0.5, %v4406_v7 }
 0xf04   :  { %v4376_v23 = vmul.f32 0.001953125, %v4360_v35 }
 0xf05   :  { %v4408_v21 = vsub.f32 1.5, %v4407_v63 }
 0xf06   :  { %v5218_v54 = vpop.eup %5217  ;;  %v4380_v37 = vadd.f32 1e-05, %v4376_v23 }
 0xf07   :  { %v4415_v17 = vmul.f32 %v5218_v54, %v4383_v33  ;;  %v4409_v62 = vmul.f32 %v5216_v47, %v4408_v21  ;;  %vm4421_vm8 = vweird.f32 %v5218_v54 }
 0xf08   :  { %5219 = vrsqrt.f32 %v4380_v37  ;;  %vm4422_vm14 = vmor %vm4420_vm12, %vm4421_vm8  ;;  %vm4390_vm2 = vweird.f32 %v4380_v37 }
 0xf09   :  { %v4416_v45 = vmul.f32 %v5218_v54, %v4415_v17  ;;  %v4413_v3 = vsel %vm4412_vm11, %v5216_v47, %v4409_v62 }
 0xf0a   :  { %v4444_v31 = vmul.f32 %v4413_v3, %v8267_v52  ;;  %v4526_v25 = vmul.f32 %v4413_v3, %v8275_v18  ;;  %v4448_v18 = vld [vmem:[%s8361_s5] sm:$0x3]  ;;  %v4525_v42 = vmul.f32 %v4413_v3, %v8273_v12  ;;  %v4534_v12 = vpop.permute.xlu1 %4533 }
 0xf0b   :  { %v4417_v14 = vmul.f32 0.5, %v4416_v45 }
 0xf0d   :  { %v4418_v59 = vsub.f32 1.5, %v4417_v14 }
 0xf0e   :  { %v5220_v39 = vpop.eup %5219 }
 0xf0f   :  { %v4419_v15 = vmul.f32 %v5218_v54, %v4418_v59  ;;  %v4385_v43 = vmul.f32 %v5220_v39, %v4380_v37  ;;  %vm4391_vm1 = vweird.f32 %v5220_v39 }
 0xf10   :  { %vm4392_vm3 = vmor %vm4390_vm2, %vm4391_vm1 }
 0xf11   :  { %v4423_v11 = vsel %vm4422_vm14, %v5218_v54, %v4419_v15  ;;  %v4386_v13 = vmul.f32 %v5220_v39, %v4385_v43 }
 0xf12   :  { %v4446_v16 = vmul.f32 %v4423_v11, %v8285_v34  ;;  %v4528_v48 = vmul.f32 %v4423_v11, %v8291_v8  ;;  %v4447_v56 = vmul.f32 %v4423_v11, %v8287_v29  ;;  %v4527_v4 = vmul.f32 %v4423_v11, %v8289_v10 }
 0xf13   :  { %v4387_v28 = vmul.f32 0.5, %v4386_v13  ;;  %v4523_v29 = vmul.f32 %v4403_v19, %v8251_v36 }
 0xf14   :  { %4470 = vmatpush.msrb.mxu2 %v4446_v16  ;;  %4571 = vmatpush.msrb.mxu0 %v4528_v48 }
 0xf15   :  { %v4388_v1 = vsub.f32 1.5, %v4387_v28 }
 0xf16   :  { %4471 = vmatpush.msrb.mxu2 %v4444_v31  ;;  %4572 = vmatpush.msrb.mxu0 %v4526_v25 }
 0xf17   :  { %v4389_v2 = vmul.f32 %v5220_v39, %v4388_v1 }
 0xf18   :  { %4472 = vmatpush.msrb.mxu2 %v4442_v24  ;;  %4573 = vmatpush.msrb.mxu0 %v4524_v49 }
 0xf19   :  { %v4393_v34 = vsel %vm4392_vm3, %v5220_v39, %v4389_v2 }
 0xf1a   :  { %v4440_v8 = vmul.f32 %v4393_v34, %v8301_v9  ;;  %v4522_v52 = vmul.f32 %v4393_v34, %v8307_v60  ;;  %v4445_v9 = vmul.f32 %v4413_v3, %v8271_v55  ;;  %v4443_v60 = vmul.f32 %v4403_v19, %v8247_v38 }
 0xf1b   :  { %v4441_v58 = vmul.f32 %v4393_v34, %v8303_v27  ;;  %v4521_v55 = vmul.f32 %v4393_v34, %v8305_v5 }
 0xf1c   :  { %4473 = vmatpush.msrb.mxu2 %v4440_v8  ;;  %4574 = vmatpush.msrb.mxu0 %v4522_v52 }
 0xf1d   :  { %4611 = vmatmul.msk.f32.vlgmr.msrb.gmra.mxu2 %vm3075_vm13, %v4448_v18  ;;  %4614 = vmatmul.msk.f32.vlgmr.msrb.gmra.mxu0 %vm3075_vm13, %v4529_v22 }
 0xf1e   :  { %4490 = vmatpush.msra.mxu2 %v4447_v56 }
 0xf20   :  { %4491 = vmatpush.msra.mxu2 %v4445_v9 }
 0xf22   :  { %4492 = vmatpush.msra.mxu2 %v4443_v60 }
 0xf24   :  { %4493 = vmatpush.msra.mxu2 %v4441_v58 }
 0xf25   :  { %4612 = vmatmul.msk.f32.vlgmr.msra.gmra.mxu2 %vm3075_vm13, %v4448_v18 }
 0xf26   :  { %4551 = vmatpush.msrb.mxu2 %v4527_v4 }
 0xf28   :  { %4552 = vmatpush.msrb.mxu2 %v4525_v42 }
 0xf2a   :  { %4553 = vmatpush.msrb.mxu2 %v4523_v29 }
 0xf2c   :  { %4554 = vmatpush.msrb.mxu2 %v4521_v55 }
 0xf2d   :  { %4613 = vmatmul.msk.f32.vlgmr.msrb.gmra.mxu2 %vm3075_vm13, %v4529_v22 }
 0xf9a   :  { %v4576_v10 = vpop.f32.mrf.mxu0 }
 0xf9b   :  { %v4577_v30 = vadd.f32 %v4576_v10, %v4534_v12 }
 0xf9d   :  { %v4581_v5 = vrot.slane %v4577_v30, 6 }
 0xfa0   :  { %v4475_v38 = vpop.f32.mrf.mxu2 }
 0xfa1   :  { %v4476_v20 = vadd.f32 %v4475_v38, %v4453_v32 }
 0xfa8   :  { %v4495_v27 = vpop.f32.mrf.mxu2 }
 0xfa9   :  { %v4496_v50 = vadd.f32 %v4495_v27, %v4453_v32 }
 0xfab   :  { %v4500_v41 = vrot.slane %v4496_v50, 6 }
 0xfad   :  { %v4502_v61 = vsel %vm4501_vm4, %v4476_v20, %v4500_v41 }
 0xfae   :  { %4504 = vst [vmem:[%s8362_s7] sm:$0xf] %v4502_v61 }
 0xfb0   :  { %v4556_v36 = vpop.f32.mrf.mxu2 }
 0xfb1   :  { %v4557_v6 = vadd.f32 %v4556_v36, %v4534_v12 }
 0xfb3   :  { %v4582_v44 = vsel %vm4501_vm4, %v4557_v6, %v4581_v5 }
 0xfb4   :  { %4615 = vst [vmem:[%s8362_s7 + $0x4] sm:$0xf] %v4582_v44 }

</bundles_post_ra>
